<compile_context>
chip_gen: v5e
topology: v5e:2x2
jax: 0.10.0
libtpu: 0.0.40
codegen_flags: <defaults>
</compile_context>

<pallas_src>
import functools

import jax
import jax.numpy as jnp
from jax.experimental import pallas as pl
from jax.experimental.pallas import tpu as pltpu

# --- module constants (small, demo-sized, consistent with the forward) ---
PRETRAINED_VECTOR_SIZE = 32
REDUCED_DIMENSION_SIZE = 16
N_STATES = 4
SIZE_AND_POS_SIZE = 6
GRAPH_HIDDEN = 32
LOGIT_HIDDEN = 32
NUMTOOLS = 10
N_EDGES = 2
N_TIMESEPS = 2

# node-data slab column layout
FEAT_COL = 32          # [states(4) | size_pos(6) | goal_bit(1) | zeros(5)]
FEAT_PAD = 16
MASK_COL = 48


def _round_up(n, m):
    return ((n + m - 1) // m) * m


# ----------------------------------------------------------------------------
# The fused kernel
# ----------------------------------------------------------------------------
def _gaed_kernel(offs, n_timesteps, n_edges, H, npad,
                 adj_ref, nd_ref, p_ref, o_ref, msg_ref):
    f32 = jnp.float32
    E2 = 2 * n_edges

    def mm(a, b):
        return jnp.dot(a, b, preferred_element_type=f32)

    def sigmoid(x):  # EUP tanh-based logistic, robust for large |x|
        return 0.5 * (jnp.tanh(0.5 * x) + 1.0)

    def layer_norm(v, gamma, beta):
        mu = jnp.mean(v, axis=-1, keepdims=True)
        var = jnp.mean(jnp.square(v - mu), axis=-1, keepdims=True)
        return gamma * (v - mu) * jax.lax.rsqrt(var + 1e-5) + beta

    def P(name):  # static slice of the packed parameter slab (zero-cost view)
        r0, nr, nc = offs[name]
        return p_ref[r0:r0 + nr, 0:nc]

    # ---- hoist every parameter read / slice (loop-invariant) ----
    w_rd, b_rd = P("w_rd"), P("b_rd")
    w_init_emb, w_init_feat, b_init = P("w_init_emb"), P("w_init_feat"), P("b_init")
    w_msg, b_msg = P("w_msg"), P("b_msg")                      # (H,2E*H), (1,2E*H)
    w_gru_i, w_gru_h = P("w_gru_i"), P("w_gru_h")              # (2E*H,3H), (H,3H)
    ln_i_g, ln_i_b = P("ln_i_g"), P("ln_i_b")                  # (1,3H)
    ln_h_g, ln_h_b = P("ln_h_g"), P("ln_h_b")
    w_attn_x, w_attn_g, b_attn = P("w_attn_x"), P("w_attn_g"), P("b_attn")
    w_fc1_x, w_fc1_g, b_fc1 = P("w_fc1_x"), P("w_fc1_g"), P("b_fc1")
    w_fc2, b_fc2 = P("w_fc2"), P("b_fc2")

    lig = [ln_i_g[:, g * H:(g + 1) * H] for g in range(3)]
    lib = [ln_i_b[:, g * H:(g + 1) * H] for g in range(3)]
    lhg = [ln_h_g[:, g * H:(g + 1) * H] for g in range(3)]
    lhb = [ln_h_b[:, g * H:(g + 1) * H] for g in range(3)]

    # adjacency blocks [out_0..out_{E-1}, in_0..in_{E-1}], hoisted
    adj = [adj_ref[k * npad:(k + 1) * npad, :] for k in range(E2)]

    # ---- node / goal data (single slab) ----
    nvec = nd_ref[0:npad, 0:PRETRAINED_VECTOR_SIZE]            # (Np, 32)
    feat = nd_ref[0:npad, FEAT_COL:FEAT_COL + FEAT_PAD]        # (Np, 16)
    mask = nd_ref[0:npad, MASK_COL:MASK_COL + 1]               # (Np, 1)
    gae_raw = nd_ref[npad:npad + 1, 0:PRETRAINED_VECTOR_SIZE]  # (1, 32)
    genc_raw = nd_ref[npad + 1:npad + 2, 0:PRETRAINED_VECTOR_SIZE]

    # ---- reduce_dimentionality (shared Linear + Tanh) ----
    genc = jnp.tanh(mm(genc_raw, w_rd) + b_rd)                 # (1, RDS)
    gae = jnp.tanh(mm(gae_raw, w_rd) + b_rd)                   # (1, RDS)
    nemb = jnp.tanh(mm(nvec, w_rd) + b_rd)                     # (Np, RDS)

    # ---- node_init2hidden: torch.cat folded into two dots ----
    h = jnp.tanh(mm(nemb, w_init_emb) + mm(feat, w_init_feat) + b_init)  # (Np, H)

    # ---- GGNN message passing with LayerNorm-GRU propagator ----
    for _ in range(n_timesteps):
        # one lane-dense message transform for all 2E edge types
        s = jnp.tanh(mm(h, w_msg) + b_msg)                     # (Np, 2E*H)
        # adjacency propagation, assembled into a (Np, 2E*H) scratch
        for k in range(E2):
            msg_ref[:, k * H:(k + 1) * H] = mm(adj[k], s[:, k * H:(k + 1) * H])
        msgs = msg_ref[...]                                    # (Np, 2E*H)

        gi = mm(msgs, w_gru_i)                                 # (Np, 3H) one dot
        gh = mm(h, w_gru_h)                                    # (Np, 3H) one dot

        gi_r = layer_norm(gi[:, 0:H],         lig[0], lib[0])
        gi_z = layer_norm(gi[:, H:2 * H],     lig[1], lib[1])
        gi_n = layer_norm(gi[:, 2 * H:3 * H], lig[2], lib[2])
        gh_r = layer_norm(gh[:, 0:H],         lhg[0], lhb[0])
        gh_z = layer_norm(gh[:, H:2 * H],     lhg[1], lhb[1])
        gh_n = layer_norm(gh[:, 2 * H:3 * H], lhg[2], lhb[2])

        r = sigmoid(gi_r + gh_r)
        z = sigmoid(gi_z + gh_z)
        n = jnp.tanh(gi_n + r * gh_n)
        h = (1.0 - z) * n + z * h                              # (Np, H)

    # ---- attention pooling (VPU mul + XLU lane reduce, no N=1 MXU dots) ----
    glogit = jnp.sum(gae * w_attn_g, axis=-1, keepdims=True) + b_attn   # (1, 1)
    logit = jnp.sum(h * w_attn_x, axis=-1, keepdims=True) + glogit      # (Np, 1)
    logit = jnp.where(mask > 0.5, logit, -1e30)
    m = jnp.max(logit, axis=0, keepdims=True)
    e = jnp.exp(logit - m) * mask
    attw = e / jnp.sum(e, axis=0, keepdims=True)               # (Np, 1)
    scene = jnp.sum(attw * h, axis=0, keepdims=True)           # (1, H)

    # ---- decoder MLP (final concat folded via split weights) ----
    h1 = jnp.tanh(mm(scene, w_fc1_x) + mm(genc, w_fc1_g) + b_fc1)
    o_ref[...] = sigmoid(mm(h1, w_fc2) + b_fc2)


# ----------------------------------------------------------------------------
# Parameters
# ----------------------------------------------------------------------------
def init_params(key):
    """Deterministic PyTorch-Linear-style uniform init; weights as (in, out)."""
    keys = iter(jax.random.split(key, 21))

    def uni(shape, fan_in):
        bound = 1.0 / (fan_in ** 0.5)
        return jax.random.uniform(next(keys), shape, jnp.float32, -bound, bound)

    H, E = GRAPH_HIDDEN, N_EDGES
    din_init = REDUCED_DIMENSION_SIZE + N_STATES + SIZE_AND_POS_SIZE + 1
    din_attn = GRAPH_HIDDEN + REDUCED_DIMENSION_SIZE
    return dict(
        w_rd=uni((PRETRAINED_VECTOR_SIZE, REDUCED_DIMENSION_SIZE),
                 PRETRAINED_VECTOR_SIZE),
        b_rd=uni((1, REDUCED_DIMENSION_SIZE), PRETRAINED_VECTOR_SIZE),
        w_init_emb=uni((REDUCED_DIMENSION_SIZE, H), din_init),
        w_init_state=uni((N_STATES, H), din_init),
        w_init_sp=uni((SIZE_AND_POS_SIZE, H), din_init),
        w_init_gb=uni((1, H), din_init),
        b_init=uni((1, H), din_init),
        w_msg_out=uni((E, H, H), H),
        b_msg_out=uni((E, 1, H), H),
        w_msg_in=uni((E, H, H), H),
        b_msg_in=uni((E, 1, H), H),
        w_gru_i=uni((3 * 2 * E, H, H), 2 * E * H),   # [gate r/z/n] x [msg block]
        w_gru_h=uni((3, H, H), H),
        ln_i_g=jnp.ones((3, 1, H), jnp.float32),
        ln_i_b=jnp.zeros((3, 1, H), jnp.float32),
        ln_h_g=jnp.ones((3, 1, H), jnp.float32),
        ln_h_b=jnp.zeros((3, 1, H), jnp.float32),
        w_attn_x=uni((H, 1), din_attn),
        w_attn_g=uni((REDUCED_DIMENSION_SIZE, 1), din_attn),
        b_attn=uni((1, 1), din_attn),
        w_fc1_x=uni((H, LOGIT_HIDDEN), din_attn),
        w_fc1_g=uni((REDUCED_DIMENSION_SIZE, LOGIT_HIDDEN), din_attn),
        b_fc1=uni((1, LOGIT_HIDDEN), din_attn),
        w_fc2=uni((LOGIT_HIDDEN, NUMTOOLS), LOGIT_HIDDEN),
        b_fc2=uni((1, NUMTOOLS), LOGIT_HIDDEN),
    )


# ----------------------------------------------------------------------------
# One-time parameter packing into a single lane-dense (R, 128) slab
# ----------------------------------------------------------------------------
def pack_params(params):
    f32 = jnp.float32
    H, E = GRAPH_HIDDEN, N_EDGES
    E2 = 2 * E
    raw_feat = N_STATES + SIZE_AND_POS_SIZE + 1

    # node_init2hidden feature weight: [states | size_pos | goal_bit | zeros]
    w_init_feat = jnp.concatenate(
        [params["w_init_state"], params["w_init_sp"], params["w_init_gb"],
         jnp.zeros((FEAT_PAD - raw_feat, H), f32)], axis=0)              # (16, H)

    # fused message-transform weight/bias: columns [out_0..out_{E-1}, in_0..in_{E-1}]
    w_msg = jnp.concatenate([params["w_msg_out"][j] for j in range(E)]
                            + [params["w_msg_in"][j] for j in range(E)], axis=1)
    b_msg = jnp.concatenate([params["b_msg_out"][j] for j in range(E)]
                            + [params["b_msg_in"][j] for j in range(E)], axis=1)

    # GRU input-path weight: (3*2E, H, H) indexed [g*2E+k] -> (2E*H, 3H)
    # row = k*H + i, col = g*H + j   (preserves reference [gate, msg-block] order)
    w_gru_i = (params["w_gru_i"].reshape(3, E2, H, H)
               .transpose(1, 2, 0, 3).reshape(E2 * H, 3 * H))
    # GRU hidden-path weight: (3, H, H) -> (H, 3H)
    w_gru_h = params["w_gru_h"].transpose(1, 0, 2).reshape(H, 3 * H)

    ln_i_g = params["ln_i_g"].transpose(1, 0, 2).reshape(1, 3 * H)
    ln_i_b = params["ln_i_b"].transpose(1, 0, 2).reshape(1, 3 * H)
    ln_h_g = params["ln_h_g"].transpose(1, 0, 2).reshape(1, 3 * H)
    ln_h_b = params["ln_h_b"].transpose(1, 0, 2).reshape(1, 3 * H)

    entries = [
        ("w_rd", params["w_rd"]), ("b_rd", params["b_rd"]),
        ("w_init_emb", params["w_init_emb"]), ("w_init_feat", w_init_feat),
        ("b_init", params["b_init"]),
        ("w_msg", w_msg), ("b_msg", b_msg),
        ("w_gru_i", w_gru_i), ("w_gru_h", w_gru_h),
        ("ln_i_g", ln_i_g), ("ln_i_b", ln_i_b),
        ("ln_h_g", ln_h_g), ("ln_h_b", ln_h_b),
        ("w_attn_x", params["w_attn_x"].T), ("w_attn_g", params["w_attn_g"].T),
        ("b_attn", params["b_attn"]),
        ("w_fc1_x", params["w_fc1_x"]), ("w_fc1_g", params["w_fc1_g"]),
        ("b_fc1", params["b_fc1"]),
        ("w_fc2", params["w_fc2"]), ("b_fc2", params["b_fc2"]),
    ]

    blocks, offs, row = [], {}, 0
    for name, a in entries:
        a = jnp.asarray(a, f32)
        r, c = a.shape
        offs[name] = (row, r, c)
        rp = _round_up(r, 8)                         # 8-row-aligned bands
        blocks.append(jnp.pad(a, ((0, rp - r), (0, 128 - c))))
        row += rp
    slab = jnp.concatenate(blocks, axis=0)           # (R, 128), one DMA
    return slab, offs


# ----------------------------------------------------------------------------
# Wrapper: packs node data + adjacency into two slabs, one pallas_call
# ----------------------------------------------------------------------------
def graph_attention_encoder_decoder(adjacency_matrix, node_states, node_ids,
                                    node_vectors, node_size_and_pos,
                                    goal_attention_encoding, goal_encoding,
                                    goal_bits, packed_params, *,
                                    n_timesteps=N_TIMESEPS):
    del node_ids  # original only used len(node_ids); shapes carry that info
    f32 = jnp.float32
    p_slab, offs = packed_params
    H = GRAPH_HIDDEN
    n_nodes = node_vectors.shape[0]
    n_edges = adjacency_matrix.shape[0]
    E2 = 2 * n_edges
    npad = max(_round_up(n_nodes, 8), 8)

    # --- node / goal data slab: one lane-dense (npad+8, 128) operand ---
    nd = jnp.zeros((npad + 8, 128), f32)
    nd = nd.at[0:n_nodes, 0:PRETRAINED_VECTOR_SIZE].set(jnp.asarray(node_vectors, f32))
    nd = nd.at[0:n_nodes, FEAT_COL:FEAT_COL + N_STATES].set(jnp.asarray(node_states, f32))
    nd = nd.at[0:n_nodes,
               FEAT_COL + N_STATES:FEAT_COL + N_STATES + SIZE_AND_POS_SIZE].set(
        jnp.asarray(node_size_and_pos, f32))
    nd = nd.at[0:n_nodes, FEAT_COL + N_STATES + SIZE_AND_POS_SIZE].set(
        jnp.asarray(goal_bits, f32).reshape(n_nodes))
    nd = nd.at[0:n_nodes, MASK_COL].set(1.0)
    nd = nd.at[npad, 0:PRETRAINED_VECTOR_SIZE].set(
        jnp.asarray(goal_attention_encoding, f32).reshape(-1))
    nd = nd.at[npad + 1, 0:PRETRAINED_VECTOR_SIZE].set(
        jnp.asarray(goal_encoding, f32).reshape(-1))

    # --- adjacency slab: [out_0..out_{E-1}, in_0..in_{E-1}] row-stacked ---
    adj = jnp.asarray(adjacency_matrix, f32)
    adj_s = jnp.zeros((E2 * npad, npad), f32)
    for k in range(n_edges):
        adj_s = adj_s.at[k * npad:k * npad + n_nodes, 0:n_nodes].set(adj[k])
        adj_s = adj_s.at[(n_edges + k) * npad:(n_edges + k) * npad + n_nodes,
                         0:n_nodes].set(adj[k].T)

    n_classes = offs["w_fc2"][2]

    # advisory cost hint so XLA can schedule/overlap this tiny custom call
    flops_step = (2 * npad * H * (E2 * H)              # fused message transform
                  + E2 * 2 * npad * npad * H           # adjacency matmuls
                  + 2 * npad * (E2 * H) * (3 * H)      # fused GRU input path
                  + 2 * npad * H * (3 * H))            # fused GRU hidden path
    flops = (n_timesteps * flops_step
             + 2 * (npad + 2) * PRETRAINED_VECTOR_SIZE * REDUCED_DIMENSION_SIZE
             + 2 * npad * (REDUCED_DIMENSION_SIZE + FEAT_PAD) * H
             + 2 * (H + REDUCED_DIMENSION_SIZE) * LOGIT_HIDDEN
             + 2 * LOGIT_HIDDEN * n_classes)
    transcendentals = (n_timesteps * npad * (E2 * H + 3 * H)
                       + (npad + 2) * REDUCED_DIMENSION_SIZE + npad * H
                       + npad + LOGIT_HIDDEN + n_classes)
    bytes_accessed = int(adj_s.size + nd.size + p_slab.size + n_classes) * 4

    vmem_spec = pl.BlockSpec(memory_space=pltpu.MemorySpace.VMEM)
    out = pl.pallas_call(
        functools.partial(_gaed_kernel, offs, n_timesteps, n_edges, H, npad),
        out_shape=jax.ShapeDtypeStruct((1, n_classes), jnp.float32),
        in_specs=[vmem_spec] * 3,
        out_specs=vmem_spec,
        scratch_shapes=[pltpu.VMEM((npad, E2 * H), jnp.float32)],
        compiler_params=pltpu.CompilerParams(vmem_limit_bytes=4 * 1024 * 1024),
        cost_estimate=pl.CostEstimate(flops=int(flops),
                                      transcendentals=int(transcendentals),
                                      bytes_accessed=int(bytes_accessed)),
    )(adj_s, nd, p_slab)
    return out  # shape (1, NUMTOOLS), matching the PyTorch module's output


# ----------------------------------------------------------------------------
# Pure-JAX reference (uses the original, unpacked parameter layout)
# ----------------------------------------------------------------------------
def _reference(adjacency_matrix, node_states, node_vectors, node_size_and_pos,
               goal_attention_encoding, goal_encoding, goal_bits, params,
               n_timesteps):
    f32 = jnp.float32
    adj = jnp.asarray(adjacency_matrix, f32)
    n_edges = adj.shape[0]
    nvec = jnp.asarray(node_vectors, f32)
    nstate = jnp.asarray(node_states, f32)
    nsp = jnp.asarray(node_size_and_pos, f32)
    gbits = jnp.asarray(goal_bits, f32).reshape(-1, 1)
    gae = jnp.asarray(goal_attention_encoding, f32).reshape(1, -1)
    genc = jnp.asarray(goal_encoding, f32).reshape(1, -1)

    def ln(v, g, b):
        mu = v.mean(-1, keepdims=True)
        var = ((v - mu) ** 2).mean(-1, keepdims=True)
        return g * (v - mu) / jnp.sqrt(var + 1e-5) + b

    genc_r = jnp.tanh(genc @ params["w_rd"] + params["b_rd"])
    gae_r = jnp.tanh(gae @ params["w_rd"] + params["b_rd"])
    nemb = jnp.tanh(nvec @ params["w_rd"] + params["b_rd"])
    h = jnp.tanh(nemb @ params["w_init_emb"] + nstate @ params["w_init_state"]
                 + nsp @ params["w_init_sp"] + gbits @ params["w_init_gb"]
                 + params["b_init"])
    for _ in range(n_timesteps):
        msgs = []
        for j in range(n_edges):
            msgs.append(adj[j] @ jnp.tanh(h @ params["w_msg_out"][j]
                                          + params["b_msg_out"][j]))
        for j in range(n_edges):
            msgs.append(adj[j].T @ jnp.tanh(h @ params["w_msg_in"][j]
                                            + params["b_msg_in"][j]))
        gi, gh = [], []
        for g in range(3):
            acc = sum(msgs[k] @ params["w_gru_i"][g * 2 * n_edges + k]
                      for k in range(2 * n_edges))
            gi.append(ln(acc, params["ln_i_g"][g], params["ln_i_b"][g]))
            gh.append(ln(h @ params["w_gru_h"][g],
                         params["ln_h_g"][g], params["ln_h_b"][g]))
        r = jax.nn.sigmoid(gi[0] + gh[0])
        z = jax.nn.sigmoid(gi[1] + gh[1])
        n = jnp.tanh(gi[2] + r * gh[2])
        h = (1.0 - z) * n + z * h
    logit = h @ params["w_attn_x"] + gae_r @ params["w_attn_g"] + params["b_attn"]
    attw = jax.nn.softmax(logit, axis=0)
    scene = attw.T @ h
    h1 = jnp.tanh(scene @ params["w_fc1_x"] + genc_r @ params["w_fc1_g"]
                  + params["b_fc1"])
    return jax.nn.sigmoid(h1 @ params["w_fc2"] + params["b_fc2"])


if __name__ == "__main__":
    key = jax.random.PRNGKey(0)
    kp, ka, ks, kv, ksp, kb, kg1, kg2 = jax.random.split(key, 8)

    n_nodes = 13  # deliberately not a multiple of 8 to exercise padding + mask
    params = init_params(kp)
    packed = pack_params(params)  # pack ONCE; reused across calls

    adjacency_matrix = (jax.random.uniform(ka, (N_EDGES, n_nodes, n_nodes))
                        < 0.3).astype(jnp.float32)
    node_states = jax.random.normal(ks, (n_nodes, N_STATES), jnp.float32)
    node_vectors = jax.random.normal(kv, (n_nodes, PRETRAINED_VECTOR_SIZE),
                                     jnp.float32)
    node_size_and_pos = jax.random.normal(ksp, (n_nodes, SIZE_AND_POS_SIZE),
                                          jnp.float32)
    goal_bits = (jax.random.uniform(kb, (n_nodes, 1)) < 0.2).astype(jnp.float32)
    goal_attention_encoding = jax.random.normal(kg1, (PRETRAINED_VECTOR_SIZE,),
                                                jnp.float32)
    goal_encoding = jax.random.normal(kg2, (PRETRAINED_VECTOR_SIZE,),
                                      jnp.float32)
    node_ids = list(range(n_nodes))  # only used for len() in the original module

    out = graph_attention_encoder_decoder(
        adjacency_matrix, node_states, node_ids, node_vectors,
        node_size_and_pos, goal_attention_encoding, goal_encoding, goal_bits,
        packed)
    out = jax.block_until_ready(out)

    ref = _reference(adjacency_matrix, node_states, node_vectors,
                     node_size_and_pos, goal_attention_encoding, goal_encoding,
                     goal_bits, params, N_TIMESEPS)
    assert out.shape == (1, NUMTOOLS), out.shape
    assert jnp.allclose(out, ref, atol=1e-4, rtol=1e-4), (out, ref)

    print("KERNEL_OK")
</pallas_src>

<mosaic_0001>
module attributes {stable_mosaic.version = 11 : i64} {
  func.func @_gaed_kernel(%arg0: memref<64x16xf32, #tpu.memory_space<vmem>>, %arg1: memref<24x128xf32, #tpu.memory_space<vmem>>, %arg2: memref<432x128xf32, #tpu.memory_space<vmem>>, %arg3: memref<1x10xf32, #tpu.memory_space<vmem>>, %arg4: memref<16x128xf32, #tpu.memory_space<vmem>>) attributes {dimension_semantics = [], scalar_prefetch = 0 : i64, scratch_operands = 1 : i64, tpu.core_type = #tpu.core_type<tc>} {
    %c0 = arith.constant 0 : index
    %c0_0 = arith.constant 0 : index
    %0 = vector.load %arg2[%c0, %c0_0] : memref<432x128xf32, #tpu.memory_space<vmem>>, vector<32x16xf32>
    %c32 = arith.constant 32 : index
    %c0_1 = arith.constant 0 : index
    %1 = vector.load %arg2[%c32, %c0_1] : memref<432x128xf32, #tpu.memory_space<vmem>>, vector<1x16xf32>
    %c40 = arith.constant 40 : index
    %c0_2 = arith.constant 0 : index
    %2 = vector.load %arg2[%c40, %c0_2] : memref<432x128xf32, #tpu.memory_space<vmem>>, vector<16x32xf32>
    %c56 = arith.constant 56 : index
    %c0_3 = arith.constant 0 : index
    %3 = vector.load %arg2[%c56, %c0_3] : memref<432x128xf32, #tpu.memory_space<vmem>>, vector<16x32xf32>
    %c72 = arith.constant 72 : index
    %c0_4 = arith.constant 0 : index
    %4 = vector.load %arg2[%c72, %c0_4] : memref<432x128xf32, #tpu.memory_space<vmem>>, vector<1x32xf32>
    %c80 = arith.constant 80 : index
    %c0_5 = arith.constant 0 : index
    %5 = vector.load %arg2[%c80, %c0_5] : memref<432x128xf32, #tpu.memory_space<vmem>>, vector<32x128xf32>
    %c112 = arith.constant 112 : index
    %c0_6 = arith.constant 0 : index
    %6 = vector.load %arg2[%c112, %c0_6] : memref<432x128xf32, #tpu.memory_space<vmem>>, vector<1x128xf32>
    %c120 = arith.constant 120 : index
    %c0_7 = arith.constant 0 : index
    %7 = vector.load %arg2[%c120, %c0_7] : memref<432x128xf32, #tpu.memory_space<vmem>>, vector<128x96xf32>
    %c248 = arith.constant 248 : index
    %c0_8 = arith.constant 0 : index
    %8 = vector.load %arg2[%c248, %c0_8] : memref<432x128xf32, #tpu.memory_space<vmem>>, vector<32x96xf32>
    %c280 = arith.constant 280 : index
    %c0_9 = arith.constant 0 : index
    %9 = vector.load %arg2[%c280, %c0_9] : memref<432x128xf32, #tpu.memory_space<vmem>>, vector<1x96xf32>
    %c288 = arith.constant 288 : index
    %c0_10 = arith.constant 0 : index
    %10 = vector.load %arg2[%c288, %c0_10] : memref<432x128xf32, #tpu.memory_space<vmem>>, vector<1x96xf32>
    %c296 = arith.constant 296 : index
    %c0_11 = arith.constant 0 : index
    %11 = vector.load %arg2[%c296, %c0_11] : memref<432x128xf32, #tpu.memory_space<vmem>>, vector<1x96xf32>
    %c304 = arith.constant 304 : index
    %c0_12 = arith.constant 0 : index
    %12 = vector.load %arg2[%c304, %c0_12] : memref<432x128xf32, #tpu.memory_space<vmem>>, vector<1x96xf32>
    %c312 = arith.constant 312 : index
    %c0_13 = arith.constant 0 : index
    %13 = vector.load %arg2[%c312, %c0_13] : memref<432x128xf32, #tpu.memory_space<vmem>>, vector<1x32xf32>
    %c320 = arith.constant 320 : index
    %c0_14 = arith.constant 0 : index
    %14 = vector.load %arg2[%c320, %c0_14] : memref<432x128xf32, #tpu.memory_space<vmem>>, vector<1x16xf32>
    %c328 = arith.constant 328 : index
    %c0_15 = arith.constant 0 : index
    %15 = vector.load %arg2[%c328, %c0_15] : memref<432x128xf32, #tpu.memory_space<vmem>>, vector<1x1xf32>
    %c336 = arith.constant 336 : index
    %c0_16 = arith.constant 0 : index
    %16 = vector.load %arg2[%c336, %c0_16] : memref<432x128xf32, #tpu.memory_space<vmem>>, vector<32x32xf32>
    %c368 = arith.constant 368 : index
    %c0_17 = arith.constant 0 : index
    %17 = vector.load %arg2[%c368, %c0_17] : memref<432x128xf32, #tpu.memory_space<vmem>>, vector<16x32xf32>
    %c384 = arith.constant 384 : index
    %c0_18 = arith.constant 0 : index
    %18 = vector.load %arg2[%c384, %c0_18] : memref<432x128xf32, #tpu.memory_space<vmem>>, vector<1x32xf32>
    %c392 = arith.constant 392 : index
    %c0_19 = arith.constant 0 : index
    %19 = vector.load %arg2[%c392, %c0_19] : memref<432x128xf32, #tpu.memory_space<vmem>>, vector<32x10xf32>
    %c424 = arith.constant 424 : index
    %c0_20 = arith.constant 0 : index
    %20 = vector.load %arg2[%c424, %c0_20] : memref<432x128xf32, #tpu.memory_space<vmem>>, vector<1x10xf32>
    %21 = vector.extract_strided_slice %9 {offsets = [0, 0], sizes = [1, 32], strides = [1, 1]} : vector<1x96xf32> to vector<1x32xf32>
    %22 = vector.extract_strided_slice %9 {offsets = [0, 32], sizes = [1, 32], strides = [1, 1]} : vector<1x96xf32> to vector<1x32xf32>
    %23 = vector.extract_strided_slice %9 {offsets = [0, 64], sizes = [1, 32], strides = [1, 1]} : vector<1x96xf32> to vector<1x32xf32>
    %24 = vector.extract_strided_slice %10 {offsets = [0, 0], sizes = [1, 32], strides = [1, 1]} : vector<1x96xf32> to vector<1x32xf32>
    %25 = vector.extract_strided_slice %10 {offsets = [0, 32], sizes = [1, 32], strides = [1, 1]} : vector<1x96xf32> to vector<1x32xf32>
    %26 = vector.extract_strided_slice %10 {offsets = [0, 64], sizes = [1, 32], strides = [1, 1]} : vector<1x96xf32> to vector<1x32xf32>
    %27 = vector.extract_strided_slice %11 {offsets = [0, 0], sizes = [1, 32], strides = [1, 1]} : vector<1x96xf32> to vector<1x32xf32>
    %28 = vector.extract_strided_slice %11 {offsets = [0, 32], sizes = [1, 32], strides = [1, 1]} : vector<1x96xf32> to vector<1x32xf32>
    %29 = vector.extract_strided_slice %11 {offsets = [0, 64], sizes = [1, 32], strides = [1, 1]} : vector<1x96xf32> to vector<1x32xf32>
    %30 = vector.extract_strided_slice %12 {offsets = [0, 0], sizes = [1, 32], strides = [1, 1]} : vector<1x96xf32> to vector<1x32xf32>
    %31 = vector.extract_strided_slice %12 {offsets = [0, 32], sizes = [1, 32], strides = [1, 1]} : vector<1x96xf32> to vector<1x32xf32>
    %32 = vector.extract_strided_slice %12 {offsets = [0, 64], sizes = [1, 32], strides = [1, 1]} : vector<1x96xf32> to vector<1x32xf32>
    %c0_21 = arith.constant 0 : index
    %c0_22 = arith.constant 0 : index
    %33 = vector.load %arg0[%c0_21, %c0_22] : memref<64x16xf32, #tpu.memory_space<vmem>>, vector<16x16xf32>
    %c16 = arith.constant 16 : index
    %c0_23 = arith.constant 0 : index
    %34 = vector.load %arg0[%c16, %c0_23] : memref<64x16xf32, #tpu.memory_space<vmem>>, vector<16x16xf32>
    %c32_24 = arith.constant 32 : index
    %c0_25 = arith.constant 0 : index
    %35 = vector.load %arg0[%c32_24, %c0_25] : memref<64x16xf32, #tpu.memory_space<vmem>>, vector<16x16xf32>
    %c48 = arith.constant 48 : index
    %c0_26 = arith.constant 0 : index
    %36 = vector.load %arg0[%c48, %c0_26] : memref<64x16xf32, #tpu.memory_space<vmem>>, vector<16x16xf32>
    %c0_27 = arith.constant 0 : index
    %c0_28 = arith.constant 0 : index
    %37 = vector.load %arg1[%c0_27, %c0_28] : memref<24x128xf32, #tpu.memory_space<vmem>>, vector<16x32xf32>
    %c0_29 = arith.constant 0 : index
    %c32_30 = arith.constant 32 : index
    %38 = vector.load %arg1[%c0_29, %c32_30] : memref<24x128xf32, #tpu.memory_space<vmem>>, vector<16x16xf32>
    %c0_31 = arith.constant 0 : index
    %c48_32 = arith.constant 48 : index
    %39 = vector.load %arg1[%c0_31, %c48_32] : memref<24x128xf32, #tpu.memory_space<vmem>>, vector<16x1xf32>
    %c16_33 = arith.constant 16 : index
    %c0_34 = arith.constant 0 : index
    %40 = vector.load %arg1[%c16_33, %c0_34] : memref<24x128xf32, #tpu.memory_space<vmem>>, vector<1x32xf32>
    %c17 = arith.constant 17 : index
    %c0_35 = arith.constant 0 : index
    %41 = vector.load %arg1[%c17, %c0_35] : memref<24x128xf32, #tpu.memory_space<vmem>>, vector<1x32xf32>
    %cst = arith.constant dense<0.000000e+00> : vector<1x16xf32>
    %42 = tpu.matmul %41, %0, %cst {dimension_numbers = #tpu.dot_dimension_numbers<[1], [0], [0], [1], [0, 0, 1, 1], [], []>} : vector<1x32xf32>, vector<32x16xf32>, vector<1x16xf32> -> vector<1x16xf32>
    %43 = arith.addf %42, %1 : vector<1x16xf32>
    %44 = math.tanh %43 : vector<1x16xf32>
    %cst_36 = arith.constant dense<0.000000e+00> : vector<1x16xf32>
    %45 = tpu.matmul %40, %0, %cst_36 {dimension_numbers = #tpu.dot_dimension_numbers<[1], [0], [0], [1], [0, 0, 1, 1], [], []>} : vector<1x32xf32>, vector<32x16xf32>, vector<1x16xf32> -> vector<1x16xf32>
    %46 = arith.addf %45, %1 : vector<1x16xf32>
    %47 = math.tanh %46 : vector<1x16xf32>
    %cst_37 = arith.constant dense<0.000000e+00> : vector<16x16xf32>
    %48 = tpu.matmul %37, %0, %cst_37 {dimension_numbers = #tpu.dot_dimension_numbers<[1], [0], [0], [1], [0, 0, 1, 1], [], []>} : vector<16x32xf32>, vector<32x16xf32>, vector<16x16xf32> -> vector<16x16xf32>
    %49 = vector.broadcast %1 : vector<1x16xf32> to vector<16x16xf32>
    %50 = arith.addf %48, %49 : vector<16x16xf32>
    %51 = math.tanh %50 : vector<16x16xf32>
    %cst_38 = arith.constant dense<0.000000e+00> : vector<16x32xf32>
    %52 = tpu.matmul %51, %2, %cst_38 {dimension_numbers = #tpu.dot_dimension_numbers<[1], [0], [0], [1], [0, 0, 1, 1], [], []>} : vector<16x16xf32>, vector<16x32xf32>, vector<16x32xf32> -> vector<16x32xf32>
    %cst_39 = arith.constant dense<0.000000e+00> : vector<16x32xf32>
    %53 = tpu.matmul %38, %3, %cst_39 {dimension_numbers = #tpu.dot_dimension_numbers<[1], [0], [0], [1], [0, 0, 1, 1], [], []>} : vector<16x16xf32>, vector<16x32xf32>, vector<16x32xf32> -> vector<16x32xf32>
    %54 = arith.addf %52, %53 : vector<16x32xf32>
    %55 = vector.broadcast %4 : vector<1x32xf32> to vector<16x32xf32>
    %56 = arith.addf %54, %55 : vector<16x32xf32>
    %57 = math.tanh %56 : vector<16x32xf32>
    %cst_40 = arith.constant dense<0.000000e+00> : vector<16x128xf32>
    %58 = tpu.matmul %57, %5, %cst_40 {dimension_numbers = #tpu.dot_dimension_numbers<[1], [0], [0], [1], [0, 0, 1, 1], [], []>} : vector<16x32xf32>, vector<32x128xf32>, vector<16x128xf32> -> vector<16x128xf32>
    %59 = vector.broadcast %6 : vector<1x128xf32> to vector<16x128xf32>
    %60 = arith.addf %58, %59 : vector<16x128xf32>
    %61 = math.tanh %60 : vector<16x128xf32>
    %62 = vector.extract_strided_slice %61 {offsets = [0, 0], sizes = [16, 32], strides = [1, 1]} : vector<16x128xf32> to vector<16x32xf32>
    %cst_41 = arith.constant dense<0.000000e+00> : vector<16x32xf32>
    %63 = tpu.matmul %33, %62, %cst_41 {dimension_numbers = #tpu.dot_dimension_numbers<[1], [0], [0], [1], [0, 0, 1, 1], [], []>} : vector<16x16xf32>, vector<16x32xf32>, vector<16x32xf32> -> vector<16x32xf32>
    %c0_42 = arith.constant 0 : index
    %c0_43 = arith.constant 0 : index
    %64 = vector.load %arg4[%c0_42, %c0_43] : memref<16x128xf32, #tpu.memory_space<vmem>>, vector<16x32xf32>
    tpu.vector_store %arg4[%c0_42, %c0_43], %63 {strides = array<i32>} : memref<16x128xf32, #tpu.memory_space<vmem>>, vector<16x32xf32>,
    %65 = vector.extract_strided_slice %61 {offsets = [0, 32], sizes = [16, 32], strides = [1, 1]} : vector<16x128xf32> to vector<16x32xf32>
    %cst_44 = arith.constant dense<0.000000e+00> : vector<16x32xf32>
    %66 = tpu.matmul %34, %65, %cst_44 {dimension_numbers = #tpu.dot_dimension_numbers<[1], [0], [0], [1], [0, 0, 1, 1], [], []>} : vector<16x16xf32>, vector<16x32xf32>, vector<16x32xf32> -> vector<16x32xf32>
    %c0_45 = arith.constant 0 : index
    %c32_46 = arith.constant 32 : index
    %67 = vector.load %arg4[%c0_45, %c32_46] : memref<16x128xf32, #tpu.memory_space<vmem>>, vector<16x32xf32>
    tpu.vector_store %arg4[%c0_45, %c32_46], %66 {strides = array<i32>} : memref<16x128xf32, #tpu.memory_space<vmem>>, vector<16x32xf32>,
    %68 = vector.extract_strided_slice %61 {offsets = [0, 64], sizes = [16, 32], strides = [1, 1]} : vector<16x128xf32> to vector<16x32xf32>
    %cst_47 = arith.constant dense<0.000000e+00> : vector<16x32xf32>
    %69 = tpu.matmul %35, %68, %cst_47 {dimension_numbers = #tpu.dot_dimension_numbers<[1], [0], [0], [1], [0, 0, 1, 1], [], []>} : vector<16x16xf32>, vector<16x32xf32>, vector<16x32xf32> -> vector<16x32xf32>
    %c0_48 = arith.constant 0 : index
    %c64 = arith.constant 64 : index
    %70 = vector.load %arg4[%c0_48, %c64] : memref<16x128xf32, #tpu.memory_space<vmem>>, vector<16x32xf32>
    tpu.vector_store %arg4[%c0_48, %c64], %69 {strides = array<i32>} : memref<16x128xf32, #tpu.memory_space<vmem>>, vector<16x32xf32>,
    %71 = vector.extract_strided_slice %61 {offsets = [0, 96], sizes = [16, 32], strides = [1, 1]} : vector<16x128xf32> to vector<16x32xf32>
    %cst_49 = arith.constant dense<0.000000e+00> : vector<16x32xf32>
    %72 = tpu.matmul %36, %71, %cst_49 {dimension_numbers = #tpu.dot_dimension_numbers<[1], [0], [0], [1], [0, 0, 1, 1], [], []>} : vector<16x16xf32>, vector<16x32xf32>, vector<16x32xf32> -> vector<16x32xf32>
    %c0_50 = arith.constant 0 : index
    %c96 = arith.constant 96 : index
    %73 = vector.load %arg4[%c0_50, %c96] : memref<16x128xf32, #tpu.memory_space<vmem>>, vector<16x32xf32>
    tpu.vector_store %arg4[%c0_50, %c96], %72 {strides = array<i32>} : memref<16x128xf32, #tpu.memory_space<vmem>>, vector<16x32xf32>,
    %c0_51 = arith.constant 0 : index
    %c0_52 = arith.constant 0 : index
    %74 = vector.load %arg4[%c0_51, %c0_52] : memref<16x128xf32, #tpu.memory_space<vmem>>, vector<16x128xf32>
    %cst_53 = arith.constant dense<0.000000e+00> : vector<16x96xf32>
    %75 = tpu.matmul %74, %7, %cst_53 {dimension_numbers = #tpu.dot_dimension_numbers<[1], [0], [0], [1], [0, 0, 1, 1], [], []>} : vector<16x128xf32>, vector<128x96xf32>, vector<16x96xf32> -> vector<16x96xf32>
    %cst_54 = arith.constant dense<0.000000e+00> : vector<16x96xf32>
    %76 = tpu.matmul %57, %8, %cst_54 {dimension_numbers = #tpu.dot_dimension_numbers<[1], [0], [0], [1], [0, 0, 1, 1], [], []>} : vector<16x32xf32>, vector<32x96xf32>, vector<16x96xf32> -> vector<16x96xf32>
    %77 = vector.extract_strided_slice %75 {offsets = [0, 0], sizes = [16, 32], strides = [1, 1]} : vector<16x96xf32> to vector<16x32xf32>
    %cst_55 = arith.constant dense<0.000000e+00> : vector<16xf32>
    %78 = vector.multi_reduction <add>, %77, %cst_55 [1] : vector<16x32xf32> to vector<16xf32>
    %79 = vector.shape_cast %78 : vector<16xf32> to vector<16x1xf32>
    %cst_56 = arith.constant 3.200000e+01 : f32
    %80 = vector.broadcast %cst_56 : f32 to vector<16x1xf32>
    %81 = arith.divf %79, %80 : vector<16x1xf32>
    %82 = vector.broadcast %81 : vector<16x1xf32> to vector<16x32xf32>
    %83 = arith.subf %77, %82 : vector<16x32xf32>
    %84 = arith.mulf %83, %83 : vector<16x32xf32>
    %cst_57 = arith.constant dense<0.000000e+00> : vector<16xf32>
    %85 = vector.multi_reduction <add>, %84, %cst_57 [1] : vector<16x32xf32> to vector<16xf32>
    %86 = vector.shape_cast %85 : vector<16xf32> to vector<16x1xf32>
    %cst_58 = arith.constant 3.200000e+01 : f32
    %87 = vector.broadcast %cst_58 : f32 to vector<16x1xf32>
    %88 = arith.divf %86, %87 : vector<16x1xf32>
    %89 = vector.broadcast %81 : vector<16x1xf32> to vector<16x32xf32>
    %90 = arith.subf %77, %89 : vector<16x32xf32>
    %91 = vector.broadcast %21 : vector<1x32xf32> to vector<16x32xf32>
    %92 = arith.mulf %91, %90 : vector<16x32xf32>
    %cst_59 = arith.constant 9.99999974E-6 : f32
    %93 = vector.broadcast %cst_59 : f32 to vector<16x1xf32>
    %94 = arith.addf %88, %93 : vector<16x1xf32>
    %95 = math.rsqrt %94 : vector<16x1xf32>
    %96 = vector.broadcast %95 : vector<16x1xf32> to vector<16x32xf32>
    %97 = arith.mulf %92, %96 : vector<16x32xf32>
    %98 = vector.broadcast %24 : vector<1x32xf32> to vector<16x32xf32>
    %99 = arith.addf %97, %98 : vector<16x32xf32>
    %100 = vector.extract_strided_slice %75 {offsets = [0, 32], sizes = [16, 32], strides = [1, 1]} : vector<16x96xf32> to vector<16x32xf32>
    %cst_60 = arith.constant dense<0.000000e+00> : vector<16xf32>
    %101 = vector.multi_reduction <add>, %100, %cst_60 [1] : vector<16x32xf32> to vector<16xf32>
    %102 = vector.shape_cast %101 : vector<16xf32> to vector<16x1xf32>
    %cst_61 = arith.constant 3.200000e+01 : f32
    %103 = vector.broadcast %cst_61 : f32 to vector<16x1xf32>
    %104 = arith.divf %102, %103 : vector<16x1xf32>
    %105 = vector.broadcast %104 : vector<16x1xf32> to vector<16x32xf32>
    %106 = arith.subf %100, %105 : vector<16x32xf32>
    %107 = arith.mulf %106, %106 : vector<16x32xf32>
    %cst_62 = arith.constant dense<0.000000e+00> : vector<16xf32>
    %108 = vector.multi_reduction <add>, %107, %cst_62 [1] : vector<16x32xf32> to vector<16xf32>
    %109 = vector.shape_cast %108 : vector<16xf32> to vector<16x1xf32>
    %cst_63 = arith.constant 3.200000e+01 : f32
    %110 = vector.broadcast %cst_63 : f32 to vector<16x1xf32>
    %111 = arith.divf %109, %110 : vector<16x1xf32>
    %112 = vector.broadcast %104 : vector<16x1xf32> to vector<16x32xf32>
    %113 = arith.subf %100, %112 : vector<16x32xf32>
    %114 = vector.broadcast %22 : vector<1x32xf32> to vector<16x32xf32>
    %115 = arith.mulf %114, %113 : vector<16x32xf32>
    %cst_64 = arith.constant 9.99999974E-6 : f32
    %116 = vector.broadcast %cst_64 : f32 to vector<16x1xf32>
    %117 = arith.addf %111, %116 : vector<16x1xf32>
    %118 = math.rsqrt %117 : vector<16x1xf32>
    %119 = vector.broadcast %118 : vector<16x1xf32> to vector<16x32xf32>
    %120 = arith.mulf %115, %119 : vector<16x32xf32>
    %121 = vector.broadcast %25 : vector<1x32xf32> to vector<16x32xf32>
    %122 = arith.addf %120, %121 : vector<16x32xf32>
    %123 = vector.extract_strided_slice %75 {offsets = [0, 64], sizes = [16, 32], strides = [1, 1]} : vector<16x96xf32> to vector<16x32xf32>
    %cst_65 = arith.constant dense<0.000000e+00> : vector<16xf32>
    %124 = vector.multi_reduction <add>, %123, %cst_65 [1] : vector<16x32xf32> to vector<16xf32>
    %125 = vector.shape_cast %124 : vector<16xf32> to vector<16x1xf32>
    %cst_66 = arith.constant 3.200000e+01 : f32
    %126 = vector.broadcast %cst_66 : f32 to vector<16x1xf32>
    %127 = arith.divf %125, %126 : vector<16x1xf32>
    %128 = vector.broadcast %127 : vector<16x1xf32> to vector<16x32xf32>
    %129 = arith.subf %123, %128 : vector<16x32xf32>
    %130 = arith.mulf %129, %129 : vector<16x32xf32>
    %cst_67 = arith.constant dense<0.000000e+00> : vector<16xf32>
    %131 = vector.multi_reduction <add>, %130, %cst_67 [1] : vector<16x32xf32> to vector<16xf32>
    %132 = vector.shape_cast %131 : vector<16xf32> to vector<16x1xf32>
    %cst_68 = arith.constant 3.200000e+01 : f32
    %133 = vector.broadcast %cst_68 : f32 to vector<16x1xf32>
    %134 = arith.divf %132, %133 : vector<16x1xf32>
    %135 = vector.broadcast %127 : vector<16x1xf32> to vector<16x32xf32>
    %136 = arith.subf %123, %135 : vector<16x32xf32>
    %137 = vector.broadcast %23 : vector<1x32xf32> to vector<16x32xf32>
    %138 = arith.mulf %137, %136 : vector<16x32xf32>
    %cst_69 = arith.constant 9.99999974E-6 : f32
    %139 = vector.broadcast %cst_69 : f32 to vector<16x1xf32>
    %140 = arith.addf %134, %139 : vector<16x1xf32>
    %141 = math.rsqrt %140 : vector<16x1xf32>
    %142 = vector.broadcast %141 : vector<16x1xf32> to vector<16x32xf32>
    %143 = arith.mulf %138, %142 : vector<16x32xf32>
    %144 = vector.broadcast %26 : vector<1x32xf32> to vector<16x32xf32>
    %145 = arith.addf %143, %144 : vector<16x32xf32>
    %146 = vector.extract_strided_slice %76 {offsets = [0, 0], sizes = [16, 32], strides = [1, 1]} : vector<16x96xf32> to vector<16x32xf32>
    %cst_70 = arith.constant dense<0.000000e+00> : vector<16xf32>
    %147 = vector.multi_reduction <add>, %146, %cst_70 [1] : vector<16x32xf32> to vector<16xf32>
    %148 = vector.shape_cast %147 : vector<16xf32> to vector<16x1xf32>
    %cst_71 = arith.constant 3.200000e+01 : f32
    %149 = vector.broadcast %cst_71 : f32 to vector<16x1xf32>
    %150 = arith.divf %148, %149 : vector<16x1xf32>
    %151 = vector.broadcast %150 : vector<16x1xf32> to vector<16x32xf32>
    %152 = arith.subf %146, %151 : vector<16x32xf32>
    %153 = arith.mulf %152, %152 : vector<16x32xf32>
    %cst_72 = arith.constant dense<0.000000e+00> : vector<16xf32>
    %154 = vector.multi_reduction <add>, %153, %cst_72 [1] : vector<16x32xf32> to vector<16xf32>
    %155 = vector.shape_cast %154 : vector<16xf32> to vector<16x1xf32>
    %cst_73 = arith.constant 3.200000e+01 : f32
    %156 = vector.broadcast %cst_73 : f32 to vector<16x1xf32>
    %157 = arith.divf %155, %156 : vector<16x1xf32>
    %158 = vector.broadcast %150 : vector<16x1xf32> to vector<16x32xf32>
    %159 = arith.subf %146, %158 : vector<16x32xf32>
    %160 = vector.broadcast %27 : vector<1x32xf32> to vector<16x32xf32>
    %161 = arith.mulf %160, %159 : vector<16x32xf32>
    %cst_74 = arith.constant 9.99999974E-6 : f32
    %162 = vector.broadcast %cst_74 : f32 to vector<16x1xf32>
    %163 = arith.addf %157, %162 : vector<16x1xf32>
    %164 = math.rsqrt %163 : vector<16x1xf32>
    %165 = vector.broadcast %164 : vector<16x1xf32> to vector<16x32xf32>
    %166 = arith.mulf %161, %165 : vector<16x32xf32>
    %167 = vector.broadcast %30 : vector<1x32xf32> to vector<16x32xf32>
    %168 = arith.addf %166, %167 : vector<16x32xf32>
    %169 = vector.extract_strided_slice %76 {offsets = [0, 32], sizes = [16, 32], strides = [1, 1]} : vector<16x96xf32> to vector<16x32xf32>
    %cst_75 = arith.constant dense<0.000000e+00> : vector<16xf32>
    %170 = vector.multi_reduction <add>, %169, %cst_75 [1] : vector<16x32xf32> to vector<16xf32>
    %171 = vector.shape_cast %170 : vector<16xf32> to vector<16x1xf32>
    %cst_76 = arith.constant 3.200000e+01 : f32
    %172 = vector.broadcast %cst_76 : f32 to vector<16x1xf32>
    %173 = arith.divf %171, %172 : vector<16x1xf32>
    %174 = vector.broadcast %173 : vector<16x1xf32> to vector<16x32xf32>
    %175 = arith.subf %169, %174 : vector<16x32xf32>
    %176 = arith.mulf %175, %175 : vector<16x32xf32>
    %cst_77 = arith.constant dense<0.000000e+00> : vector<16xf32>
    %177 = vector.multi_reduction <add>, %176, %cst_77 [1] : vector<16x32xf32> to vector<16xf32>
    %178 = vector.shape_cast %177 : vector<16xf32> to vector<16x1xf32>
    %cst_78 = arith.constant 3.200000e+01 : f32
    %179 = vector.broadcast %cst_78 : f32 to vector<16x1xf32>
    %180 = arith.divf %178, %179 : vector<16x1xf32>
    %181 = vector.broadcast %173 : vector<16x1xf32> to vector<16x32xf32>
    %182 = arith.subf %169, %181 : vector<16x32xf32>
    %183 = vector.broadcast %28 : vector<1x32xf32> to vector<16x32xf32>
    %184 = arith.mulf %183, %182 : vector<16x32xf32>
    %cst_79 = arith.constant 9.99999974E-6 : f32
    %185 = vector.broadcast %cst_79 : f32 to vector<16x1xf32>
    %186 = arith.addf %180, %185 : vector<16x1xf32>
    %187 = math.rsqrt %186 : vector<16x1xf32>
    %188 = vector.broadcast %187 : vector<16x1xf32> to vector<16x32xf32>
    %189 = arith.mulf %184, %188 : vector<16x32xf32>
    %190 = vector.broadcast %31 : vector<1x32xf32> to vector<16x32xf32>
    %191 = arith.addf %189, %190 : vector<16x32xf32>
    %192 = vector.extract_strided_slice %76 {offsets = [0, 64], sizes = [16, 32], strides = [1, 1]} : vector<16x96xf32> to vector<16x32xf32>
    %cst_80 = arith.constant dense<0.000000e+00> : vector<16xf32>
    %193 = vector.multi_reduction <add>, %192, %cst_80 [1] : vector<16x32xf32> to vector<16xf32>
    %194 = vector.shape_cast %193 : vector<16xf32> to vector<16x1xf32>
    %cst_81 = arith.constant 3.200000e+01 : f32
    %195 = vector.broadcast %cst_81 : f32 to vector<16x1xf32>
    %196 = arith.divf %194, %195 : vector<16x1xf32>
    %197 = vector.broadcast %196 : vector<16x1xf32> to vector<16x32xf32>
    %198 = arith.subf %192, %197 : vector<16x32xf32>
    %199 = arith.mulf %198, %198 : vector<16x32xf32>
    %cst_82 = arith.constant dense<0.000000e+00> : vector<16xf32>
    %200 = vector.multi_reduction <add>, %199, %cst_82 [1] : vector<16x32xf32> to vector<16xf32>
    %201 = vector.shape_cast %200 : vector<16xf32> to vector<16x1xf32>
    %cst_83 = arith.constant 3.200000e+01 : f32
    %202 = vector.broadcast %cst_83 : f32 to vector<16x1xf32>
    %203 = arith.divf %201, %202 : vector<16x1xf32>
    %204 = vector.broadcast %196 : vector<16x1xf32> to vector<16x32xf32>
    %205 = arith.subf %192, %204 : vector<16x32xf32>
    %206 = vector.broadcast %29 : vector<1x32xf32> to vector<16x32xf32>
    %207 = arith.mulf %206, %205 : vector<16x32xf32>
    %cst_84 = arith.constant 9.99999974E-6 : f32
    %208 = vector.broadcast %cst_84 : f32 to vector<16x1xf32>
    %209 = arith.addf %203, %208 : vector<16x1xf32>
    %210 = math.rsqrt %209 : vector<16x1xf32>
    %211 = vector.broadcast %210 : vector<16x1xf32> to vector<16x32xf32>
    %212 = arith.mulf %207, %211 : vector<16x32xf32>
    %213 = vector.broadcast %32 : vector<1x32xf32> to vector<16x32xf32>
    %214 = arith.addf %212, %213 : vector<16x32xf32>
    %215 = arith.addf %99, %168 : vector<16x32xf32>
    %cst_85 = arith.constant 5.000000e-01 : f32
    %216 = vector.broadcast %cst_85 : f32 to vector<16x32xf32>
    %217 = arith.mulf %216, %215 : vector<16x32xf32>
    %218 = math.tanh %217 : vector<16x32xf32>
    %cst_86 = arith.constant 1.000000e+00 : f32
    %219 = vector.broadcast %cst_86 : f32 to vector<16x32xf32>
    %220 = arith.addf %218, %219 : vector<16x32xf32>
    %cst_87 = arith.constant 5.000000e-01 : f32
    %221 = vector.broadcast %cst_87 : f32 to vector<16x32xf32>
    %222 = arith.mulf %221, %220 : vector<16x32xf32>
    %223 = arith.addf %122, %191 : vector<16x32xf32>
    %cst_88 = arith.constant 5.000000e-01 : f32
    %224 = vector.broadcast %cst_88 : f32 to vector<16x32xf32>
    %225 = arith.mulf %224, %223 : vector<16x32xf32>
    %226 = math.tanh %225 : vector<16x32xf32>
    %cst_89 = arith.constant 1.000000e+00 : f32
    %227 = vector.broadcast %cst_89 : f32 to vector<16x32xf32>
    %228 = arith.addf %226, %227 : vector<16x32xf32>
    %cst_90 = arith.constant 5.000000e-01 : f32
    %229 = vector.broadcast %cst_90 : f32 to vector<16x32xf32>
    %230 = arith.mulf %229, %228 : vector<16x32xf32>
    %231 = arith.mulf %222, %214 : vector<16x32xf32>
    %232 = arith.addf %145, %231 : vector<16x32xf32>
    %233 = math.tanh %232 : vector<16x32xf32>
    %cst_91 = arith.constant 1.000000e+00 : f32
    %234 = vector.broadcast %cst_91 : f32 to vector<16x32xf32>
    %235 = arith.subf %234, %230 : vector<16x32xf32>
    %236 = arith.mulf %235, %233 : vector<16x32xf32>
    %237 = arith.mulf %230, %57 : vector<16x32xf32>
    %238 = arith.addf %236, %237 : vector<16x32xf32>
    %cst_92 = arith.constant dense<0.000000e+00> : vector<16x128xf32>
    %239 = tpu.matmul %238, %5, %cst_92 {dimension_numbers = #tpu.dot_dimension_numbers<[1], [0], [0], [1], [0, 0, 1, 1], [], []>} : vector<16x32xf32>, vector<32x128xf32>, vector<16x128xf32> -> vector<16x128xf32>
    %240 = vector.broadcast %6 : vector<1x128xf32> to vector<16x128xf32>
    %241 = arith.addf %239, %240 : vector<16x128xf32>
    %242 = math.tanh %241 : vector<16x128xf32>
    %243 = vector.extract_strided_slice %242 {offsets = [0, 0], sizes = [16, 32], strides = [1, 1]} : vector<16x128xf32> to vector<16x32xf32>
    %cst_93 = arith.constant dense<0.000000e+00> : vector<16x32xf32>
    %244 = tpu.matmul %33, %243, %cst_93 {dimension_numbers = #tpu.dot_dimension_numbers<[1], [0], [0], [1], [0, 0, 1, 1], [], []>} : vector<16x16xf32>, vector<16x32xf32>, vector<16x32xf32> -> vector<16x32xf32>
    %c0_94 = arith.constant 0 : index
    %c0_95 = arith.constant 0 : index
    %245 = vector.load %arg4[%c0_94, %c0_95] : memref<16x128xf32, #tpu.memory_space<vmem>>, vector<16x32xf32>
    tpu.vector_store %arg4[%c0_94, %c0_95], %244 {strides = array<i32>} : memref<16x128xf32, #tpu.memory_space<vmem>>, vector<16x32xf32>,
    %246 = vector.extract_strided_slice %242 {offsets = [0, 32], sizes = [16, 32], strides = [1, 1]} : vector<16x128xf32> to vector<16x32xf32>
    %cst_96 = arith.constant dense<0.000000e+00> : vector<16x32xf32>
    %247 = tpu.matmul %34, %246, %cst_96 {dimension_numbers = #tpu.dot_dimension_numbers<[1], [0], [0], [1], [0, 0, 1, 1], [], []>} : vector<16x16xf32>, vector<16x32xf32>, vector<16x32xf32> -> vector<16x32xf32>
    %c0_97 = arith.constant 0 : index
    %c32_98 = arith.constant 32 : index
    %248 = vector.load %arg4[%c0_97, %c32_98] : memref<16x128xf32, #tpu.memory_space<vmem>>, vector<16x32xf32>
    tpu.vector_store %arg4[%c0_97, %c32_98], %247 {strides = array<i32>} : memref<16x128xf32, #tpu.memory_space<vmem>>, vector<16x32xf32>,
    %249 = vector.extract_strided_slice %242 {offsets = [0, 64], sizes = [16, 32], strides = [1, 1]} : vector<16x128xf32> to vector<16x32xf32>
    %cst_99 = arith.constant dense<0.000000e+00> : vector<16x32xf32>
    %250 = tpu.matmul %35, %249, %cst_99 {dimension_numbers = #tpu.dot_dimension_numbers<[1], [0], [0], [1], [0, 0, 1, 1], [], []>} : vector<16x16xf32>, vector<16x32xf32>, vector<16x32xf32> -> vector<16x32xf32>
    %c0_100 = arith.constant 0 : index
    %c64_101 = arith.constant 64 : index
    %251 = vector.load %arg4[%c0_100, %c64_101] : memref<16x128xf32, #tpu.memory_space<vmem>>, vector<16x32xf32>
    tpu.vector_store %arg4[%c0_100, %c64_101], %250 {strides = array<i32>} : memref<16x128xf32, #tpu.memory_space<vmem>>, vector<16x32xf32>,
    %252 = vector.extract_strided_slice %242 {offsets = [0, 96], sizes = [16, 32], strides = [1, 1]} : vector<16x128xf32> to vector<16x32xf32>
    %cst_102 = arith.constant dense<0.000000e+00> : vector<16x32xf32>
    %253 = tpu.matmul %36, %252, %cst_102 {dimension_numbers = #tpu.dot_dimension_numbers<[1], [0], [0], [1], [0, 0, 1, 1], [], []>} : vector<16x16xf32>, vector<16x32xf32>, vector<16x32xf32> -> vector<16x32xf32>
    %c0_103 = arith.constant 0 : index
    %c96_104 = arith.constant 96 : index
    %254 = vector.load %arg4[%c0_103, %c96_104] : memref<16x128xf32, #tpu.memory_space<vmem>>, vector<16x32xf32>
    tpu.vector_store %arg4[%c0_103, %c96_104], %253 {strides = array<i32>} : memref<16x128xf32, #tpu.memory_space<vmem>>, vector<16x32xf32>,
    %c0_105 = arith.constant 0 : index
    %c0_106 = arith.constant 0 : index
    %255 = vector.load %arg4[%c0_105, %c0_106] : memref<16x128xf32, #tpu.memory_space<vmem>>, vector<16x128xf32>
    %cst_107 = arith.constant dense<0.000000e+00> : vector<16x96xf32>
    %256 = tpu.matmul %255, %7, %cst_107 {dimension_numbers = #tpu.dot_dimension_numbers<[1], [0], [0], [1], [0, 0, 1, 1], [], []>} : vector<16x128xf32>, vector<128x96xf32>, vector<16x96xf32> -> vector<16x96xf32>
    %cst_108 = arith.constant dense<0.000000e+00> : vector<16x96xf32>
    %257 = tpu.matmul %238, %8, %cst_108 {dimension_numbers = #tpu.dot_dimension_numbers<[1], [0], [0], [1], [0, 0, 1, 1], [], []>} : vector<16x32xf32>, vector<32x96xf32>, vector<16x96xf32> -> vector<16x96xf32>
    %258 = vector.extract_strided_slice %256 {offsets = [0, 0], sizes = [16, 32], strides = [1, 1]} : vector<16x96xf32> to vector<16x32xf32>
    %cst_109 = arith.constant dense<0.000000e+00> : vector<16xf32>
    %259 = vector.multi_reduction <add>, %258, %cst_109 [1] : vector<16x32xf32> to vector<16xf32>
    %260 = vector.shape_cast %259 : vector<16xf32> to vector<16x1xf32>
    %cst_110 = arith.constant 3.200000e+01 : f32
    %261 = vector.broadcast %cst_110 : f32 to vector<16x1xf32>
    %262 = arith.divf %260, %261 : vector<16x1xf32>
    %263 = vector.broadcast %262 : vector<16x1xf32> to vector<16x32xf32>
    %264 = arith.subf %258, %263 : vector<16x32xf32>
    %265 = arith.mulf %264, %264 : vector<16x32xf32>
    %cst_111 = arith.constant dense<0.000000e+00> : vector<16xf32>
    %266 = vector.multi_reduction <add>, %265, %cst_111 [1] : vector<16x32xf32> to vector<16xf32>
    %267 = vector.shape_cast %266 : vector<16xf32> to vector<16x1xf32>
    %cst_112 = arith.constant 3.200000e+01 : f32
    %268 = vector.broadcast %cst_112 : f32 to vector<16x1xf32>
    %269 = arith.divf %267, %268 : vector<16x1xf32>
    %270 = vector.broadcast %262 : vector<16x1xf32> to vector<16x32xf32>
    %271 = arith.subf %258, %270 : vector<16x32xf32>
    %272 = vector.broadcast %21 : vector<1x32xf32> to vector<16x32xf32>
    %273 = arith.mulf %272, %271 : vector<16x32xf32>
    %cst_113 = arith.constant 9.99999974E-6 : f32
    %274 = vector.broadcast %cst_113 : f32 to vector<16x1xf32>
    %275 = arith.addf %269, %274 : vector<16x1xf32>
    %276 = math.rsqrt %275 : vector<16x1xf32>
    %277 = vector.broadcast %276 : vector<16x1xf32> to vector<16x32xf32>
    %278 = arith.mulf %273, %277 : vector<16x32xf32>
    %279 = vector.broadcast %24 : vector<1x32xf32> to vector<16x32xf32>
    %280 = arith.addf %278, %279 : vector<16x32xf32>
    %281 = vector.extract_strided_slice %256 {offsets = [0, 32], sizes = [16, 32], strides = [1, 1]} : vector<16x96xf32> to vector<16x32xf32>
    %cst_114 = arith.constant dense<0.000000e+00> : vector<16xf32>
    %282 = vector.multi_reduction <add>, %281, %cst_114 [1] : vector<16x32xf32> to vector<16xf32>
    %283 = vector.shape_cast %282 : vector<16xf32> to vector<16x1xf32>
    %cst_115 = arith.constant 3.200000e+01 : f32
    %284 = vector.broadcast %cst_115 : f32 to vector<16x1xf32>
    %285 = arith.divf %283, %284 : vector<16x1xf32>
    %286 = vector.broadcast %285 : vector<16x1xf32> to vector<16x32xf32>
    %287 = arith.subf %281, %286 : vector<16x32xf32>
    %288 = arith.mulf %287, %287 : vector<16x32xf32>
    %cst_116 = arith.constant dense<0.000000e+00> : vector<16xf32>
    %289 = vector.multi_reduction <add>, %288, %cst_116 [1] : vector<16x32xf32> to vector<16xf32>
    %290 = vector.shape_cast %289 : vector<16xf32> to vector<16x1xf32>
    %cst_117 = arith.constant 3.200000e+01 : f32
    %291 = vector.broadcast %cst_117 : f32 to vector<16x1xf32>
    %292 = arith.divf %290, %291 : vector<16x1xf32>
    %293 = vector.broadcast %285 : vector<16x1xf32> to vector<16x32xf32>
    %294 = arith.subf %281, %293 : vector<16x32xf32>
    %295 = vector.broadcast %22 : vector<1x32xf32> to vector<16x32xf32>
    %296 = arith.mulf %295, %294 : vector<16x32xf32>
    %cst_118 = arith.constant 9.99999974E-6 : f32
    %297 = vector.broadcast %cst_118 : f32 to vector<16x1xf32>
    %298 = arith.addf %292, %297 : vector<16x1xf32>
    %299 = math.rsqrt %298 : vector<16x1xf32>
    %300 = vector.broadcast %299 : vector<16x1xf32> to vector<16x32xf32>
    %301 = arith.mulf %296, %300 : vector<16x32xf32>
    %302 = vector.broadcast %25 : vector<1x32xf32> to vector<16x32xf32>
    %303 = arith.addf %301, %302 : vector<16x32xf32>
    %304 = vector.extract_strided_slice %256 {offsets = [0, 64], sizes = [16, 32], strides = [1, 1]} : vector<16x96xf32> to vector<16x32xf32>
    %cst_119 = arith.constant dense<0.000000e+00> : vector<16xf32>
    %305 = vector.multi_reduction <add>, %304, %cst_119 [1] : vector<16x32xf32> to vector<16xf32>
    %306 = vector.shape_cast %305 : vector<16xf32> to vector<16x1xf32>
    %cst_120 = arith.constant 3.200000e+01 : f32
    %307 = vector.broadcast %cst_120 : f32 to vector<16x1xf32>
    %308 = arith.divf %306, %307 : vector<16x1xf32>
    %309 = vector.broadcast %308 : vector<16x1xf32> to vector<16x32xf32>
    %310 = arith.subf %304, %309 : vector<16x32xf32>
    %311 = arith.mulf %310, %310 : vector<16x32xf32>
    %cst_121 = arith.constant dense<0.000000e+00> : vector<16xf32>
    %312 = vector.multi_reduction <add>, %311, %cst_121 [1] : vector<16x32xf32> to vector<16xf32>
    %313 = vector.shape_cast %312 : vector<16xf32> to vector<16x1xf32>
    %cst_122 = arith.constant 3.200000e+01 : f32
    %314 = vector.broadcast %cst_122 : f32 to vector<16x1xf32>
    %315 = arith.divf %313, %314 : vector<16x1xf32>
    %316 = vector.broadcast %308 : vector<16x1xf32> to vector<16x32xf32>
    %317 = arith.subf %304, %316 : vector<16x32xf32>
    %318 = vector.broadcast %23 : vector<1x32xf32> to vector<16x32xf32>
    %319 = arith.mulf %318, %317 : vector<16x32xf32>
    %cst_123 = arith.constant 9.99999974E-6 : f32
    %320 = vector.broadcast %cst_123 : f32 to vector<16x1xf32>
    %321 = arith.addf %315, %320 : vector<16x1xf32>
    %322 = math.rsqrt %321 : vector<16x1xf32>
    %323 = vector.broadcast %322 : vector<16x1xf32> to vector<16x32xf32>
    %324 = arith.mulf %319, %323 : vector<16x32xf32>
    %325 = vector.broadcast %26 : vector<1x32xf32> to vector<16x32xf32>
    %326 = arith.addf %324, %325 : vector<16x32xf32>
    %327 = vector.extract_strided_slice %257 {offsets = [0, 0], sizes = [16, 32], strides = [1, 1]} : vector<16x96xf32> to vector<16x32xf32>
    %cst_124 = arith.constant dense<0.000000e+00> : vector<16xf32>
    %328 = vector.multi_reduction <add>, %327, %cst_124 [1] : vector<16x32xf32> to vector<16xf32>
    %329 = vector.shape_cast %328 : vector<16xf32> to vector<16x1xf32>
    %cst_125 = arith.constant 3.200000e+01 : f32
    %330 = vector.broadcast %cst_125 : f32 to vector<16x1xf32>
    %331 = arith.divf %329, %330 : vector<16x1xf32>
    %332 = vector.broadcast %331 : vector<16x1xf32> to vector<16x32xf32>
    %333 = arith.subf %327, %332 : vector<16x32xf32>
    %334 = arith.mulf %333, %333 : vector<16x32xf32>
    %cst_126 = arith.constant dense<0.000000e+00> : vector<16xf32>
    %335 = vector.multi_reduction <add>, %334, %cst_126 [1] : vector<16x32xf32> to vector<16xf32>
    %336 = vector.shape_cast %335 : vector<16xf32> to vector<16x1xf32>
    %cst_127 = arith.constant 3.200000e+01 : f32
    %337 = vector.broadcast %cst_127 : f32 to vector<16x1xf32>
    %338 = arith.divf %336, %337 : vector<16x1xf32>
    %339 = vector.broadcast %331 : vector<16x1xf32> to vector<16x32xf32>
    %340 = arith.subf %327, %339 : vector<16x32xf32>
    %341 = vector.broadcast %27 : vector<1x32xf32> to vector<16x32xf32>
    %342 = arith.mulf %341, %340 : vector<16x32xf32>
    %cst_128 = arith.constant 9.99999974E-6 : f32
    %343 = vector.broadcast %cst_128 : f32 to vector<16x1xf32>
    %344 = arith.addf %338, %343 : vector<16x1xf32>
    %345 = math.rsqrt %344 : vector<16x1xf32>
    %346 = vector.broadcast %345 : vector<16x1xf32> to vector<16x32xf32>
    %347 = arith.mulf %342, %346 : vector<16x32xf32>
    %348 = vector.broadcast %30 : vector<1x32xf32> to vector<16x32xf32>
    %349 = arith.addf %347, %348 : vector<16x32xf32>
    %350 = vector.extract_strided_slice %257 {offsets = [0, 32], sizes = [16, 32], strides = [1, 1]} : vector<16x96xf32> to vector<16x32xf32>
    %cst_129 = arith.constant dense<0.000000e+00> : vector<16xf32>
    %351 = vector.multi_reduction <add>, %350, %cst_129 [1] : vector<16x32xf32> to vector<16xf32>
    %352 = vector.shape_cast %351 : vector<16xf32> to vector<16x1xf32>
    %cst_130 = arith.constant 3.200000e+01 : f32
    %353 = vector.broadcast %cst_130 : f32 to vector<16x1xf32>
    %354 = arith.divf %352, %353 : vector<16x1xf32>
    %355 = vector.broadcast %354 : vector<16x1xf32> to vector<16x32xf32>
    %356 = arith.subf %350, %355 : vector<16x32xf32>
    %357 = arith.mulf %356, %356 : vector<16x32xf32>
    %cst_131 = arith.constant dense<0.000000e+00> : vector<16xf32>
    %358 = vector.multi_reduction <add>, %357, %cst_131 [1] : vector<16x32xf32> to vector<16xf32>
    %359 = vector.shape_cast %358 : vector<16xf32> to vector<16x1xf32>
    %cst_132 = arith.constant 3.200000e+01 : f32
    %360 = vector.broadcast %cst_132 : f32 to vector<16x1xf32>
    %361 = arith.divf %359, %360 : vector<16x1xf32>
    %362 = vector.broadcast %354 : vector<16x1xf32> to vector<16x32xf32>
    %363 = arith.subf %350, %362 : vector<16x32xf32>
    %364 = vector.broadcast %28 : vector<1x32xf32> to vector<16x32xf32>
    %365 = arith.mulf %364, %363 : vector<16x32xf32>
    %cst_133 = arith.constant 9.99999974E-6 : f32
    %366 = vector.broadcast %cst_133 : f32 to vector<16x1xf32>
    %367 = arith.addf %361, %366 : vector<16x1xf32>
    %368 = math.rsqrt %367 : vector<16x1xf32>
    %369 = vector.broadcast %368 : vector<16x1xf32> to vector<16x32xf32>
    %370 = arith.mulf %365, %369 : vector<16x32xf32>
    %371 = vector.broadcast %31 : vector<1x32xf32> to vector<16x32xf32>
    %372 = arith.addf %370, %371 : vector<16x32xf32>
    %373 = vector.extract_strided_slice %257 {offsets = [0, 64], sizes = [16, 32], strides = [1, 1]} : vector<16x96xf32> to vector<16x32xf32>
    %cst_134 = arith.constant dense<0.000000e+00> : vector<16xf32>
    %374 = vector.multi_reduction <add>, %373, %cst_134 [1] : vector<16x32xf32> to vector<16xf32>
    %375 = vector.shape_cast %374 : vector<16xf32> to vector<16x1xf32>
    %cst_135 = arith.constant 3.200000e+01 : f32
    %376 = vector.broadcast %cst_135 : f32 to vector<16x1xf32>
    %377 = arith.divf %375, %376 : vector<16x1xf32>
    %378 = vector.broadcast %377 : vector<16x1xf32> to vector<16x32xf32>
    %379 = arith.subf %373, %378 : vector<16x32xf32>
    %380 = arith.mulf %379, %379 : vector<16x32xf32>
    %cst_136 = arith.constant dense<0.000000e+00> : vector<16xf32>
    %381 = vector.multi_reduction <add>, %380, %cst_136 [1] : vector<16x32xf32> to vector<16xf32>
    %382 = vector.shape_cast %381 : vector<16xf32> to vector<16x1xf32>
    %cst_137 = arith.constant 3.200000e+01 : f32
    %383 = vector.broadcast %cst_137 : f32 to vector<16x1xf32>
    %384 = arith.divf %382, %383 : vector<16x1xf32>
    %385 = vector.broadcast %377 : vector<16x1xf32> to vector<16x32xf32>
    %386 = arith.subf %373, %385 : vector<16x32xf32>
    %387 = vector.broadcast %29 : vector<1x32xf32> to vector<16x32xf32>
    %388 = arith.mulf %387, %386 : vector<16x32xf32>
    %cst_138 = arith.constant 9.99999974E-6 : f32
    %389 = vector.broadcast %cst_138 : f32 to vector<16x1xf32>
    %390 = arith.addf %384, %389 : vector<16x1xf32>
    %391 = math.rsqrt %390 : vector<16x1xf32>
    %392 = vector.broadcast %391 : vector<16x1xf32> to vector<16x32xf32>
    %393 = arith.mulf %388, %392 : vector<16x32xf32>
    %394 = vector.broadcast %32 : vector<1x32xf32> to vector<16x32xf32>
    %395 = arith.addf %393, %394 : vector<16x32xf32>
    %396 = arith.addf %280, %349 : vector<16x32xf32>
    %cst_139 = arith.constant 5.000000e-01 : f32
    %397 = vector.broadcast %cst_139 : f32 to vector<16x32xf32>
    %398 = arith.mulf %397, %396 : vector<16x32xf32>
    %399 = math.tanh %398 : vector<16x32xf32>
    %cst_140 = arith.constant 1.000000e+00 : f32
    %400 = vector.broadcast %cst_140 : f32 to vector<16x32xf32>
    %401 = arith.addf %399, %400 : vector<16x32xf32>
    %cst_141 = arith.constant 5.000000e-01 : f32
    %402 = vector.broadcast %cst_141 : f32 to vector<16x32xf32>
    %403 = arith.mulf %402, %401 : vector<16x32xf32>
    %404 = arith.addf %303, %372 : vector<16x32xf32>
    %cst_142 = arith.constant 5.000000e-01 : f32
    %405 = vector.broadcast %cst_142 : f32 to vector<16x32xf32>
    %406 = arith.mulf %405, %404 : vector<16x32xf32>
    %407 = math.tanh %406 : vector<16x32xf32>
    %cst_143 = arith.constant 1.000000e+00 : f32
    %408 = vector.broadcast %cst_143 : f32 to vector<16x32xf32>
    %409 = arith.addf %407, %408 : vector<16x32xf32>
    %cst_144 = arith.constant 5.000000e-01 : f32
    %410 = vector.broadcast %cst_144 : f32 to vector<16x32xf32>
    %411 = arith.mulf %410, %409 : vector<16x32xf32>
    %412 = arith.mulf %403, %395 : vector<16x32xf32>
    %413 = arith.addf %326, %412 : vector<16x32xf32>
    %414 = math.tanh %413 : vector<16x32xf32>
    %cst_145 = arith.constant 1.000000e+00 : f32
    %415 = vector.broadcast %cst_145 : f32 to vector<16x32xf32>
    %416 = arith.subf %415, %411 : vector<16x32xf32>
    %417 = arith.mulf %416, %414 : vector<16x32xf32>
    %418 = arith.mulf %411, %238 : vector<16x32xf32>
    %419 = arith.addf %417, %418 : vector<16x32xf32>
    %420 = arith.mulf %47, %14 : vector<1x16xf32>
    %cst_146 = arith.constant dense<0.000000e+00> : vector<1xf32>
    %421 = vector.multi_reduction <add>, %420, %cst_146 [1] : vector<1x16xf32> to vector<1xf32>
    %422 = vector.shape_cast %421 : vector<1xf32> to vector<1x1xf32>
    %423 = arith.addf %422, %15 : vector<1x1xf32>
    %424 = vector.broadcast %13 : vector<1x32xf32> to vector<16x32xf32>
    %425 = arith.mulf %419, %424 : vector<16x32xf32>
    %cst_147 = arith.constant dense<0.000000e+00> : vector<16xf32>
    %426 = vector.multi_reduction <add>, %425, %cst_147 [1] : vector<16x32xf32> to vector<16xf32>
    %427 = vector.shape_cast %426 : vector<16xf32> to vector<16x1xf32>
    %428 = vector.broadcast %423 : vector<1x1xf32> to vector<16x1xf32>
    %429 = arith.addf %427, %428 : vector<16x1xf32>
    %cst_148 = arith.constant 5.000000e-01 : f32
    %430 = vector.broadcast %cst_148 : f32 to vector<16x1xf32>
    %431 = arith.cmpf ogt, %39, %430 : vector<16x1xf32>
    %cst_149 = arith.constant -1.000000e+30 : f32
    %432 = vector.broadcast %cst_149 : f32 to vector<16x1xf32>
    %433 = arith.select %431, %429, %432 : vector<16x1xi1>, vector<16x1xf32>
    %cst_150 = arith.constant dense<0xFF800000> : vector<1xf32>
    %434 = vector.multi_reduction <maximumf>, %433, %cst_150 [0] : vector<16x1xf32> to vector<1xf32>
    %435 = vector.shape_cast %434 : vector<1xf32> to vector<1x1xf32>
    %436 = vector.broadcast %435 : vector<1x1xf32> to vector<16x1xf32>
    %437 = arith.subf %433, %436 : vector<16x1xf32>
    %438 = math.exp %437 : vector<16x1xf32>
    %439 = arith.mulf %438, %39 : vector<16x1xf32>
    %cst_151 = arith.constant dense<0.000000e+00> : vector<1xf32>
    %440 = vector.multi_reduction <add>, %439, %cst_151 [0] : vector<16x1xf32> to vector<1xf32>
    %441 = vector.shape_cast %440 : vector<1xf32> to vector<1x1xf32>
    %442 = vector.broadcast %441 : vector<1x1xf32> to vector<16x1xf32>
    %443 = arith.divf %439, %442 : vector<16x1xf32>
    %444 = vector.broadcast %443 : vector<16x1xf32> to vector<16x32xf32>
    %445 = arith.mulf %444, %419 : vector<16x32xf32>
    %cst_152 = arith.constant dense<0.000000e+00> : vector<32xf32>
    %446 = vector.multi_reduction <add>, %445, %cst_152 [0] : vector<16x32xf32> to vector<32xf32>
    %447 = vector.shape_cast %446 : vector<32xf32> to vector<1x32xf32>
    %cst_153 = arith.constant dense<0.000000e+00> : vector<1x32xf32>
    %448 = tpu.matmul %447, %16, %cst_153 {dimension_numbers = #tpu.dot_dimension_numbers<[1], [0], [0], [1], [0, 0, 1, 1], [], []>} : vector<1x32xf32>, vector<32x32xf32>, vector<1x32xf32> -> vector<1x32xf32>
    %cst_154 = arith.constant dense<0.000000e+00> : vector<1x32xf32>
    %449 = tpu.matmul %44, %17, %cst_154 {dimension_numbers = #tpu.dot_dimension_numbers<[1], [0], [0], [1], [0, 0, 1, 1], [], []>} : vector<1x16xf32>, vector<16x32xf32>, vector<1x32xf32> -> vector<1x32xf32>
    %450 = arith.addf %448, %449 : vector<1x32xf32>
    %451 = arith.addf %450, %18 : vector<1x32xf32>
    %452 = math.tanh %451 : vector<1x32xf32>
    %cst_155 = arith.constant dense<0.000000e+00> : vector<1x10xf32>
    %453 = tpu.matmul %452, %19, %cst_155 {dimension_numbers = #tpu.dot_dimension_numbers<[1], [0], [0], [1], [0, 0, 1, 1], [], []>} : vector<1x32xf32>, vector<32x10xf32>, vector<1x10xf32> -> vector<1x10xf32>
    %454 = arith.addf %453, %20 : vector<1x10xf32>
    %cst_156 = arith.constant 5.000000e-01 : f32
    %455 = vector.broadcast %cst_156 : f32 to vector<1x10xf32>
    %456 = arith.mulf %455, %454 : vector<1x10xf32>
    %457 = math.tanh %456 : vector<1x10xf32>
    %cst_157 = arith.constant 1.000000e+00 : f32
    %458 = vector.broadcast %cst_157 : f32 to vector<1x10xf32>
    %459 = arith.addf %457, %458 : vector<1x10xf32>
    %cst_158 = arith.constant 5.000000e-01 : f32
    %460 = vector.broadcast %cst_158 : f32 to vector<1x10xf32>
    %461 = arith.mulf %460, %459 : vector<1x10xf32>
    %c0_159 = arith.constant 0 : index
    %c0_160 = arith.constant 0 : index
    %462 = vector.load %arg3[%c0_159, %c0_160] : memref<1x10xf32, #tpu.memory_space<vmem>>, vector<1x10xf32>
    tpu.vector_store %arg3[%c0_159, %c0_160], %461 {strides = array<i32>} : memref<1x10xf32, #tpu.memory_space<vmem>>, vector<1x10xf32>,
    return
  }
}

</mosaic_0001>

<bundles_post_ra>
// kernel: tpu_custom_call.1
= control target key start
LH: loop header
LB: loop body
LE: loop exit
PB: predicated region body
PF: predicated region fallthrough
CT: control target
= control target key end

     0   :  { %8 = vsyncpa [#allocation4], 0  ;;  %s2649_s0 = inlined_call_operand.vmem [shape: f32[64,16], index: 0, kind: input, shape index: {}]   ;;  %s2650_s1 = inlined_call_operand.vmem [shape: f32[24,128], index: 1, kind: input, shape index: {}]   ;;  %s2651_s2 = inlined_call_operand.hbm [shape: f32[432,128], index: 2, kind: input, shape index: {}]   ;;  %s2652_s3 = inlined_call_operand.hbm [shape: f32[1,10], index: 3, kind: output, shape index: {}]  }
   0x1   :  { %9 = vsyncpa [#allocation5], 0  ;;  %s18_s14 = sshll.u32 %s2651_s2, 4  ;;  %s2015_s15 = smov [#allocation3]   ;;  %s19_s14 = int_to_ptr.hbm [resolvable:$true] %s18_s14 }
   0x2   :  { %s20_s16 = sshll.u32 %s2015_s15, 4  ;;  %s2016_s17 = smov 128   ;;  %s21_s16 = int_to_ptr.vmem [resolvable:$true] %s20_s16 }
   0x3   :  { %s2017_s18 = smov 8  }
   0x4   :  { %26 = dma.hbm_to_vmem [thread:$0]  %s19_s14, 6912, %s21_s16, [#allocation4], %s2016_s17, %s2016_s17, %s2017_s18  }
   0x5   :  { %2011 = dma.done.wait [#allocation4], 6912  }
   0x6   :  { %2012 = vsyncadd [#allocation4], 4294960384  ;;  %v34_v0 = vld [vmem:[#allocation3 + $0x18] sm:$0xff]  ;;  %v33_v1 = vld [vmem:[#allocation3 + $0x10] sm:$0xff]  ;;  %s2018_s2 = smov 96   ;;  %vm97_vm0 = vcmask 261120  }
   0x7   :  { %165 = vmatpush.msra.mxu2 %v34_v0  ;;  %v93_v2 = vld [vmem:[%s2650_s1] sm:$0xff]  ;;  %137 = vmatpush.msra.mxu1 %v34_v0  ;;  %v32_v3 = vld [vmem:[#allocation3 + $0x8] sm:$0xff]  ;;  %v31_v4 = vld [vmem:[#allocation3] sm:$0xff]  ;;  %vm182_vm1 = vcmask 130048   ;;  %s2019_s27 = smov 32   ;;  %s2020_s28 = smov 64  }
   0x8   :  { %178 = vrot.lane.b32.xlu0 %v93_v2, %s2018_s2  ;;  %113 = vmatpush.msra.mxu0 %v34_v0  ;;  %v95_v5 = vld [vmem:[%s2650_s1 + $0x10] sm:$0x1]  ;;  %v94_v6 = vld [vmem:[%s2650_s1 + $0x8] sm:$0xff]  ;;  %v96_v8 = vld [vmem:[%s2650_s1 + $0x11] sm:$0x1]  ;;  %vm352_vm2 = vcmask 523520  }
   0x9   :  { %166 = vmatpush.msra.mxu2 %v33_v1  ;;  %138 = vmatpush.msra.mxu1 %v33_v1  ;;  %v39_v7 = vld [vmem:[#allocation3 + $0x40] sm:$0xff]  ;;  %v38_v9 = vld [vmem:[#allocation3 + $0x38] sm:$0xff]  ;;  %v37_v10 = vld [vmem:[#allocation3 + $0x30] sm:$0xff]  ;;  %vm398_vm3 = vcmask 785920   ;;  %vm444_vm4 = vcmask 1048320   ;;  %s1743_s13 = sshll.u32 %s2652_s3, 4  ;;  %s1744_s13 = int_to_ptr.hbm [resolvable:$true] %s1743_s13 }
   0xa   :  { %114 = vmatpush.msra.mxu0 %v33_v1  ;;  %1788 = vmatpush.msra.mxu3 %v39_v7  ;;  %v36_v11 = vld [vmem:[#allocation3 + $0x28] sm:$0xff]  ;;  %v1832_v14 = vld [vmem:[#allocation3 + $0x20] ss:$0 sm:$0xff]  ;;  %v2076_v23 = vld [vmem:[#allocation3 + $0x58] sm:$0xff] }
   0xb   :  { %167 = vmatpush.msra.mxu2 %v32_v3  ;;  %139 = vmatpush.msra.mxu1 %v32_v3  ;;  %v2070_v21 = vld [vmem:[#allocation3 + $0x68] sm:$0xff]  ;;  %v2073_v22 = vld [vmem:[#allocation3 + $0x60] sm:$0xff]  ;;  %v2079_v24 = vld [vmem:[#allocation3 + $0x50] sm:$0xff] }
   0xc   :  { %115 = vmatpush.msra.mxu0 %v32_v3  ;;  %1789 = vmatpush.msra.mxu3 %v38_v9  ;;  %v1833_v27 = vld [vmem:[#allocation3 + $0x48] ss:$0 sm:$0xff]  ;;  %v1834_v39 = vld [vmem:[#allocation3 + $0x70] ss:$0 sm:$0xff]  ;;  %v91_v49 = vld [vmem:[%s2649_s0 + $0x30] sm:$0xff] }
   0xd   :  { %168 = vmatpush.msra.mxu2 %v31_v4  ;;  %140 = vmatpush.msra.mxu1 %v31_v4  ;;  %v92_v50 = vld [vmem:[%s2649_s0 + $0x38] sm:$0xff]  ;;  %v85_v51 = vld [vmem:[%s2649_s0] sm:$0xff]  ;;  %v87_v55 = vld [vmem:[%s2649_s0 + $0x10] sm:$0xff] }
   0xe   :  { %1755 = vmatmul.msk.f32.vlgmr.msra.gmra.mxu2 %vm97_vm0, %v93_v2  ;;  %1754 = vmatmul.msk.f32.vlgmr.msra.gmra.mxu1 %vm97_vm0, %v95_v5  ;;  %v65_v56 = vld [vmem:[#allocation3 + $0x110] sm:$0xff]  ;;  %v86_v57 = vld [vmem:[%s2649_s0 + $0x8] sm:$0xff]  ;;  %v64_v58 = vld [vmem:[#allocation3 + $0x108] sm:$0xff] }
   0xf   :  { %116 = vmatpush.msra.mxu0 %v31_v4  ;;  %201 = vmatpush.msrb.mxu1 %v39_v7  ;;  %v63_v60 = vld [vmem:[#allocation3 + $0x100] sm:$0xff]  ;;  %v62_v62 = vld [vmem:[#allocation3 + $0xf8] sm:$0xff]  ;;  %v88_v0 = vld [vmem:[%s2649_s0 + $0x18] sm:$0xff] }
  0x10   :  { %180 = vrot.lane.b32.xlu0 %v94_v6, %s2018_s2  ;;  %1753 = vmatmul.msk.f32.vlgmr.msra.gmra.mxu0 %vm97_vm0, %v96_v8  ;;  %v89_v1 = vld [vmem:[%s2649_s0 + $0x20] sm:$0xff]  ;;  %v90_v2 = vld [vmem:[%s2649_s0 + $0x28] sm:$0xff] }
  0x11   :  { %202 = vmatpush.msrb.mxu1 %v38_v9  ;;  %230 = vmatpush.msrb.mxu0 %v37_v10 }
  0x13   :  { %231 = vmatpush.msrb.mxu0 %v36_v11  ;;  %263 = vmatpush.msra.mxu1 %v2070_v21 }
  0x15   :  { %264 = vmatpush.msra.mxu1 %v2073_v22 }
  0x16   :  { %1756 = vmatmul.msk.f32.gmra.mxu2 %vm97_vm0, %v94_v6 }
  0x17   :  { %265 = vmatpush.msra.mxu1 %v2076_v23 }
  0x19   :  { %266 = vmatpush.msra.mxu1 %v2079_v24 }
  0x7a   :  { %v179_v12 = vpop.permute.xlu0 %178 }
  0x7b   :  { %1757 = vmatmul.msk.f32.vlgmr.msrb.gmra.mxu1 %vm182_vm1, %v179_v12 }
  0x82   :  { %v181_v13 = vpop.permute.xlu0 %180 }
  0x83   :  { %1758 = vmatmul.msk.f32.vlgmr.msra.gmra.mxu3 %vm182_vm1, %v181_v13 }
  0x8b   :  { %v2082_v25 = vpop.f32.mrf.mxu1 }
  0x8d   :  { %v2084_v26 = vpop.f32.mrf.mxu0 }
  0x91   :  { %v170_v15 = vpop.f32.mrf.mxu2 }
  0x92   :  { %v171_v16 = vadd.f32 %v1832_v14, %v170_v15 }
  0x94   :  { %1840 = vtanh.f32 %v171_v16  ;;  %v60_v16 = vld [vmem:[#allocation3 + $0xe8] sm:$0xff] }
  0x99   :  { %v173_v17 = vpop.f32.mrf.mxu2 }
  0x9a   :  { %v1841_v18 = vpop.eup %1840  ;;  %v174_v19 = vadd.f32 %v1832_v14, %v173_v17  ;;  %v61_v14 = vld [vmem:[#allocation3 + $0xf0] sm:$0xff]  ;;  %v59_v17 = vld [vmem:[#allocation3 + $0xe0] sm:$0xff] }
  0x9b   :  { %1759 = vmatmul.msk.f32.vlgmr.msrb.gmra.mxu0 %vm182_vm1, %v1841_v18  ;;  %v58_v18 = vld [vmem:[#allocation3 + $0xd8] sm:$0xff] }
  0x9c   :  { %1842 = vtanh.f32 %v174_v19  ;;  %v57_v19 = vld [vmem:[#allocation3 + $0xd0] sm:$0xff] }
  0xa2   :  { %v1843_v20 = vpop.eup %1842 }
  0xa3   :  { %1760 = vmatmul.msk.f32.gmra.mxu0 %vm182_vm1, %v1843_v20  ;;  %v56_v20 = vld [vmem:[#allocation3 + $0xc8] sm:$0xff] }
  0xf8   :  { %v204_v28 = vpop.f32.mrf.mxu1 }
 0x106   :  { %v207_v32 = vpop.f32.mrf.mxu3 }
 0x118   :  { %v233_v29 = vpop.f32.mrf.mxu0 }
 0x119   :  { %v234_v30 = vadd.f32 %v233_v29, %v204_v28  ;;  %v50_v28 = vld [vmem:[#allocation3 + $0x98] sm:$0xff]  ;;  %v49_v29 = vld [vmem:[#allocation3 + $0x90] sm:$0xff] }
 0x11b   :  { %v240_v31 = vadd.f32 %v1833_v27, %v234_v30  ;;  %v48_v30 = vld [vmem:[#allocation3 + $0x88] sm:$0xff] }
 0x11d   :  { %1844 = vtanh.f32 %v240_v31  ;;  %v47_v31 = vld [vmem:[#allocation3 + $0x80] sm:$0xff] }
 0x120   :  { %v236_v33 = vpop.f32.mrf.mxu0 }
 0x121   :  { %v237_v34 = vadd.f32 %v236_v33, %v207_v32  ;;  %v46_v33 = vld [vmem:[#allocation3 + $0x78] sm:$0xff] }
 0x123   :  { %v2086_v35 = vpop.eup %1844  ;;  %v241_v36 = vadd.f32 %v1833_v27, %v237_v34  ;;  %v51_v27 = vld [vmem:[#allocation3 + $0xa0] sm:$0xff] }
 0x124   :  { %1761 = vmatmul.msk.f32.vlgmr.msra.gmra.mxu1 %vm97_vm0, %v2086_v35 }
 0x125   :  { %1846 = vtanh.f32 %v241_v36 }
 0x12b   :  { %v2090_v37 = vpop.eup %1846 }
 0x12c   :  { %1762 = vmatmul.msk.f32.gmra.mxu1 %vm97_vm0, %v2090_v37 }
 0x1a1   :  { %v268_v38 = vpop.f32.mrf.mxu1 }
 0x1a2   :  { %v269_v40 = vadd.f32 %v1834_v39, %v268_v38 }
 0x1a4   :  { %1848 = vtanh.f32 %v269_v40 }
 0x1a9   :  { %v271_v41 = vpop.f32.mrf.mxu1 }
 0x1aa   :  { %v272_v42 = vadd.f32 %v1834_v39, %v271_v41  ;;  %v1849_v43 = vpop.eup %1848 }
 0x1ac   :  { %1850 = vtanh.f32 %v272_v42 }
 0x1b2   :  { %v1851_v44 = vpop.eup %1850 }
 0x1b3   :  { %296 = vmatpush.msrb.mxu3 %v1851_v44  ;;  %v1810_v45 = vpack.i.bf16 %v1849_v43, %v1851_v44 }
 0x1b5   :  { %1811 = vrot.lane.b32.xlu2 %v1810_v45, %s2019_s27  ;;  %1801 = vrot.lane.b32.xlu1 %v1810_v45, %s2018_s2 }
 0x1b6   :  { %297 = vmatpush.msrb.mxu3 %v1849_v43 }
 0x1b7   :  { %1763 = vmatmul.msk.f32.vlgmr.msrb.gmra.mxu3 %vm182_vm1, %v85_v51 }
 0x1b8   :  { %449 = vmatpush.msra.mxu3 %v61_v14 }
 0x1ba   :  { %450 = vmatpush.msra.mxu3 %v60_v16 }
 0x1bc   :  { %451 = vmatpush.msra.mxu3 %v59_v17 }
 0x1bd   :  { %1806 = vrot.lane.b32.xlu1 %v1810_v45, %s2020_s28 }
 0x1be   :  { %452 = vmatpush.msra.mxu3 %v58_v18 }
 0x1bf   :  { %1764 = vmatmul.msk.f32.gmra.mxu3 %vm182_vm1, %v86_v57 }
 0x1c0   :  { %453 = vmatpush.msra.mxu3 %v57_v19 }
 0x1c2   :  { %454 = vmatpush.msra.mxu3 %v56_v20 }
 0x20f   :  { %v1812_v46 = vpop.permute.xlu2 %1811 }
 0x210   :  { %v1813_v47 = vunpack.i.l.bf16 %v1812_v46  ;;  %v1814_v48 = vunpack.i.h.bf16 %v1812_v46 }
 0x212   :  { %427 = vmatpush.msrb.mxu1 %v1813_v47 }
 0x214   :  { %428 = vmatpush.msrb.mxu1 %v1814_v48 }
 0x215   :  { %1769 = vmatmul.msk.f32.vlgmr.msrb.gmra.mxu1 %vm182_vm1, %v91_v49 }
 0x21d   :  { %1770 = vmatmul.msk.f32.gmra.mxu1 %vm182_vm1, %v92_v50  ;;  %v2021_v50 = vmov 32.0  }
 0x21e   :  { %1852 = vrcp.f32 %v2021_v50 }
 0x224   :  { %v1853_v51 = vpop.eup %1852 }
 0x225   :  { %vm506_vm5 = vweird.f32 %v1853_v51 }
 0x227   :  { %v1802_v52 = vpop.permute.xlu1 %1801 }
 0x228   :  { %v1803_v53 = vunpack.i.l.bf16 %v1802_v52  ;;  %v1804_v54 = vunpack.i.h.bf16 %v1802_v52  ;;  %v502_v52 = vmul.f32 32.0, %v1853_v51 }
 0x22a   :  { %335 = vmatpush.msrb.mxu2 %v1803_v53  ;;  %v503_v53 = vsub.f32 1.0, %v502_v52 }
 0x22c   :  { %336 = vmatpush.msrb.mxu2 %v1804_v54 }
 0x22d   :  { %1765 = vmatmul.msk.f32.vlgmr.msrb.gmra.mxu2 %vm182_vm1, %v87_v55  ;;  %v504_v55 = vmul.f32 %v1853_v51, %v503_v53 }
 0x22e   :  { %484 = vmatpush.msra.mxu2 %v65_v56 }
 0x22f   :  { %v1807_v59 = vpop.permute.xlu1 %1806  ;;  %v505_v56 = vadd.f32 %v1853_v51, %v504_v55 }
 0x230   :  { %v1808_v61 = vunpack.i.l.bf16 %v1807_v59  ;;  %485 = vmatpush.msra.mxu2 %v64_v58  ;;  %v1809_v63 = vunpack.i.h.bf16 %v1807_v59 }
 0x231   :  { %v2170_v58 = vsel %vm506_vm5, %v1853_v51, %v505_v56 }
 0x232   :  { %381 = vmatpush.msra.mxu0 %v1808_v61  ;;  %486 = vmatpush.msra.mxu2 %v63_v60 }
 0x234   :  { %382 = vmatpush.msra.mxu0 %v1809_v63  ;;  %487 = vmatpush.msra.mxu2 %v62_v62 }
 0x235   :  { %1766 = vmatmul.msk.f32.gmra.mxu2 %vm182_vm1, %v88_v0  ;;  %1767 = vmatmul.msk.f32.vlgmr.msra.gmra.mxu0 %vm182_vm1, %v89_v1 }
 0x236   :  { %940 = vmatpush.msrb.mxu0 %v2070_v21  ;;  %v55_v21 = vld [vmem:[#allocation3 + $0xc0] sm:$0xff] }
 0x237   :  { %455 = vmatpush.msra.mxu3 %v55_v21 }
 0x238   :  { %941 = vmatpush.msrb.mxu0 %v2073_v22  ;;  %v54_v22 = vld [vmem:[#allocation3 + $0xb8] sm:$0xff] }
 0x239   :  { %456 = vmatpush.msra.mxu3 %v54_v22 }
 0x23a   :  { %942 = vmatpush.msrb.mxu0 %v2076_v23  ;;  %v299_v12 = vpop.f32.mrf.mxu3  ;;  %v53_v23 = vld [vmem:[#allocation3 + $0xb0] sm:$0xff] }
 0x23b   :  { %305 = vst.msk [vmem:[#allocation2] sm:$0xff] %vm97_vm0, %v299_v12  ;;  %457 = vmatpush.msra.mxu3 %v53_v23 }
 0x23c   :  { %943 = vmatpush.msrb.mxu0 %v2079_v24  ;;  %v52_v24 = vld [vmem:[#allocation3 + $0xa8] sm:$0xff] }
 0x23d   :  { %1768 = vmatmul.msk.f32.gmra.mxu0 %vm182_vm1, %v90_v2  ;;  %1771 = vmatmul.msk.f32.vlgmr.msra.gmra.mxu2 %vm97_vm0, %v2086_v35 }
 0x23e   :  { %458 = vmatpush.msra.mxu3 %v52_v24 }
 0x240   :  { %459 = vmatpush.msra.mxu3 %v51_v27 }
 0x242   :  { %v302_v15 = vpop.f32.mrf.mxu3  ;;  %460 = vmatpush.msra.mxu3 %v50_v28 }
 0x243   :  { %306 = vst.msk [vmem:[#allocation2 + $0x8] sm:$0xff] %vm97_vm0, %v302_v15 }
 0x244   :  { %461 = vmatpush.msra.mxu3 %v49_v29 }
 0x245   :  { %1772 = vmatmul.msk.f32.gmra.mxu2 %vm97_vm0, %v2090_v37 }
 0x246   :  { %462 = vmatpush.msra.mxu3 %v48_v30 }
 0x248   :  { %463 = vmatpush.msra.mxu3 %v47_v31 }
 0x24a   :  { %464 = vmatpush.msra.mxu3 %v46_v33 }
 0x24c   :  { %1099 = vmatpush.msrb.mxu3 %v61_v14 }
 0x24e   :  { %1100 = vmatpush.msrb.mxu3 %v60_v16 }
 0x250   :  { %1101 = vmatpush.msrb.mxu3 %v59_v17 }
 0x252   :  { %1102 = vmatpush.msrb.mxu3 %v58_v18 }
 0x254   :  { %1103 = vmatpush.msrb.mxu3 %v57_v19 }
 0x256   :  { %1104 = vmatpush.msrb.mxu3 %v56_v20 }
 0x258   :  { %1105 = vmatpush.msrb.mxu3 %v55_v21 }
 0x25a   :  { %1106 = vmatpush.msrb.mxu3 %v54_v22 }
 0x25c   :  { %1107 = vmatpush.msrb.mxu3 %v53_v23 }
 0x25e   :  { %1108 = vmatpush.msrb.mxu3 %v52_v24 }
 0x260   :  { %1109 = vmatpush.msrb.mxu3 %v51_v27 }
 0x262   :  { %1110 = vmatpush.msrb.mxu3 %v50_v28 }
 0x264   :  { %1111 = vmatpush.msrb.mxu3 %v49_v29 }
 0x266   :  { %1112 = vmatpush.msrb.mxu3 %v48_v30 }
 0x268   :  { %1113 = vmatpush.msrb.mxu3 %v47_v31 }
 0x26a   :  { %1114 = vmatpush.msrb.mxu3 %v46_v33 }
 0x292   :  { %v430_v3 = vpop.f32.mrf.mxu1 }
 0x293   :  { %438 = vrot.lane.b32.xlu1 %v430_v3, %s2018_s2 }
 0x29a   :  { %v433_v4 = vpop.f32.mrf.mxu1 }
 0x29b   :  { %440 = vrot.lane.b32.xlu1 %v433_v4, %s2018_s2 }
 0x2b0   :  { %v338_v5 = vpop.f32.mrf.mxu2 }
 0x2b1   :  { %346 = vrot.lane.b32.xlu2 %v338_v5, %s2019_s27 }
 0x2b2   :  { %v384_v6 = vpop.f32.mrf.mxu0 }
 0x2b3   :  { %392 = vrot.lane.b32.xlu0 %v384_v6, %s2020_s28 }
 0x2b8   :  { %v341_v7 = vpop.f32.mrf.mxu2 }
 0x2b9   :  { %348 = vrot.lane.b32.xlu2 %v341_v7, %s2019_s27 }
 0x2ba   :  { %v387_v8 = vpop.f32.mrf.mxu0 }
 0x2bb   :  { %394 = vrot.lane.b32.xlu0 %v387_v8, %s2020_s28 }
 0x2c0   :  { %v2143_v9 = vpop.f32.mrf.mxu2 }
 0x2c1   :  { %792 = vrot.lane.b32.xlu2 %v2143_v9, %s2020_s28  ;;  %v678_v13 = vsel %vm97_vm0, %v2143_v9, 0.0 }
 0x2c8   :  { %v2147_v10 = vpop.f32.mrf.mxu2 }
 0x2c9   :  { %794 = vrot.lane.b32.xlu0 %v2147_v10, %s2020_s28  ;;  %v681_v11 = vsel %vm97_vm0, %v2147_v10, 0.0 }
 0x2ca   :  { %682 = vadd.xlane.f32.xlu1 %v681_v11 }
 0x2ea   :  { %679 = vadd.xlane.f32.xlu2 %v678_v13 }
 0x302   :  { %732 = vrot.lane.b32.xlu2 %v2147_v10, %s2018_s2 }
 0x305   :  { %v439_v39 = vpop.permute.xlu1 %438 }
 0x30b   :  { %v347_v32 = vpop.permute.xlu2 %346 }
 0x30c   :  { %353 = vst.msk [vmem:[#allocation2] sm:$0xff] %vm352_vm2, %v347_v32 }
 0x30d   :  { %v441_v41 = vpop.permute.xlu1 %440 }
 0x313   :  { %v349_v34 = vpop.permute.xlu2 %348 }
 0x314   :  { %354 = vst.msk [vmem:[#allocation2 + $0x8] sm:$0xff] %vm352_vm2, %v349_v34  ;;  %v2213_v34 = vld [vmem:[#allocation3 + $0x128] ss:$0 sm:$0xff] }
 0x31b   :  { %v793_v36 = vpop.permute.xlu2 %792 }
 0x31c   :  { %v798_v38 = vsel %vm97_vm0, %v793_v36, 0.0 }
 0x31d   :  { %799 = vadd.xlane.f32.xlu1 %v798_v38 }
 0x325   :  { %v393_v40 = vpop.permute.xlu0 %392 }
 0x326   :  { %399 = vst.msk [vmem:[#allocation2] sm:$0xff] %vm398_vm3, %v393_v40 }
 0x327   :  { %445 = vst.msk [vmem:[#allocation2] sm:$0xff] %vm444_vm4, %v439_v39 }
 0x32d   :  { %v395_v42 = vpop.permute.xlu0 %394 }
 0x32e   :  { %400 = vst.msk [vmem:[#allocation2 + $0x8] sm:$0xff] %vm398_vm3, %v395_v42  ;;  %v447_v43 = vld [vmem:[#allocation2] sm:$0xff] }
 0x32f   :  { %446 = vst.msk [vmem:[#allocation2 + $0x8] sm:$0xff] %vm444_vm4, %v441_v41  ;;  %465 = vmatmul.f32.vlgmr.msra.gmra.mxu3 %v447_v43 }
 0x336   :  { %730 = vrot.lane.b32.xlu1 %v2143_v9, %s2018_s2  ;;  %v448_v44 = vld [vmem:[#allocation2 + $0x8] sm:$0xff] }
 0x337   :  { %468 = vmatmul.f32.gmra.mxu3 %v448_v44 }
 0x33b   :  { %v795_v45 = vpop.permute.xlu0 %794 }
 0x33c   :  { %v801_v46 = vsel %vm97_vm0, %v795_v45, 0.0 }
 0x33d   :  { %802 = vadd.xlane.f32.xlu2 %v801_v46  ;;  %v683_v54 = vpop.xlane.xlu1 %682 }
 0x33e   :  { %v685_v63 = vmul.f32 %v683_v54, %v2170_v58 }
 0x340   :  { %v687_v1 = vsub.f32 %v2147_v10, %v685_v63 }
 0x342   :  { %v689_v4 = vmul.f32 %v687_v1, %v687_v1  ;;  %v700_v51 = vmul.f32 %v2213_v34, %v687_v1 }
 0x344   :  { %v693_v5 = vsel %vm97_vm0, %v689_v4, 0.0 }
 0x35d   :  { %v680_v47 = vpop.xlane.xlu2 %679 }
 0x35e   :  { %v684_v59 = vmul.f32 %v680_v47, %v2170_v58 }
 0x360   :  { %v686_v61 = vsub.f32 %v2143_v9, %v684_v59 }
 0x362   :  { %v688_v0 = vmul.f32 %v686_v61, %v686_v61  ;;  %v699_v39 = vmul.f32 %v2213_v34, %v686_v61 }
 0x364   :  { %v690_v2 = vsel %vm97_vm0, %v688_v0, 0.0 }
 0x365   :  { %v733_v48 = vpop.permute.xlu2 %732 }
 0x366   :  { %v739_v49 = vsel %vm97_vm0, %v733_v48, 0.0 }
 0x367   :  { %740 = vadd.xlane.f32.xlu1 %v739_v49 }
 0x390   :  { %v800_v57 = vpop.xlane.xlu1 %799 }
 0x391   :  { %v804_v8 = vmul.f32 %v800_v57, %v2170_v58 }
 0x393   :  { %v2191_v11 = vsub.f32 %v2143_v9, %v804_v8 }
 0x395   :  { %v808_v12 = vmul.f32 %v2191_v11, %v2191_v11 }
 0x3a8   :  { %v731_v60 = vpop.permute.xlu1 %730 }
 0x3a9   :  { %v736_v62 = vsel %vm97_vm0, %v731_v60, 0.0 }
 0x3aa   :  { %737 = vadd.xlane.f32.xlu0 %v736_v62 }
 0x3b0   :  { %v803_v14 = vpop.xlane.xlu2 %802 }
 0x3b1   :  { %v805_v15 = vmul.f32 %v803_v14, %v2170_v58 }
 0x3b2   :  { %691 = vadd.xlane.f32.xlu0 %v690_v2  ;;  %v2178_v3 = vpop.f32.mrf.mxu3 }
 0x3b3   :  { %554 = vrot.lane.b32.xlu2 %v2178_v3, %s2018_s2  ;;  %v495_v13 = vsel %vm97_vm0, %v2178_v3, 0.0  ;;  %v2202_v16 = vsub.f32 %v2147_v10, %v805_v15 }
 0x3b5   :  { %v809_v17 = vmul.f32 %v2202_v16, %v2202_v16 }
 0x3ba   :  { %694 = vadd.xlane.f32.xlu0 %v693_v5  ;;  %v2183_v6 = vpop.f32.mrf.mxu3 }
 0x3bb   :  { %v498_v7 = vsel %vm97_vm0, %v2183_v6, 0.0  ;;  %556 = vrot.lane.b32.xlu2 %v2183_v6, %s2018_s2 }
 0x3bc   :  { %499 = vadd.xlane.f32.xlu1 %v498_v7 }
 0x3ce   :  { %812 = vrot.lane.b32.xlu0 %v808_v12, %s2020_s28 }
 0x3d6   :  { %616 = vrot.lane.b32.xlu0 %v2178_v3, %s2020_s28 }
 0x3da   :  { %v741_v29 = vpop.xlane.xlu1 %740 }
 0x3db   :  { %v743_v15 = vmul.f32 %v741_v29, %v2170_v58 }
 0x400   :  { %496 = vadd.xlane.f32.xlu0 %v495_v13 }
 0x40d   :  { %v555_v59 = vpop.permute.xlu2 %554 }
 0x40e   :  { %v560_v60 = vsel %vm97_vm0, %v555_v59, 0.0 }
 0x414   :  { %814 = vrot.lane.b32.xlu0 %v809_v17, %s2020_s28 }
 0x415   :  { %v557_v8 = vpop.permute.xlu2 %556 }
 0x416   :  { %v563_v12 = vsel %vm97_vm0, %v557_v8, 0.0 }
 0x41c   :  { %618 = vrot.lane.b32.xlu0 %v2183_v6, %s2020_s28 }
 0x41d   :  { %v2209_v18 = vpop.xlane.xlu0 %737 }
 0x41e   :  { %v742_v13 = vmul.f32 %v2209_v18, %v2170_v58 }
 0x420   :  { %v2244_v14 = vsub.f32 %v2143_v9, %v742_v13 }
 0x422   :  { %v746_v17 = vmul.f32 %v2244_v14, %v2244_v14 }
 0x425   :  { %v692_v19 = vpop.xlane.xlu0 %691 }
 0x426   :  { %v696_v20 = vmul.f32 %v692_v19, %v2170_v58  ;;  %v2251_v19 = vsub.f32 %v2147_v10, %v743_v15 }
 0x428   :  { %v701_v21 = vadd.f32 1e-05, %v696_v20 }
 0x42a   :  { %1854 = vrsqrt.f32 %v701_v21  ;;  %vm709_vm7 = vweird.f32 %v701_v21 }
 0x42d   :  { %v695_v22 = vpop.xlane.xlu0 %694 }
 0x42e   :  { %v697_v23 = vmul.f32 %v695_v22, %v2170_v58 }
 0x42f   :  { %v500_v40 = vpop.xlane.xlu1 %499 }
 0x430   :  { %v1855_v24 = vpop.eup %1854  ;;  %v702_v27 = vadd.f32 1e-05, %v697_v23  ;;  %v509_v45 = vmul.f32 %v2170_v58, %v500_v40 }
 0x431   :  { %v704_v28 = vmul.f32 %v1855_v24, %v701_v21  ;;  %vm710_vm6 = vweird.f32 %v1855_v24  ;;  %v747_v21 = vmul.f32 %v2251_v19, %v2251_v19 }
 0x432   :  { %1856 = vrsqrt.f32 %v702_v27  ;;  %vm711_vm8 = vmor %vm709_vm7, %vm710_vm6  ;;  %vm719_vm10 = vweird.f32 %v702_v27  ;;  %v2220_v49 = vsub.f32 %v2183_v6, %v509_v45  ;;  %v2277_v45 = vld [vmem:[#allocation3 + $0x130] ss:$0 sm:$0xff] }
 0x433   :  { %v705_v30 = vmul.f32 %v1855_v24, %v704_v28 }
 0x434   :  { %v513_v54 = vmul.f32 %v2220_v49, %v2220_v49 }
 0x435   :  { %v706_v31 = vmul.f32 0.5, %v705_v30 }
 0x436   :  { %v517_v57 = vsel %vm97_vm0, %v513_v54, 0.0 }
 0x437   :  { %v707_v32 = vsub.f32 1.5, %v706_v31 }
 0x438   :  { %v1857_v33 = vpop.eup %1856 }
 0x439   :  { %v708_v36 = vmul.f32 %v1855_v24, %v707_v32  ;;  %v714_v38 = vmul.f32 %v1857_v33, %v702_v27  ;;  %vm720_vm9 = vweird.f32 %v1857_v33 }
 0x43a   :  { %vm721_vm11 = vmor %vm719_vm10, %vm720_vm9 }
 0x43b   :  { %v712_v41 = vsel %vm711_vm8, %v1855_v24, %v708_v36  ;;  %v715_v42 = vmul.f32 %v1857_v33, %v714_v38 }
 0x43c   :  { %v2216_v43 = vmul.f32 %v712_v41, %v699_v39  ;;  %v2271_v39 = vld [vmem:[#allocation3 + $0x118] ss:$0 sm:$0xff] }
 0x43d   :  { %v716_v44 = vmul.f32 0.5, %v715_v42  ;;  %v524_v42 = vmul.f32 %v2271_v39, %v2220_v49 }
 0x43f   :  { %v717_v46 = vsub.f32 1.5, %v716_v44 }
 0x440   :  { %v813_v47 = vpop.permute.xlu0 %812 }
 0x441   :  { %v718_v48 = vmul.f32 %v1857_v33, %v717_v46  ;;  %v818_v50 = vsel %vm97_vm0, %v813_v47, 0.0 }
 0x442   :  { %819 = vadd.xlane.f32.xlu1 %v818_v50 }
 0x443   :  { %v722_v52 = vsel %vm721_vm11, %v1857_v33, %v718_v48 }
 0x444   :  { %v2224_v53 = vmul.f32 %v722_v52, %v700_v51 }
 0x446   :  { %v727_v47 = vadd.f32 %v2277_v45, %v2224_v53 }
 0x448   :  { %v617_v55 = vpop.permute.xlu0 %616 }
 0x449   :  { %v622_v56 = vsel %vm97_vm0, %v617_v55, 0.0 }
 0x44a   :  { %623 = vadd.xlane.f32.xlu0 %v622_v56  ;;  %518 = vadd.xlane.f32.xlu1 %v517_v57 }
 0x452   :  { %561 = vadd.xlane.f32.xlu0 %v560_v60 }
 0x473   :  { %v497_v61 = vpop.xlane.xlu0 %496 }
 0x474   :  { %v508_v62 = vmul.f32 %v2170_v58, %v497_v61 }
 0x476   :  { %v2233_v0 = vsub.f32 %v2178_v3, %v508_v62 }
 0x478   :  { %v512_v2 = vmul.f32 %v2233_v0, %v2233_v0 }
 0x47a   :  { %v514_v5 = vsel %vm97_vm0, %v512_v2, 0.0 }
 0x486   :  { %v815_v63 = vpop.permute.xlu0 %814 }
 0x487   :  { %v821_v1 = vsel %vm97_vm0, %v815_v63, 0.0 }
 0x488   :  { %822 = vadd.xlane.f32.xlu0 %v821_v1 }
 0x48e   :  { %v619_v4 = vpop.permute.xlu0 %618 }
 0x48f   :  { %v625_v7 = vsel %vm97_vm0, %v619_v4, 0.0 }
 0x490   :  { %515 = vadd.xlane.f32.xlu0 %v514_v5  ;;  %626 = vadd.xlane.f32.xlu2 %v625_v7 }
 0x498   :  { %564 = vadd.xlane.f32.xlu2 %v563_v12 }
 0x4b0   :  { %750 = vrot.lane.b32.xlu2 %v746_v17, %s2018_s2 }
 0x4b5   :  { %v820_v20 = vpop.xlane.xlu1 %819 }
 0x4b6   :  { %v824_v51 = vmul.f32 %v820_v20, %v2170_v58 }
 0x4b8   :  { %752 = vrot.lane.b32.xlu2 %v747_v21, %s2018_s2  ;;  %v828_v52 = vadd.f32 1e-05, %v824_v51 }
 0x4ba   :  { %vm836_vm6 = vweird.f32 %v828_v52 }
 0x4bd   :  { %v624_v18 = vpop.xlane.xlu0 %623  ;;  %v519_v22 = vpop.xlane.xlu1 %518 }
 0x4be   :  { %v628_v9 = vmul.f32 %v624_v18, %v2170_v58  ;;  %v521_v23 = vmul.f32 %v519_v22, %v2170_v58 }
 0x4c0   :  { %v2259_v24 = vsub.f32 %v2178_v3, %v628_v9  ;;  %v526_v27 = vadd.f32 1e-05, %v521_v23 }
 0x4c2   :  { %1858 = vrsqrt.f32 %v526_v27  ;;  %v632_v10 = vmul.f32 %v2259_v24, %v2259_v24  ;;  %vm543_vm13 = vweird.f32 %v526_v27 }
 0x4c3   :  { %1860 = vrsqrt.f32 %v828_v52 }
 0x4c4   :  { %636 = vrot.lane.b32.xlu0 %v632_v10, %s2020_s28 }
 0x4c5   :  { %v562_v28 = vpop.xlane.xlu0 %561 }
 0x4c6   :  { %v566_v29 = vmul.f32 %v562_v28, %v2170_v58 }
 0x4c8   :  { %v1859_v30 = vpop.eup %1858  ;;  %v2266_v31 = vsub.f32 %v2178_v3, %v566_v29  ;;  %v2275_v3 = vld [vmem:[#allocation3 + $0x120] ss:$0 sm:$0xff] }
 0x4c9   :  { %v538_v32 = vmul.f32 %v1859_v30, %v526_v27  ;;  %vm544_vm12 = vweird.f32 %v1859_v30  ;;  %v1861_v54 = vpop.eup %1860  ;;  %v827_v27 = vmul.f32 %v2213_v34, %v2202_v16 }
 0x4ca   :  { %v570_v33 = vmul.f32 %v2266_v31, %v2266_v31  ;;  %vm545_vm14 = vmor %vm543_vm13, %vm544_vm12  ;;  %v831_v56 = vmul.f32 %v1861_v54, %v828_v52  ;;  %vm837_vm15 = vweird.f32 %v1861_v54 }
 0x4cb   :  { %v539_v36 = vmul.f32 %v1859_v30, %v538_v32  ;;  %vm838_vm7 = vmor %vm836_vm6, %vm837_vm15  ;;  %v826_v32 = vmul.f32 %v2213_v34, %v2191_v11 }
 0x4cc   :  { %574 = vrot.lane.b32.xlu0 %v570_v33, %s2018_s2  ;;  %v832_v59 = vmul.f32 %v1861_v54, %v831_v56 }
 0x4cd   :  { %v540_v38 = vmul.f32 0.5, %v539_v36 }
 0x4ce   :  { %v833_v63 = vmul.f32 0.5, %v832_v59 }
 0x4cf   :  { %v541_v40 = vsub.f32 1.5, %v540_v38 }
 0x4d0   :  { %v834_v8 = vsub.f32 1.5, %v833_v63 }
 0x4d1   :  { %v542_v41 = vmul.f32 %v1859_v30, %v541_v40 }
 0x4d2   :  { %v835_v20 = vmul.f32 %v1861_v54, %v834_v8 }
 0x4d3   :  { %v546_v44 = vsel %vm545_vm14, %v1859_v30, %v542_v41  ;;  %v523_v41 = vmul.f32 %v2271_v39, %v2233_v0 }
 0x4d4   :  { %v548_v46 = vmul.f32 %v546_v44, %v524_v42  ;;  %v839_v30 = vsel %vm838_vm7, %v1861_v54, %v835_v20 }
 0x4d5   :  { %v850_v38 = vmul.f32 %v839_v30, %v826_v32 }
 0x4d6   :  { %v551_v48 = vadd.f32 %v2275_v3, %v548_v46 }
 0x4d7   :  { %v852_v42 = vadd.f32 %v2277_v45, %v850_v38 }
 0x4d8   :  { %v2282_v50 = vadd.f32 %v727_v47, %v551_v48  ;;  %v726_v47 = vadd.f32 %v2277_v45, %v2216_v43 }
 0x4da   :  { %v857_v43 = vmul.f32 0.5, %v2282_v50 }
 0x4fb   :  { %v823_v49 = vpop.xlane.xlu0 %822 }
 0x4fc   :  { %v825_v55 = vmul.f32 %v823_v49, %v2170_v58 }
 0x4fe   :  { %v829_v57 = vadd.f32 1e-05, %v825_v55 }
 0x500   :  { %1862 = vrsqrt.f32 %v829_v57  ;;  %vm846_vm8 = vweird.f32 %v829_v57 }
 0x503   :  { %v627_v60 = vpop.xlane.xlu2 %626  ;;  %v516_v61 = vpop.xlane.xlu0 %515 }
 0x504   :  { %v629_v53 = vmul.f32 %v627_v60, %v2170_v58  ;;  %v520_v62 = vmul.f32 %v516_v61, %v2170_v58 }
 0x506   :  { %v1863_v1 = vpop.eup %1862  ;;  %v2289_v2 = vsub.f32 %v2183_v6, %v629_v53  ;;  %v525_v4 = vadd.f32 1e-05, %v520_v62 }
 0x507   :  { %v841_v5 = vmul.f32 %v1863_v1, %v829_v57  ;;  %vm847_vm5 = vweird.f32 %v1863_v1 }
 0x508   :  { %1864 = vrsqrt.f32 %v525_v4  ;;  %v633_v7 = vmul.f32 %v2289_v2, %v2289_v2  ;;  %vm848_vm9 = vmor %vm846_vm8, %vm847_vm5  ;;  %vm533_vm11 = vweird.f32 %v525_v4 }
 0x509   :  { %v842_v12 = vmul.f32 %v1863_v1, %v841_v5  ;;  %1866 = vtanh.f32 %v857_v43 }
 0x50a   :  { %638 = vrot.lane.b32.xlu2 %v633_v7, %s2020_s28 }
 0x50b   :  { %v843_v13 = vmul.f32 0.5, %v842_v12  ;;  %v565_v15 = vpop.xlane.xlu2 %564 }
 0x50c   :  { %v567_v17 = vmul.f32 %v565_v15, %v2170_v58 }
 0x50d   :  { %v844_v21 = vsub.f32 1.5, %v843_v13 }
 0x50e   :  { %v1865_v18 = vpop.eup %1864  ;;  %v2296_v22 = vsub.f32 %v2183_v6, %v567_v17 }
 0x50f   :  { %v845_v9 = vmul.f32 %v1863_v1, %v844_v21  ;;  %v528_v23 = vmul.f32 %v1865_v18, %v525_v4  ;;  %vm534_vm10 = vweird.f32 %v1865_v18  ;;  %v1867_v61 = vpop.eup %1866 }
 0x510   :  { %v571_v10 = vmul.f32 %v2296_v22, %v2296_v22  ;;  %vm535_vm12 = vmor %vm533_vm11, %vm534_vm10  ;;  %v861_v53 = vadd.f32 1.0, %v1867_v61 }
 0x511   :  { %v529_v28 = vmul.f32 %v1865_v18, %v528_v23  ;;  %v849_v29 = vsel %vm848_vm9, %v1863_v1, %v845_v9 }
 0x512   :  { %576 = vrot.lane.b32.xlu1 %v571_v10, %s2018_s2  ;;  %v851_v6 = vmul.f32 %v849_v29, %v827_v27  ;;  %v863_v4 = vmul.f32 0.5, %v861_v53  ;;  %v650_v53 = vmul.f32 %v2271_v39, %v2259_v24  ;;  %v651_v24 = vmul.f32 %v2271_v39, %v2289_v2 }
 0x513   :  { %v530_v33 = vmul.f32 0.5, %v529_v28  ;;  %v751_v0 = vpop.permute.xlu2 %750 }
 0x514   :  { %v853_v36 = vadd.f32 %v2277_v45, %v851_v6  ;;  %v756_v55 = vsel %vm97_vm0, %v751_v0, 0.0 }
 0x515   :  { %v531_v40 = vsub.f32 1.5, %v530_v33 }
 0x516   :  { %878 = vrot.lane.b32.xlu0 %v853_v36, %s2020_s28 }
 0x517   :  { %v532_v16 = vmul.f32 %v1865_v18, %v531_v40 }
 0x519   :  { %v536_v11 = vsel %vm535_vm12, %v1865_v18, %v532_v16  ;;  %v588_v16 = vmul.f32 %v2271_v39, %v2266_v31 }
 0x51a   :  { %876 = vrot.lane.b32.xlu1 %v852_v42, %s2020_s28  ;;  %v547_v44 = vmul.f32 %v536_v11, %v523_v41 }
 0x51b   :  { %v753_v56 = vpop.permute.xlu2 %752 }
 0x51c   :  { %v550_v46 = vadd.f32 %v2275_v3, %v547_v44  ;;  %v759_v18 = vsel %vm97_vm0, %v753_v56, 0.0 }
 0x51e   :  { %v854_v48 = vadd.f32 %v726_v47, %v550_v46 }
 0x520   :  { %v856_v60 = vmul.f32 0.5, %v854_v48 }
 0x522   :  { %1868 = vtanh.f32 %v856_v60 }
 0x528   :  { %v1869_v62 = vpop.eup %1868 }
 0x529   :  { %v860_v5 = vadd.f32 1.0, %v1869_v62 }
 0x52b   :  { %v862_v12 = vmul.f32 0.5, %v860_v5 }
 0x536   :  { %v637_v51 = vpop.permute.xlu0 %636 }
 0x537   :  { %v642_v54 = vsel %vm97_vm0, %v637_v51, 0.0 }
 0x53e   :  { %v575_v52 = vpop.permute.xlu0 %574 }
 0x53f   :  { %v580_v49 = vsel %vm97_vm0, %v575_v52, 0.0  ;;  %v764_v52 = vmul.f32 %v2213_v34, %v2244_v14 }
 0x540   :  { %643 = vadd.xlane.f32.xlu0 %v642_v54  ;;  %581 = vadd.xlane.f32.xlu2 %v580_v49 }
 0x548   :  { %757 = vadd.xlane.f32.xlu0 %v756_v55 }
 0x564   :  { %v639_v57 = vpop.permute.xlu2 %638 }
 0x565   :  { %v645_v59 = vsel %vm97_vm0, %v639_v57, 0.0 }
 0x566   :  { %646 = vadd.xlane.f32.xlu1 %v645_v59 }
 0x584   :  { %v577_v63 = vpop.permute.xlu1 %576 }
 0x585   :  { %v583_v1 = vsel %vm97_vm0, %v577_v63, 0.0 }
 0x586   :  { %584 = vadd.xlane.f32.xlu0 %v583_v1 }
 0x588   :  { %v879_v7 = vpop.permute.xlu0 %878 }
 0x589   :  { %v883_v8 = vmul.f32 %v879_v7, %v863_v4 }
 0x58b   :  { %888 = vrot.lane.b32.xlu1 %v883_v8, %s2020_s28 }
 0x58c   :  { %v877_v13 = vpop.permute.xlu1 %876 }
 0x58d   :  { %v882_v15 = vmul.f32 %v877_v13, %v862_v12 }
 0x58f   :  { %886 = vrot.lane.b32.xlu2 %v882_v15, %s2020_s28 }
 0x5b3   :  { %v582_v50 = vpop.xlane.xlu2 %581  ;;  %v644_v17 = vpop.xlane.xlu0 %643 }
 0x5b4   :  { %v586_v20 = vmul.f32 %v582_v50, %v2170_v58  ;;  %v648_v23 = vmul.f32 %v644_v17, %v2170_v58 }
 0x5b6   :  { %v590_v21 = vadd.f32 1e-05, %v586_v20  ;;  %v652_v30 = vadd.f32 1e-05, %v648_v23 }
 0x5b8   :  { %1870 = vrsqrt.f32 %v590_v21  ;;  %760 = vadd.xlane.f32.xlu2 %v759_v18  ;;  %vm598_vm14 = vweird.f32 %v590_v21  ;;  %vm660_vm9 = vweird.f32 %v652_v30 }
 0x5bb   :  { %v758_v9 = vpop.xlane.xlu0 %757 }
 0x5bc   :  { %v762_v27 = vmul.f32 %v758_v9, %v2170_v58 }
 0x5be   :  { %v1871_v10 = vpop.eup %1870  ;;  %v766_v28 = vadd.f32 1e-05, %v762_v27 }
 0x5bf   :  { %v593_v29 = vmul.f32 %v1871_v10, %v590_v21  ;;  %vm599_vm13 = vweird.f32 %v1871_v10 }
 0x5c0   :  { %1872 = vrsqrt.f32 %v766_v28  ;;  %vm600_vm15 = vmor %vm598_vm14, %vm599_vm13  ;;  %vm774_vm6 = vweird.f32 %v766_v28 }
 0x5c1   :  { %v594_v32 = vmul.f32 %v1871_v10, %v593_v29  ;;  %1874 = vrsqrt.f32 %v652_v30 }
 0x5c3   :  { %v595_v6 = vmul.f32 0.5, %v594_v32 }
 0x5c5   :  { %v596_v33 = vsub.f32 1.5, %v595_v6 }
 0x5c6   :  { %v1873_v36 = vpop.eup %1872 }
 0x5c7   :  { %v597_v38 = vmul.f32 %v1871_v10, %v596_v33  ;;  %v769_v40 = vmul.f32 %v1873_v36, %v766_v28  ;;  %v1875_v11 = vpop.eup %1874  ;;  %vm775_vm5 = vweird.f32 %v1873_v36 }
 0x5c8   :  { %v655_v47 = vmul.f32 %v1875_v11, %v652_v30  ;;  %vm776_vm7 = vmor %vm774_vm6, %vm775_vm5  ;;  %vm661_vm8 = vweird.f32 %v1875_v11 }
 0x5c9   :  { %v601_v41 = vsel %vm600_vm15, %v1871_v10, %v597_v38  ;;  %v770_v42 = vmul.f32 %v1873_v36, %v769_v40  ;;  %vm662_vm10 = vmor %vm660_vm9, %vm661_vm8 }
 0x5ca   :  { %v612_v44 = vmul.f32 %v601_v41, %v588_v16  ;;  %v656_v54 = vmul.f32 %v1875_v11, %v655_v47 }
 0x5cb   :  { %v771_v46 = vmul.f32 0.5, %v770_v42 }
 0x5cc   :  { %v614_v0 = vadd.f32 %v2275_v3, %v612_v44  ;;  %v657_v56 = vmul.f32 0.5, %v656_v54 }
 0x5cd   :  { %v772_v48 = vsub.f32 1.5, %v771_v46  ;;  %v589_v46 = vmul.f32 %v2271_v39, %v2296_v22 }
 0x5ce   :  { %v658_v59 = vsub.f32 1.5, %v657_v56 }
 0x5cf   :  { %v773_v51 = vmul.f32 %v1873_v36, %v772_v48  ;;  %v765_v48 = vmul.f32 %v2213_v34, %v2251_v19 }
 0x5d0   :  { %908 = vrot.lane.b32.xlu2 %v2086_v35, %s2019_s27  ;;  %v659_v14 = vmul.f32 %v1875_v11, %v658_v59 }
 0x5d1   :  { %v777_v31 = vsel %vm776_vm7, %v1873_v36, %v773_v51 }
 0x5d2   :  { %v788_v49 = vmul.f32 %v777_v31, %v764_v52  ;;  %v663_v35 = vsel %vm662_vm10, %v1875_v11, %v659_v14 }
 0x5d3   :  { %v674_v63 = vmul.f32 %v663_v35, %v650_v53 }
 0x5d4   :  { %v790_v55 = vadd.f32 %v2277_v45, %v788_v49 }
 0x5d5   :  { %v676_v5 = vadd.f32 %v2275_v3, %v674_v63 }
 0x5d6   :  { %v2334_v57 = vadd.f32 %v790_v55, %v614_v0 }
 0x5d8   :  { %v866_v55 = vmul.f32 0.5, %v2334_v57 }
 0x5d9   :  { %v647_v43 = vpop.xlane.xlu1 %646 }
 0x5da   :  { %v649_v60 = vmul.f32 %v647_v43, %v2170_v58 }
 0x5dc   :  { %v653_v61 = vadd.f32 1e-05, %v649_v60 }
 0x5de   :  { %1876 = vrsqrt.f32 %v653_v61  ;;  %vm670_vm12 = vweird.f32 %v653_v61 }
 0x5e4   :  { %v1877_v62 = vpop.eup %1876 }
 0x5e5   :  { %v665_v1 = vmul.f32 %v1877_v62, %v653_v61  ;;  %vm671_vm11 = vweird.f32 %v1877_v62 }
 0x5e6   :  { %vm672_vm13 = vmor %vm670_vm12, %vm671_vm11 }
 0x5e7   :  { %v666_v4 = vmul.f32 %v1877_v62, %v665_v1 }
 0x5e9   :  { %v667_v7 = vmul.f32 0.5, %v666_v4  ;;  %v887_v8 = vpop.permute.xlu2 %886 }
 0x5ea   :  { %v892_v12 = vadd.f32 %v887_v8, %v676_v5 }
 0x5eb   :  { %v668_v13 = vsub.f32 1.5, %v667_v7 }
 0x5ec   :  { %1878 = vtanh.f32 %v892_v12 }
 0x5ed   :  { %v669_v15 = vmul.f32 %v1877_v62, %v668_v13 }
 0x5ef   :  { %v673_v17 = vsel %vm672_vm13, %v1877_v62, %v669_v15 }
 0x5f0   :  { %v675_v20 = vmul.f32 %v673_v17, %v651_v24 }
 0x5f2   :  { %v1879_v50 = vpop.eup %1878  ;;  %v677_v21 = vadd.f32 %v2275_v3, %v675_v20 }
 0x5f3   :  { %900 = vrot.lane.b32.xlu0 %v1879_v50, %s2018_s2  ;;  %v1944_v50 = vld [vmem:[#allocation3 + $0x70] ss:$0 sm:$0xff] }
 0x5f9   :  { %v585_v27 = vpop.xlane.xlu0 %584 }
 0x5fa   :  { %v587_v10 = vmul.f32 %v585_v27, %v2170_v58  ;;  %v1946_v27 = vld [vmem:[%s2649_s0 + $0x8] sm:$0xff] }
 0x5fc   :  { %v591_v28 = vadd.f32 1e-05, %v587_v10 }
 0x5fd   :  { %v889_v18 = vpop.permute.xlu1 %888 }
 0x5fe   :  { %v893_v9 = vadd.f32 %v889_v18, %v677_v21  ;;  %vm608_vm15 = vweird.f32 %v591_v28 }
 0x600   :  { %1880 = vtanh.f32 %v893_v9 }
 0x601   :  { %1882 = vrsqrt.f32 %v591_v28 }
 0x606   :  { %v1881_v23 = vpop.eup %1880 }
 0x607   :  { %902 = vrot.lane.b32.xlu1 %v1881_v23, %s2018_s2  ;;  %v1883_v29 = vpop.eup %1882  ;;  %v1945_v23 = vld [vmem:[%s2649_s0] sm:$0xff] }
 0x608   :  { %v603_v30 = vmul.f32 %v1883_v29, %v591_v28  ;;  %vm609_vm14 = vweird.f32 %v1883_v29 }
 0x609   :  { %vm610_vm5 = vmor %vm608_vm15, %vm609_vm14 }
 0x60a   :  { %v604_v6 = vmul.f32 %v1883_v29, %v603_v30  ;;  %v1947_v30 = vld [vmem:[%s2649_s0 + $0x10] sm:$0xff] }
 0x60c   :  { %v605_v36 = vmul.f32 0.5, %v604_v6  ;;  %v1950_v6 = vld [vmem:[#allocation3 + $0x100] sm:$0xff] }
 0x60e   :  { %v606_v38 = vsub.f32 1.5, %v605_v36  ;;  %v1952_v36 = vld [vmem:[%s2649_s0 + $0x18] sm:$0xff] }
 0x60f   :  { %910 = vrot.lane.b32.xlu1 %v2090_v37, %s2019_s27 }
 0x610   :  { %v607_v41 = vmul.f32 %v1883_v29, %v606_v38 }
 0x612   :  { %v611_v11 = vsel %vm610_vm5, %v1883_v29, %v607_v41 }
 0x613   :  { %v613_v51 = vmul.f32 %v611_v11, %v589_v46  ;;  %v78_v11 = vld [vmem:[#allocation3 + $0x178] sm:$0xff]  ;;  %v1954_v46 = vld [vmem:[%s2649_s0 + $0x30] sm:$0xff] }
 0x615   :  { %v615_v31 = vadd.f32 %v2275_v3, %v613_v51 }
 0x62b   :  { %v761_v2 = vpop.xlane.xlu2 %760 }
 0x62c   :  { %v763_v32 = vmul.f32 %v761_v2, %v2170_v58  ;;  %v1948_v2 = vld [vmem:[#allocation3 + $0x110] sm:$0xff] }
 0x62e   :  { %v767_v33 = vadd.f32 1e-05, %v763_v32  ;;  %v1949_v32 = vld [vmem:[#allocation3 + $0x108] sm:$0xff] }
 0x630   :  { %1884 = vrsqrt.f32 %v767_v33  ;;  %vm784_vm7 = vweird.f32 %v767_v33 }
 0x631   :  { %1886 = vtanh.f32 %v866_v55 }
 0x633   :  { %v909_v43 = vpop.permute.xlu2 %908 }
 0x636   :  { %v1885_v40 = vpop.eup %1884 }
 0x637   :  { %v779_v16 = vmul.f32 %v1885_v40, %v767_v33  ;;  %vm785_vm6 = vweird.f32 %v1885_v40  ;;  %v1887_v56 = vpop.eup %1886  ;;  %v1951_v33 = vld [vmem:[#allocation3 + $0xf8] sm:$0xff] }
 0x638   :  { %vm786_vm8 = vmor %vm784_vm7, %vm785_vm6  ;;  %v870_v59 = vadd.f32 1.0, %v1887_v56 }
 0x639   :  { %v780_v37 = vmul.f32 %v1885_v40, %v779_v16 }
 0x63a   :  { %v872_v22 = vmul.f32 0.5, %v870_v59 }
 0x63b   :  { %v781_v42 = vmul.f32 0.5, %v780_v37 }
 0x63c   :  { %v896_v60 = vsub.f32 1.0, %v872_v22  ;;  %v914_v14 = vmul.f32 %v909_v43, %v872_v22 }
 0x63d   :  { %v782_v44 = vsub.f32 1.5, %v781_v42 }
 0x63f   :  { %v783_v47 = vmul.f32 %v1885_v40, %v782_v44  ;;  %v1953_v44 = vld [vmem:[%s2649_s0 + $0x20] sm:$0xff] }
 0x641   :  { %v787_v52 = vsel %vm786_vm8, %v1885_v40, %v783_v47  ;;  %v77_v47 = vld [vmem:[#allocation3 + $0x170] sm:$0xff] }
 0x642   :  { %v789_v54 = vmul.f32 %v787_v52, %v765_v48  ;;  %v2395_v48 = vld [vmem:[#allocation3 + $0x20] sm:$0x1]  ;;  %v1955_v52 = vld [vmem:[%s2649_s0 + $0x28] sm:$0xff] }
 0x643   :  { %v119_v51 = vadd.f32 %v2084_v26, %v2395_v48 }
 0x644   :  { %v791_v49 = vadd.f32 %v2277_v45, %v789_v54  ;;  %v1956_v54 = vld [vmem:[%s2649_s0 + $0x38] sm:$0xff]  ;;  %s2022_s0 = smov 48  }
 0x646   :  { %v865_v0 = vadd.f32 %v791_v49, %v615_v31 }
 0x648   :  { %v867_v35 = vmul.f32 0.5, %v865_v0 }
 0x64a   :  { %1888 = vtanh.f32 %v867_v35 }
 0x650   :  { %v1889_v53 = vpop.eup %1888 }
 0x651   :  { %v871_v62 = vadd.f32 1.0, %v1889_v53 }
 0x653   :  { %v873_v57 = vmul.f32 0.5, %v871_v62 }
 0x655   :  { %v897_v1 = vsub.f32 1.0, %v873_v57 }
 0x665   :  { %v901_v61 = vpop.permute.xlu0 %900 }
 0x666   :  { %v906_v34 = vmul.f32 %v901_v61, %v896_v60 }
 0x668   :  { %v2356_v19 = vadd.f32 %v914_v14, %v906_v34 }
 0x66a   :  { %920 = vrot.lane.b32.xlu0 %v2356_v19, %s2018_s2 }
 0x679   :  { %v903_v63 = vpop.permute.xlu1 %902 }
 0x67a   :  { %v907_v5 = vmul.f32 %v903_v63, %v897_v1 }
 0x681   :  { %v911_v4 = vpop.permute.xlu1 %910 }
 0x682   :  { %v915_v7 = vmul.f32 %v911_v4, %v873_v57 }
 0x684   :  { %v2360_v8 = vadd.f32 %v915_v7, %v907_v5 }
 0x686   :  { %922 = vrot.lane.b32.xlu1 %v2360_v8, %s2018_s2 }
 0x6dc   :  { %v921_v12 = vpop.permute.xlu0 %920 }
 0x6dd   :  { %1773 = vmatmul.msk.f32.vlgmr.msrb.gmra.mxu0 %vm97_vm0, %v921_v12 }
 0x6f8   :  { %v923_v13 = vpop.permute.xlu1 %922 }
 0x6f9   :  { %1774 = vmatmul.msk.f32.gmra.mxu0 %vm97_vm0, %v923_v13 }
 0x75a   :  { %v945_v15 = vpop.f32.mrf.mxu0 }
 0x75b   :  { %v946_v17 = vadd.f32 %v1944_v50, %v945_v15 }
 0x75d   :  { %1890 = vtanh.f32 %v946_v17 }
 0x763   :  { %v1891_v21 = vpop.eup %1890 }
 0x776   :  { %v948_v24 = vpop.f32.mrf.mxu0 }
 0x777   :  { %v949_v20 = vadd.f32 %v1944_v50, %v948_v24 }
 0x779   :  { %1892 = vtanh.f32 %v949_v20 }
 0x77a   :  { %1894 = vtanh.f32 %v119_v51 }
 0x77f   :  { %v1893_v18 = vpop.eup %1892 }
 0x780   :  { %967 = vmatpush.msra.mxu1 %v1893_v18  ;;  %v1825_v9 = vpack.i.bf16 %v1891_v21, %v1893_v18  ;;  %v1895_v31 = vpop.eup %1894 }
 0x782   :  { %1826 = vrot.lane.b32.xlu1 %v1825_v9, %s2019_s27  ;;  %1821 = vrot.lane.b32.xlu0 %v1825_v9, %s2020_s28 }
 0x783   :  { %1816 = vrot.lane.b32.xlu2 %v1825_v9, %s2018_s2  ;;  %968 = vmatpush.msra.mxu1 %v1891_v21 }
 0x784   :  { %1775 = vmatmul.msk.f32.vlgmr.msra.gmra.mxu1 %vm182_vm1, %v1945_v23 }
 0x78c   :  { %1776 = vmatmul.msk.f32.gmra.mxu1 %vm182_vm1, %v1946_v27 }
 0x7dd   :  { %v1817_v10 = vpop.permute.xlu2 %1816 }
 0x7de   :  { %v1818_v28 = vunpack.i.l.bf16 %v1817_v10  ;;  %v1819_v29 = vunpack.i.h.bf16 %v1817_v10 }
 0x7e0   :  { %1000 = vmatpush.msrb.mxu2 %v1818_v28 }
 0x7e2   :  { %1001 = vmatpush.msrb.mxu2 %v1819_v29 }
 0x7e3   :  { %1777 = vmatmul.msk.f32.vlgmr.msrb.gmra.mxu2 %vm182_vm1, %v1947_v30 }
 0x7e4   :  { %1134 = vmatpush.msra.mxu2 %v1948_v2 }
 0x7e6   :  { %1135 = vmatpush.msra.mxu2 %v1949_v32 }
 0x7e8   :  { %1136 = vmatpush.msra.mxu2 %v1950_v6 }
 0x7ea   :  { %1137 = vmatpush.msra.mxu2 %v1951_v33 }
 0x7eb   :  { %1778 = vmatmul.msk.f32.gmra.mxu2 %vm182_vm1, %v1952_v36 }
 0x7f3   :  { %1783 = vmatmul.msk.f32.vlgmr.msra.gmra.mxu2 %vm97_vm0, %v921_v12 }
 0x7f4   :  { %v1827_v38 = vpop.permute.xlu1 %1826  ;;  %v1822_v40 = vpop.permute.xlu0 %1821 }
 0x7f5   :  { %v1828_v16 = vunpack.i.l.bf16 %v1827_v38  ;;  %v1823_v41 = vunpack.i.l.bf16 %v1822_v40  ;;  %v1829_v37 = vunpack.i.h.bf16 %v1827_v38  ;;  %v1824_v42 = vunpack.i.h.bf16 %v1822_v40 }
 0x7f7   :  { %1039 = vmatpush.msra.mxu0 %v1823_v41  ;;  %1078 = vmatpush.msrb.mxu1 %v1828_v16 }
 0x7f9   :  { %1040 = vmatpush.msra.mxu0 %v1824_v42  ;;  %1079 = vmatpush.msrb.mxu1 %v1829_v37 }
 0x7fa   :  { %1779 = vmatmul.msk.f32.vlgmr.msra.gmra.mxu0 %vm182_vm1, %v1953_v44  ;;  %1781 = vmatmul.msk.f32.vlgmr.msrb.gmra.mxu1 %vm182_vm1, %v1954_v46 }
 0x7fb   :  { %1784 = vmatmul.msk.f32.gmra.mxu2 %vm97_vm0, %v923_v13  ;;  %1674 = vmatpush.msrb.mxu0 %v78_v11 }
 0x7fd   :  { %1675 = vmatpush.msrb.mxu0 %v77_v47 }
 0x801   :  { %v970_v49 = vpop.f32.mrf.mxu1 }
 0x802   :  { %1780 = vmatmul.msk.f32.gmra.mxu0 %vm182_vm1, %v1955_v52  ;;  %1782 = vmatmul.msk.f32.gmra.mxu1 %vm182_vm1, %v1956_v54  ;;  %976 = vst.msk [vmem:[#allocation2] sm:$0xff] %vm97_vm0, %v970_v49 }
 0x809   :  { %v973_v26 = vpop.f32.mrf.mxu1 }
 0x80a   :  { %1785 = vmatmul.msk.f32.vlgmr.msrb.gmra.mxu0 %vm182_vm1, %v1895_v31  ;;  %977 = vst.msk [vmem:[#allocation2 + $0x8] sm:$0xff] %vm97_vm0, %v973_v26 }
 0x866   :  { %v1003_v0 = vpop.f32.mrf.mxu2 }
 0x867   :  { %1011 = vrot.lane.b32.xlu2 %v1003_v0, %s2019_s27 }
 0x86e   :  { %v1006_v55 = vpop.f32.mrf.mxu2 }
 0x86f   :  { %1013 = vrot.lane.b32.xlu2 %v1006_v55, %s2019_s27 }
 0x876   :  { %v2412_v56 = vpop.f32.mrf.mxu2 }
 0x877   :  { %1431 = vrot.lane.b32.xlu2 %v2412_v56, %s2020_s28  ;;  %v1042_v59 = vpop.f32.mrf.mxu0  ;;  %v1081_v22 = vpop.f32.mrf.mxu1  ;;  %v1319_v14 = vsel %vm97_vm0, %v2412_v56, 0.0 }
 0x878   :  { %1050 = vrot.lane.b32.xlu0 %v1042_v59, %s2020_s28  ;;  %1089 = vrot.lane.b32.xlu1 %v1081_v22, %s2018_s2 }
 0x87e   :  { %v2422_v61 = vpop.f32.mrf.mxu2 }
 0x87f   :  { %1369 = vrot.lane.b32.xlu2 %v2412_v56, %s2018_s2  ;;  %v1045_v43 = vpop.f32.mrf.mxu0  ;;  %v1084_v60 = vpop.f32.mrf.mxu1  ;;  %v1322_v34 = vsel %vm97_vm0, %v2422_v61, 0.0 }
 0x880   :  { %1052 = vrot.lane.b32.xlu0 %v1045_v43, %s2020_s28  ;;  %1091 = vrot.lane.b32.xlu1 %v1084_v60, %s2018_s2 }
 0x888   :  { %1433 = vrot.lane.b32.xlu0 %v2422_v61, %s2020_s28 }
 0x8a8   :  { %1320 = vadd.xlane.f32.xlu2 %v1319_v14 }
 0x8aa   :  { %1323 = vadd.xlane.f32.xlu1 %v1322_v34 }
 0x8c1   :  { %v1012_v35 = vpop.permute.xlu2 %1011 }
 0x8c2   :  { %1017 = vst.msk [vmem:[#allocation2] sm:$0xff] %vm352_vm2, %v1012_v35 }
 0x8c9   :  { %v1014_v53 = vpop.permute.xlu2 %1013 }
 0x8ca   :  { %1018 = vst.msk [vmem:[#allocation2 + $0x8] sm:$0xff] %vm352_vm2, %v1014_v53 }
 0x8d1   :  { %v1432_v62 = vpop.permute.xlu2 %1431 }
 0x8d2   :  { %v1437_v63 = vsel %vm97_vm0, %v1432_v62, 0.0 }
 0x8d3   :  { %1438 = vadd.xlane.f32.xlu1 %v1437_v63 }
 0x8d9   :  { %v1370_v50 = vpop.permute.xlu2 %1369 }
 0x8da   :  { %v1375_v51 = vsel %vm97_vm0, %v1370_v50, 0.0 }
 0x8ea   :  { %v1051_v57 = vpop.permute.xlu0 %1050  ;;  %v1090_v1 = vpop.permute.xlu1 %1089 }
 0x8eb   :  { %1056 = vst.msk [vmem:[#allocation2] sm:$0xff] %vm398_vm3, %v1051_v57 }
 0x8ec   :  { %1095 = vst.msk [vmem:[#allocation2] sm:$0xff] %vm444_vm4, %v1090_v1 }
 0x8f2   :  { %v1053_v4 = vpop.permute.xlu0 %1052  ;;  %v1092_v5 = vpop.permute.xlu1 %1091 }
 0x8f3   :  { %1057 = vst.msk [vmem:[#allocation2 + $0x8] sm:$0xff] %vm398_vm3, %v1053_v4  ;;  %v1097_v7 = vld [vmem:[#allocation2] sm:$0xff] }
 0x8f4   :  { %1096 = vst.msk [vmem:[#allocation2 + $0x8] sm:$0xff] %vm444_vm4, %v1092_v5  ;;  %1115 = vmatmul.f32.vlgmr.msrb.gmra.mxu3 %v1097_v7 }
 0x8fa   :  { %v1434_v12 = vpop.permute.xlu0 %1433 }
 0x8fb   :  { %v1440_v13 = vsel %vm97_vm0, %v1434_v12, 0.0  ;;  %v1098_v15 = vld [vmem:[#allocation2 + $0x8] sm:$0xff] }
 0x8fc   :  { %1441 = vadd.xlane.f32.xlu2 %v1440_v13  ;;  %1118 = vmatmul.f32.gmra.mxu3 %v1098_v15 }
 0x91b   :  { %v1321_v17 = vpop.xlane.xlu2 %1320 }
 0x91c   :  { %v1325_v24 = vmul.f32 %v1321_v17, %v2170_v58 }
 0x91d   :  { %v1324_v9 = vpop.xlane.xlu1 %1323 }
 0x91e   :  { %v2440_v20 = vsub.f32 %v2412_v56, %v1325_v24  ;;  %v1326_v37 = vmul.f32 %v1324_v9, %v2170_v58 }
 0x920   :  { %v1329_v21 = vmul.f32 %v2440_v20, %v2440_v20  ;;  %v1328_v42 = vsub.f32 %v2422_v61, %v1326_v37 }
 0x922   :  { %v1331_v18 = vsel %vm97_vm0, %v1329_v21, 0.0  ;;  %v1330_v46 = vmul.f32 %v1328_v42, %v1328_v42 }
 0x923   :  { %1332 = vadd.xlane.f32.xlu1 %v1331_v18 }
 0x924   :  { %v1334_v47 = vsel %vm97_vm0, %v1330_v46, 0.0 }
 0x946   :  { %v1439_v23 = vpop.xlane.xlu1 %1438 }
 0x947   :  { %v1443_v27 = vmul.f32 %v1439_v23, %v2170_v58 }
 0x949   :  { %v2447_v10 = vsub.f32 %v2412_v56, %v1443_v27 }
 0x94b   :  { %v1447_v28 = vmul.f32 %v2447_v10, %v2447_v10 }
 0x94d   :  { %1451 = vrot.lane.b32.xlu0 %v1447_v28, %s2020_s28 }
 0x96f   :  { %v1442_v6 = vpop.xlane.xlu2 %1441 }
 0x970   :  { %v1444_v33 = vmul.f32 %v1442_v6, %v2170_v58 }
 0x972   :  { %v2468_v36 = vsub.f32 %v2422_v61, %v1444_v33 }
 0x974   :  { %v1448_v38 = vmul.f32 %v2468_v36, %v2468_v36 }
 0x977   :  { %v2452_v29 = vpop.f32.mrf.mxu3 }
 0x978   :  { %1195 = vrot.lane.b32.xlu2 %v2452_v29, %s2018_s2  ;;  %1257 = vrot.lane.b32.xlu0 %v2452_v29, %s2020_s28  ;;  %v1145_v2 = vsel %vm97_vm0, %v2452_v29, 0.0 }
 0x97f   :  { %v2458_v30 = vpop.f32.mrf.mxu3 }
 0x980   :  { %1197 = vrot.lane.b32.xlu1 %v2458_v30, %s2018_s2  ;;  %v1148_v32 = vsel %vm97_vm0, %v2458_v30, 0.0 }
 0x996   :  { %v1333_v26 = vpop.xlane.xlu1 %1332 }
 0x997   :  { %v1337_v37 = vmul.f32 %v1333_v26, %v2170_v58 }
 0x9a2   :  { %1146 = vadd.xlane.f32.xlu0 %v1145_v2 }
 0x9aa   :  { %1149 = vadd.xlane.f32.xlu1 %v1148_v32 }
 0x9b6   :  { %1453 = vrot.lane.b32.xlu0 %v1448_v38, %s2020_s28  ;;  %v2517_v38 = vld [vmem:[#allocation3 + $0x128] ss:$0 sm:$0xff] }
 0x9be   :  { %1259 = vrot.lane.b32.xlu0 %v2458_v30, %s2020_s28 }
 0x9bf   :  { %v1452_v41 = vpop.permute.xlu0 %1451 }
 0x9c0   :  { %v1457_v52 = vsel %vm97_vm0, %v1452_v41, 0.0 }
 0x9c6   :  { %1371 = vrot.lane.b32.xlu0 %v2422_v61, %s2018_s2 }
 0x9d2   :  { %v1196_v40 = vpop.permute.xlu2 %1195 }
 0x9d3   :  { %v1201_v16 = vsel %vm97_vm0, %v1196_v40, 0.0  ;;  %v1340_v40 = vmul.f32 %v2517_v38, %v1328_v42 }
 0x9d4   :  { %1202 = vadd.xlane.f32.xlu2 %v1201_v16 }
 0x9ea   :  { %v1258_v11 = vpop.permute.xlu0 %1257 }
 0x9eb   :  { %v1263_v44 = vsel %vm97_vm0, %v1258_v11, 0.0 }
 0x9ec   :  { %1264 = vadd.xlane.f32.xlu1 %v1263_v44  ;;  %v1341_v44 = vadd.f32 1e-05, %v1337_v37 }
 0x9ee   :  { %vm1349_vm13 = vweird.f32 %v1341_v44 }
 0x9f0   :  { %1335 = vadd.xlane.f32.xlu0 %v1334_v47 }
 0x9f2   :  { %v1198_v59 = vpop.permute.xlu1 %1197 }
 0x9f3   :  { %v1204_v22 = vsel %vm97_vm0, %v1198_v59, 0.0 }
 0x9f8   :  { %1376 = vadd.xlane.f32.xlu0 %v1375_v51 }
 0xa00   :  { %1458 = vadd.xlane.f32.xlu0 %v1457_v52 }
 0xa15   :  { %v1147_v54 = vpop.xlane.xlu0 %1146 }
 0xa16   :  { %v1151_v31 = vmul.f32 %v1147_v54, %v2170_v58 }
 0xa18   :  { %v2486_v49 = vsub.f32 %v2452_v29, %v1151_v31 }
 0xa1a   :  { %v1155_v0 = vmul.f32 %v2486_v49, %v2486_v49 }
 0xa1c   :  { %v1157_v55 = vsel %vm97_vm0, %v1155_v0, 0.0 }
 0xa1d   :  { %1158 = vadd.xlane.f32.xlu1 %v1157_v55  ;;  %v1150_v35 = vpop.xlane.xlu1 %1149 }
 0xa1e   :  { %v1152_v53 = vmul.f32 %v1150_v35, %v2170_v58 }
 0xa20   :  { %v2496_v63 = vsub.f32 %v2458_v30, %v1152_v53 }
 0xa22   :  { %v1156_v1 = vmul.f32 %v2496_v63, %v2496_v63 }
 0xa24   :  { %v1160_v4 = vsel %vm97_vm0, %v1156_v1, 0.0 }
 0xa25   :  { %1205 = vadd.xlane.f32.xlu1 %v1204_v22 }
 0xa28   :  { %v1454_v43 = vpop.permute.xlu0 %1453 }
 0xa29   :  { %v1460_v60 = vsel %vm97_vm0, %v1454_v43, 0.0 }
 0xa2a   :  { %1461 = vadd.xlane.f32.xlu2 %v1460_v60 }
 0xa30   :  { %v1260_v14 = vpop.permute.xlu0 %1259 }
 0xa31   :  { %v1266_v34 = vsel %vm97_vm0, %v1260_v14, 0.0 }
 0xa32   :  { %1267 = vadd.xlane.f32.xlu2 %v1266_v34 }
 0xa38   :  { %v1372_v62 = vpop.permute.xlu0 %1371 }
 0xa39   :  { %v1378_v57 = vsel %vm97_vm0, %v1372_v62, 0.0 }
 0xa3a   :  { %1379 = vadd.xlane.f32.xlu2 %v1378_v57 }
 0xa42   :  { %1161 = vadd.xlane.f32.xlu2 %v1160_v4 }
 0xa47   :  { %v1203_v22 = vpop.xlane.xlu2 %1202 }
 0xa5f   :  { %v1265_v5 = vpop.xlane.xlu1 %1264 }
 0xa60   :  { %v1269_v7 = vmul.f32 %v1265_v5, %v2170_v58 }
 0xa62   :  { %v2504_v12 = vsub.f32 %v2452_v29, %v1269_v7 }
 0xa63   :  { %v1336_v13 = vpop.xlane.xlu0 %1335 }
 0xa64   :  { %v1338_v15 = vmul.f32 %v1336_v13, %v2170_v58  ;;  %v1273_v50 = vmul.f32 %v2504_v12, %v2504_v12 }
 0xa66   :  { %v1342_v17 = vadd.f32 1e-05, %v1338_v15  ;;  %1277 = vrot.lane.b32.xlu1 %v1273_v50, %s2020_s28  ;;  %v1465_v50 = vmul.f32 %v2517_v38, %v2447_v10 }
 0xa68   :  { %1896 = vrsqrt.f32 %v1342_v17  ;;  %vm1359_vm3 = vweird.f32 %v1342_v17 }
 0xa6b   :  { %v1377_v24 = vpop.xlane.xlu0 %1376 }
 0xa6c   :  { %v1381_v21 = vmul.f32 %v1377_v24, %v2170_v58 }
 0xa6e   :  { %v1897_v18 = vpop.eup %1896  ;;  %v2512_v9 = vsub.f32 %v2412_v56, %v1381_v21 }
 0xa6f   :  { %v1354_v23 = vmul.f32 %v1897_v18, %v1342_v17  ;;  %vm1360_vm1 = vweird.f32 %v1897_v18 }
 0xa70   :  { %v1385_v27 = vmul.f32 %v2512_v9, %v2512_v9  ;;  %vm1361_vm4 = vmor %vm1359_vm3, %vm1360_vm1 }
 0xa71   :  { %v1355_v28 = vmul.f32 %v1897_v18, %v1354_v23 }
 0xa72   :  { %1389 = vrot.lane.b32.xlu1 %v1385_v27, %s2018_s2  ;;  %v1339_v27 = vmul.f32 %v2517_v38, %v2440_v20 }
 0xa73   :  { %v1356_v2 = vmul.f32 0.5, %v1355_v28  ;;  %v1459_v6 = vpop.xlane.xlu0 %1458 }
 0xa74   :  { %v1463_v16 = vmul.f32 %v1459_v6, %v2170_v58 }
 0xa75   :  { %v1357_v32 = vsub.f32 1.5, %v1356_v2  ;;  %v1165_v2 = vmul.f32 %v2271_v39, %v2486_v49  ;;  %v1207_v49 = vmul.f32 %v1203_v22, %v2170_v58 }
 0xa76   :  { %v1467_v11 = vadd.f32 1e-05, %v1463_v16 }
 0xa77   :  { %v1358_v33 = vmul.f32 %v1897_v18, %v1357_v32 }
 0xa78   :  { %1898 = vrsqrt.f32 %v1467_v11  ;;  %vm1475_vm10 = vweird.f32 %v1467_v11 }
 0xa79   :  { %v1362_v56 = vsel %vm1361_vm4, %v1897_v18, %v1358_v33  ;;  %1900 = vrsqrt.f32 %v1341_v44 }
 0xa7a   :  { %v2521_v41 = vmul.f32 %v1362_v56, %v1340_v40 }
 0xa7e   :  { %v1899_v46 = vpop.eup %1898 }
 0xa7f   :  { %v1470_v47 = vmul.f32 %v1899_v46, %v1467_v11  ;;  %v1901_v51 = vpop.eup %1900  ;;  %vm1476_vm9 = vweird.f32 %v1899_v46 }
 0xa80   :  { %v1344_v52 = vmul.f32 %v1901_v51, %v1341_v44  ;;  %vm1350_vm11 = vweird.f32 %v1901_v51  ;;  %vm1477_vm12 = vmor %vm1475_vm10, %vm1476_vm9 }
 0xa81   :  { %v1471_v54 = vmul.f32 %v1899_v46, %v1470_v47  ;;  %vm1351_vm14 = vmor %vm1349_vm13, %vm1350_vm11 }
 0xa82   :  { %v1345_v0 = vmul.f32 %v1901_v51, %v1344_v52 }
 0xa83   :  { %v1472_v55 = vmul.f32 0.5, %v1471_v54  ;;  %v2552_v54 = vsub.f32 %v2452_v29, %v1207_v49 }
 0xa84   :  { %v1346_v43 = vmul.f32 0.5, %v1345_v0 }
 0xa85   :  { %v1473_v60 = vsub.f32 1.5, %v1472_v55 }
 0xa86   :  { %v1347_v34 = vsub.f32 1.5, %v1346_v43  ;;  %v2564_v43 = vld [vmem:[#allocation3 + $0x130] ss:$0 sm:$0xff] }
 0xa87   :  { %v1474_v35 = vmul.f32 %v1899_v46, %v1473_v60 }
 0xa88   :  { %v1348_v5 = vmul.f32 %v1901_v51, %v1347_v34 }
 0xa89   :  { %v1478_v15 = vsel %vm1477_vm12, %v1899_v46, %v1474_v35 }
 0xa8a   :  { %v1489_v21 = vmul.f32 %v1478_v15, %v1465_v50  ;;  %v1352_v18 = vsel %vm1351_vm14, %v1901_v51, %v1348_v5  ;;  %v1366_v50 = vadd.f32 %v2564_v43, %v2521_v41 }
 0xa8b   :  { %v1363_v6 = vmul.f32 %v1352_v18, %v1339_v27 }
 0xa8c   :  { %v1491_v32 = vadd.f32 %v2277_v45, %v1489_v21 }
 0xa8d   :  { %v1365_v39 = vadd.f32 %v2277_v45, %v1363_v6 }
 0xa90   :  { %v1159_v31 = vpop.xlane.xlu1 %1158 }
 0xa91   :  { %v1163_v42 = vmul.f32 %v1159_v31, %v2170_v58 }
 0xa93   :  { %v1167_v59 = vadd.f32 1e-05, %v1163_v42  ;;  %v1211_v42 = vmul.f32 %v2552_v54, %v2552_v54 }
 0xa95   :  { %1902 = vrsqrt.f32 %v1167_v59  ;;  %vm1175_vm5 = vweird.f32 %v1167_v59 }
 0xa98   :  { %v1206_v26 = vpop.xlane.xlu1 %1205 }
 0xa99   :  { %v1208_v14 = vmul.f32 %v1206_v26, %v2170_v58 }
 0xa9b   :  { %v1903_v53 = vpop.eup %1902  ;;  %v2527_v62 = vsub.f32 %v2458_v30, %v1208_v14 }
 0xa9c   :  { %v1170_v57 = vmul.f32 %v1903_v53, %v1167_v59  ;;  %vm1176_vm15 = vweird.f32 %v1903_v53 }
 0xa9d   :  { %v1462_v1 = vpop.xlane.xlu2 %1461  ;;  %v1212_v4 = vmul.f32 %v2527_v62, %v2527_v62  ;;  %vm1177_vm6 = vmor %vm1175_vm5, %vm1176_vm15 }
 0xa9e   :  { %v1171_v7 = vmul.f32 %v1903_v53, %v1170_v57  ;;  %v1464_v13 = vmul.f32 %v1462_v1, %v2170_v58  ;;  %v2571_v1 = vld [vmem:[#allocation3 + $0x118] ss:$0 sm:$0xff] }
 0xa9f   :  { %1217 = vrot.lane.b32.xlu2 %v1212_v4, %s2018_s2  ;;  %v1166_v4 = vmul.f32 %v2571_v1, %v2496_v63 }
 0xaa0   :  { %v1172_v17 = vmul.f32 0.5, %v1171_v7  ;;  %v1468_v24 = vadd.f32 1e-05, %v1464_v13  ;;  %v2575_v13 = vld [vmem:[#allocation3 + $0x120] ss:$0 sm:$0xff] }
 0xaa2   :  { %v1173_v23 = vsub.f32 1.5, %v1172_v17  ;;  %1904 = vrsqrt.f32 %v1468_v24  ;;  %vm1485_vm8 = vweird.f32 %v1468_v24 }
 0xaa4   :  { %v1174_v28 = vmul.f32 %v1903_v53, %v1173_v23 }
 0xaa5   :  { %v1268_v10 = vpop.xlane.xlu2 %1267 }
 0xaa6   :  { %v1178_v33 = vsel %vm1177_vm6, %v1903_v53, %v1174_v28  ;;  %v1270_v40 = vmul.f32 %v1268_v10, %v2170_v58 }
 0xaa7   :  { %1515 = vrot.lane.b32.xlu2 %v1491_v32, %s2020_s28  ;;  %v1189_v56 = vmul.f32 %v1178_v33, %v1165_v2 }
 0xaa8   :  { %v1905_v16 = vpop.eup %1904  ;;  %v2543_v37 = vsub.f32 %v2458_v30, %v1270_v40 }
 0xaa9   :  { %v1480_v20 = vmul.f32 %v1905_v16, %v1468_v24  ;;  %v1191_v11 = vadd.f32 %v2275_v3, %v1189_v56  ;;  %vm1486_vm7 = vweird.f32 %v1905_v16  ;;  %v1466_v3 = vmul.f32 %v2517_v38, %v2468_v36 }
 0xaaa   :  { %v1274_v44 = vmul.f32 %v2543_v37, %v2543_v37  ;;  %vm1487_vm1 = vmor %vm1485_vm8, %vm1486_vm7 }
 0xaab   :  { %v1481_v46 = vmul.f32 %v1905_v16, %v1480_v20  ;;  %v1493_v47 = vadd.f32 %v1365_v39, %v1191_v11 }
 0xaac   :  { %1279 = vrot.lane.b32.xlu0 %v1274_v44, %s2020_s28 }
 0xaad   :  { %v1482_v51 = vmul.f32 0.5, %v1481_v46  ;;  %v1380_v52 = vpop.xlane.xlu2 %1379  ;;  %v1495_v18 = vmul.f32 0.5, %v1493_v47 }
 0xaae   :  { %v1382_v45 = vmul.f32 %v1380_v52, %v2170_v58 }
 0xaaf   :  { %v1483_v30 = vsub.f32 1.5, %v1482_v51 }
 0xab0   :  { %v2561_v29 = vsub.f32 %v2422_v61, %v1382_v45 }
 0xab1   :  { %v1484_v31 = vmul.f32 %v1905_v16, %v1483_v30 }
 0xab2   :  { %v1386_v26 = vmul.f32 %v2561_v29, %v2561_v29 }
 0xab3   :  { %v1488_v0 = vsel %vm1487_vm1, %v1905_v16, %v1484_v31 }
 0xab4   :  { %1215 = vrot.lane.b32.xlu0 %v1211_v42, %s2018_s2  ;;  %v1490_v55 = vmul.f32 %v1488_v0, %v1466_v3 }
 0xab5   :  { %v1162_v59 = vpop.xlane.xlu2 %1161 }
 0xab6   :  { %v1164_v22 = vmul.f32 %v1162_v59, %v2170_v58  ;;  %v1492_v36 = vadd.f32 %v2564_v43, %v1490_v55  ;;  %v1839_v59 = vld [vmem:[#allocation3 + $0x138] ss:$0 sm:$0xff] }
 0xab8   :  { %v1168_v60 = vadd.f32 1e-05, %v1164_v22  ;;  %1517 = vrot.lane.b32.xlu1 %v1492_v36, %s2020_s28 }
 0xaba   :  { %1906 = vrsqrt.f32 %v1168_v60  ;;  %vm1185_vm4 = vweird.f32 %v1168_v60 }
 0xabb   :  { %1908 = vtanh.f32 %v1495_v18 }
 0xabc   :  { %1391 = vrot.lane.b32.xlu0 %v1386_v26, %s2018_s2 }
 0xac0   :  { %v1907_v14 = vpop.eup %1906 }
 0xac1   :  { %v1180_v34 = vmul.f32 %v1907_v14, %v1168_v60  ;;  %vm1186_vm3 = vweird.f32 %v1907_v14  ;;  %v1909_v23 = vpop.eup %1908  ;;  %v1291_v60 = vmul.f32 %v2571_v1, %v2504_v12 }
 0xac2   :  { %vm1187_vm9 = vmor %vm1185_vm4, %vm1186_vm3  ;;  %v1499_v28 = vadd.f32 1.0, %v1909_v23 }
 0xac3   :  { %v1181_v35 = vmul.f32 %v1907_v14, %v1180_v34 }
 0xac4   :  { %v1501_v2 = vmul.f32 0.5, %v1499_v28 }
 0xac5   :  { %v1182_v61 = vmul.f32 0.5, %v1181_v35 }
 0xac7   :  { %v1183_v53 = vsub.f32 1.5, %v1182_v61 }
 0xac9   :  { %v1184_v57 = vmul.f32 %v1907_v14, %v1183_v53 }
 0xacb   :  { %v1188_v5 = vsel %vm1187_vm9, %v1907_v14, %v1184_v57 }
 0xacc   :  { %v1190_v7 = vmul.f32 %v1188_v5, %v1166_v4 }
 0xace   :  { %v1192_v15 = vadd.f32 %v2575_v13, %v1190_v7 }
 0xad0   :  { %v1494_v17 = vadd.f32 %v1366_v50, %v1192_v15 }
 0xad2   :  { %v1496_v6 = vmul.f32 0.5, %v1494_v17 }
 0xad4   :  { %1910 = vtanh.f32 %v1496_v6 }
 0xad8   :  { %v1278_v24 = vpop.permute.xlu1 %1277 }
 0xad9   :  { %v1283_v21 = vsel %vm97_vm0, %v1278_v24, 0.0 }
 0xada   :  { %1284 = vadd.xlane.f32.xlu2 %v1283_v21  ;;  %v1911_v40 = vpop.eup %1910 }
 0xadb   :  { %v1500_v16 = vadd.f32 1.0, %v1911_v40 }
 0xadd   :  { %v1502_v39 = vmul.f32 0.5, %v1500_v16 }
 0xae4   :  { %v1390_v56 = vpop.permute.xlu1 %1389 }
 0xae5   :  { %v1395_v11 = vsel %vm97_vm0, %v1390_v56, 0.0 }
 0xaf9   :  { %v1218_v27 = vpop.permute.xlu2 %1217 }
 0xafa   :  { %v1224_v63 = vsel %vm97_vm0, %v1218_v27, 0.0 }
 0xafb   :  { %1225 = vadd.xlane.f32.xlu2 %v1224_v63 }
 0xb01   :  { %v1516_v10 = vpop.permute.xlu2 %1515 }
 0xb02   :  { %v1521_v32 = vmul.f32 %v1516_v10, %v1501_v2 }
 0xb04   :  { %1525 = vrot.lane.b32.xlu0 %v1521_v32, %s2020_s28  ;;  %v1292_v32 = vmul.f32 %v2571_v1, %v2543_v37 }
 0xb1e   :  { %v1280_v41 = vpop.permute.xlu0 %1279 }
 0xb1f   :  { %v1286_v33 = vsel %vm97_vm0, %v1280_v41, 0.0 }
 0xb20   :  { %1287 = vadd.xlane.f32.xlu1 %v1286_v33 }
 0xb26   :  { %v1216_v20 = vpop.permute.xlu0 %1215 }
 0xb27   :  { %v1221_v31 = vsel %vm97_vm0, %v1216_v20, 0.0 }
 0xb28   :  { %1396 = vadd.xlane.f32.xlu1 %v1395_v11 }
 0xb2a   :  { %v1518_v49 = vpop.permute.xlu1 %1517 }
 0xb2b   :  { %v1522_v44 = vmul.f32 %v1518_v49, %v1502_v39 }
 0xb2d   :  { %1527 = vrot.lane.b32.xlu0 %v1522_v44, %s2020_s28 }
 0xb2e   :  { %v1392_v46 = vpop.permute.xlu0 %1391 }
 0xb2f   :  { %v1398_v47 = vsel %vm97_vm0, %v1392_v46, 0.0 }
 0xb30   :  { %1399 = vadd.xlane.f32.xlu2 %v1398_v47 }
 0xb4d   :  { %v1285_v51 = vpop.xlane.xlu2 %1284 }
 0xb4e   :  { %v1289_v52 = vmul.f32 %v1285_v51, %v2170_v58 }
 0xb50   :  { %v1293_v30 = vadd.f32 1e-05, %v1289_v52 }
 0xb52   :  { %1912 = vrsqrt.f32 %v1293_v30  ;;  %vm1301_vm11 = vweird.f32 %v1293_v30 }
 0xb57   :  { %1222 = vadd.xlane.f32.xlu0 %v1221_v31 }
 0xb58   :  { %v1913_v3 = vpop.eup %1912 }
 0xb59   :  { %v1296_v45 = vmul.f32 %v1913_v3, %v1293_v30  ;;  %vm1302_vm10 = vweird.f32 %v1913_v3  ;;  %v1230_v30 = vmul.f32 %v2571_v1, %v2527_v62 }
 0xb5a   :  { %vm1303_vm12 = vmor %vm1301_vm11, %vm1302_vm10 }
 0xb5b   :  { %v1297_v42 = vmul.f32 %v1913_v3, %v1296_v45  ;;  %v1404_v45 = vmul.f32 %v2517_v38, %v2561_v29  ;;  %v143_v29 = vadd.f32 %v2082_v25, %v2395_v48  ;;  %v1403_v25 = vmul.f32 %v2517_v38, %v2512_v9 }
 0xb5d   :  { %v1298_v0 = vmul.f32 0.5, %v1297_v42 }
 0xb5f   :  { %v1299_v55 = vsub.f32 1.5, %v1298_v0 }
 0xb61   :  { %v1300_v22 = vmul.f32 %v1913_v3, %v1299_v55 }
 0xb63   :  { %v1304_v36 = vsel %vm1303_vm12, %v1913_v3, %v1300_v22  ;;  %vm1552_vm12 = vcmask 122880  }
 0xb64   :  { %v1315_v26 = vmul.f32 %v1304_v36, %v1291_v60 }
 0xb66   :  { %v1317_v14 = vadd.f32 %v2575_v13, %v1315_v26 }
 0xb6b   :  { %1559 = vrot.lane.b32.xlu0 %v1839_v59, %s2019_s27 }
 0xb6e   :  { %v1226_v53 = vpop.xlane.xlu2 %1225 }
 0xb6f   :  { %v1228_v57 = vmul.f32 %v1226_v53, %v2170_v58 }
 0xb71   :  { %v1232_v4 = vadd.f32 1e-05, %v1228_v57 }
 0xb73   :  { %vm1249_vm6 = vweird.f32 %v1232_v4 }
 0xb76   :  { %v1526_v34 = vpop.permute.xlu0 %1525 }
 0xb77   :  { %v1531_v35 = vadd.f32 %v1526_v34, %v1317_v14 }
 0xb79   :  { %1914 = vtanh.f32 %v1531_v35 }
 0xb7a   :  { %1916 = vrsqrt.f32 %v1232_v4 }
 0xb7f   :  { %v1915_v61 = vpop.eup %1914 }
 0xb80   :  { %1539 = vrot.lane.b32.xlu1 %v1915_v61, %s2018_s2  ;;  %v1917_v12 = vpop.eup %1916 }
 0xb81   :  { %v1244_v24 = vmul.f32 %v1917_v12, %v1232_v4  ;;  %vm1250_vm5 = vweird.f32 %v1917_v12 }
 0xb82   :  { %vm1251_vm7 = vmor %vm1249_vm6, %vm1250_vm5  ;;  %vm1593_vm6 = vcmask 400768  }
 0xb83   :  { %v1245_v63 = vmul.f32 %v1917_v12, %v1244_v24 }
 0xb85   :  { %v1246_v6 = vmul.f32 0.5, %v1245_v63 }
 0xb87   :  { %v1247_v56 = vsub.f32 1.5, %v1246_v6 }
 0xb89   :  { %v1248_v49 = vmul.f32 %v1917_v12, %v1247_v56 }
 0xb8b   :  { %v1252_v47 = vsel %vm1251_vm7, %v1917_v12, %v1248_v49 }
 0xb8c   :  { %v1254_v42 = vmul.f32 %v1252_v47, %v1230_v30 }
 0xb8e   :  { %v1256_v22 = vadd.f32 %v2575_v13, %v1254_v42 }
 0xb93   :  { %v1288_v5 = vpop.xlane.xlu1 %1287 }
 0xb94   :  { %v1290_v7 = vmul.f32 %v1288_v5, %v2170_v58 }
 0xb96   :  { %v1294_v15 = vadd.f32 1e-05, %v1290_v7 }
 0xb98   :  { %1918 = vrsqrt.f32 %v1294_v15  ;;  %vm1311_vm14 = vweird.f32 %v1294_v15 }
 0xb9b   :  { %v1397_v37 = vpop.xlane.xlu1 %1396 }
 0xb9c   :  { %v1401_v31 = vmul.f32 %v1397_v37, %v2170_v58 }
 0xb9e   :  { %v1919_v50 = vpop.eup %1918  ;;  %v1405_v59 = vadd.f32 1e-05, %v1401_v31 }
 0xb9f   :  { %v1306_v17 = vmul.f32 %v1919_v50, %v1294_v15  ;;  %vm1312_vm13 = vweird.f32 %v1919_v50  ;;  %v1528_v16 = vpop.permute.xlu0 %1527 }
 0xba0   :  { %vm1313_vm15 = vmor %vm1311_vm14, %vm1312_vm13  ;;  %vm1413_vm9 = vweird.f32 %v1405_v59 }
 0xba1   :  { %v1307_v21 = vmul.f32 %v1919_v50, %v1306_v17 }
 0xba3   :  { %v1308_v18 = vmul.f32 0.5, %v1307_v21  ;;  %v1400_v23 = vpop.xlane.xlu2 %1399 }
 0xba4   :  { %v1402_v27 = vmul.f32 %v1400_v23, %v2170_v58 }
 0xba5   :  { %v1309_v28 = vsub.f32 1.5, %v1308_v18  ;;  %v1229_v18 = vmul.f32 %v2571_v1, %v2552_v54 }
 0xba6   :  { %v1406_v2 = vadd.f32 1e-05, %v1402_v27 }
 0xba7   :  { %v1310_v10 = vmul.f32 %v1919_v50, %v1309_v28 }
 0xba8   :  { %1920 = vrsqrt.f32 %v1406_v2  ;;  %vm1423_vm1 = vweird.f32 %v1406_v2 }
 0xba9   :  { %v1314_v41 = vsel %vm1313_vm15, %v1919_v50, %v1310_v10  ;;  %v71_v50 = vld [vmem:[#allocation3 + $0x140] sm:$0x1] }
 0xbaa   :  { %v1316_v33 = vmul.f32 %v1314_v41, %v1292_v32 }
 0xbac   :  { %v1318_v40 = vadd.f32 %v2575_v13, %v1316_v33 }
 0xbae   :  { %v1921_v20 = vpop.eup %1920  ;;  %v1532_v11 = vadd.f32 %v1528_v16, %v1318_v40 }
 0xbaf   :  { %v1418_v39 = vmul.f32 %v1921_v20, %v1406_v2  ;;  %vm1424_vm8 = vweird.f32 %v1921_v20 }
 0xbb0   :  { %1922 = vtanh.f32 %v1532_v11  ;;  %vm1425_vm3 = vmor %vm1423_vm1, %vm1424_vm8 }
 0xbb1   :  { %v1419_v44 = vmul.f32 %v1921_v20, %v1418_v39  ;;  %1924 = vrsqrt.f32 %v1405_v59 }
 0xbb3   :  { %v1420_v46 = vmul.f32 0.5, %v1419_v44 }
 0xbb5   :  { %v1421_v51 = vsub.f32 1.5, %v1420_v46 }
 0xbb6   :  { %v1923_v52 = vpop.eup %1922 }
 0xbb7   :  { %v1422_v3 = vmul.f32 %v1921_v20, %v1421_v51  ;;  %1541 = vrot.lane.b32.xlu2 %v1923_v52, %s2018_s2  ;;  %v1925_v62 = vpop.eup %1924 }
 0xbb8   :  { %v1408_v26 = vmul.f32 %v1925_v62, %v1405_v59  ;;  %vm1414_vm4 = vweird.f32 %v1925_v62 }
 0xbb9   :  { %v1426_v0 = vsel %vm1425_vm3, %v1921_v20, %v1422_v3  ;;  %vm1415_vm10 = vmor %vm1413_vm9, %vm1414_vm4  ;;  %v72_v3 = vld [vmem:[#allocation3 + $0x148] sm:$0x1] }
 0xbba   :  { %v1428_v55 = vmul.f32 %v1426_v0, %v1404_v45  ;;  %v1409_v35 = vmul.f32 %v1925_v62, %v1408_v26  ;;  %v1962_v26 = vld [vmem:[%s2650_s1 + $0x8] sm:$0xff] }
 0xbbb   :  { %vm1582_vm5 = vcmp.gt.f32.partialorder %v1962_v26, 0.5 }
 0xbbc   :  { %v1430_v36 = vadd.f32 %v2564_v43, %v1428_v55  ;;  %v1410_v53 = vmul.f32 0.5, %v1409_v35 }
 0xbbe   :  { %v1504_v60 = vadd.f32 %v1430_v36, %v1256_v22  ;;  %v1411_v57 = vsub.f32 1.5, %v1410_v53  ;;  %v2023_v36 = vmov 48  }
 0xbbf   :  { %1831 = vset.pattern.permute.xlu2 %v2023_v36  ;;  %1830 = vset.pattern.permute.xlu0 %v2023_v36 }
 0xbc0   :  { %v1412_v15 = vmul.f32 %v1925_v62, %v1411_v57  ;;  %v1506_v11 = vmul.f32 0.5, %v1504_v60  ;;  %v1961_v60 = vld [vmem:[%s2650_s1] sm:$0xff]  ;;  %s2024_s1 = smov [#allocation6]  }
 0xbc1   :  { %vm1581_vm15 = vcmp.gt.f32.partialorder %v1961_v60, 0.5 }
 0xbc2   :  { %v1416_v24 = vsel %vm1415_vm10, %v1925_v62, %v1412_v15 }
 0xbc3   :  { %v1427_v23 = vmul.f32 %v1416_v24, %v1403_v25 }
 0xbc5   :  { %v1429_v10 = vadd.f32 %v2564_v43, %v1427_v23 }
 0xbca   :  { %v1223_v14 = vpop.xlane.xlu0 %1222 }
 0xbcb   :  { %v1227_v34 = vmul.f32 %v1223_v14, %v2170_v58 }
 0xbcd   :  { %v1231_v61 = vadd.f32 1e-05, %v1227_v34 }
 0xbcf   :  { %1926 = vrsqrt.f32 %v1231_v61  ;;  %vm1239_vm13 = vweird.f32 %v1231_v61 }
 0xbd0   :  { %1928 = vtanh.f32 %v143_v29 }
 0xbd5   :  { %v1927_v4 = vpop.eup %1926 }
 0xbd6   :  { %v1234_v5 = vmul.f32 %v1927_v4, %v1231_v61  ;;  %v1929_v7 = vpop.eup %1928  ;;  %vm1240_vm11 = vweird.f32 %v1927_v4 }
 0xbd7   :  { %v1551_v58 = vmul.f32 %v1929_v7, %v71_v50  ;;  %vm1241_vm14 = vmor %vm1239_vm13, %vm1240_vm11 }
 0xbd8   :  { %v1235_v12 = vmul.f32 %v1927_v4, %v1234_v5 }
 0xbd9   :  { %v1553_v27 = vsel %vm1552_vm12, %v1551_v58, 0.0 }
 0xbda   :  { %v1236_v17 = vmul.f32 0.5, %v1235_v12 }
 0xbdc   :  { %v1237_v21 = vsub.f32 1.5, %v1236_v17 }
 0xbdd   :  { %v1560_v56 = vpop.permute.xlu0 %1559 }
 0xbde   :  { %v1238_v48 = vmul.f32 %v1927_v4, %v1237_v21 }
 0xbe0   :  { %v1242_v63 = vsel %vm1241_vm14, %v1927_v4, %v1238_v48  ;;  %1554 = vadd.xlane.f32.xlu2 %v1553_v27 }
 0xbe1   :  { %v1253_v28 = vmul.f32 %v1242_v63, %v1229_v18 }
 0xbe3   :  { %v1255_v2 = vadd.f32 %v2575_v13, %v1253_v28 }
 0xbe5   :  { %v1503_v32 = vadd.f32 %v1429_v10, %v1255_v2 }
 0xbe7   :  { %v1505_v6 = vmul.f32 0.5, %v1503_v32 }
 0xbe9   :  { %1930 = vtanh.f32 %v1505_v6 }
 0xbea   :  { %1932 = vtanh.f32 %v1506_v11 }
 0xbef   :  { %v1931_v41 = vpop.eup %1930 }
 0xbf0   :  { %v1509_v9 = vadd.f32 1.0, %v1931_v41  ;;  %v1933_v43 = vpop.eup %1932 }
 0xbf1   :  { %v1510_v13 = vadd.f32 1.0, %v1933_v43 }
 0xbf2   :  { %v1511_v38 = vmul.f32 0.5, %v1509_v9  ;;  %v1540_v40 = vpop.permute.xlu1 %1539 }
 0xbf3   :  { %v1512_v39 = vmul.f32 0.5, %v1510_v13 }
 0xbf4   :  { %v1535_v33 = vsub.f32 1.0, %v1511_v38  ;;  %v1547_v54 = vmul.f32 %v1511_v38, %v2356_v19 }
 0xbf5   :  { %v1536_v49 = vsub.f32 1.0, %v1512_v39  ;;  %v1548_v46 = vmul.f32 %v1512_v39, %v2360_v8 }
 0xbf6   :  { %v1545_v1 = vmul.f32 %v1540_v40, %v1535_v33 }
 0xbf8   :  { %v2618_v16 = vadd.f32 %v1547_v54, %v1545_v1 }
 0xbfa   :  { %v1562_v20 = vmul.f32 %v1560_v56, %v2618_v16 }
 0xbfc   :  { %1566 = vrot.lane.b32.xlu1 %v1562_v20, %s2018_s2 }
 0xc11   :  { %v1542_v44 = vpop.permute.xlu2 %1541 }
 0xc12   :  { %v1546_v37 = vmul.f32 %v1542_v44, %v1536_v49  ;;  %v76_v49 = vld [vmem:[#allocation3 + $0x168] sm:$0xff]  ;;  %v75_v44 = vld [vmem:[#allocation3 + $0x160] sm:$0xff] }
 0xc13   :  { %1697 = vmatpush.msra.mxu1 %v76_v49 }
 0xc14   :  { %v2623_v47 = vadd.f32 %v1548_v46, %v1546_v37  ;;  %v74_v46 = vld [vmem:[#allocation3 + $0x158] sm:$0xff]  ;;  %v73_v37 = vld [vmem:[#allocation3 + $0x150] sm:$0xff] }
 0xc15   :  { %1698 = vmatpush.msra.mxu1 %v75_v44 }
 0xc16   :  { %v1563_v19 = vmul.f32 %v1560_v56, %v2623_v47 }
 0xc17   :  { %1699 = vmatpush.msra.mxu1 %v74_v46 }
 0xc18   :  { %1568 = vrot.lane.b32.xlu0 %v1563_v19, %s2018_s2 }
 0xc19   :  { %1700 = vmatpush.msra.mxu1 %v73_v37 }
 0xc53   :  { %v1555_v45 = vpop.xlane.xlu2 %1554 }
 0xc54   :  { %v1556_v42 = vadd.f32 %v1555_v45, %v72_v3 }
 0xc56   :  { %v1578_v0 = vperm.slane %v1556_v42, 0 }
 0xc6e   :  { %v1567_v51 = vpop.permute.xlu1 %1566 }
 0xc6f   :  { %v1572_v52 = vsel %vm97_vm0, %v1567_v51, 0.0 }
 0xc70   :  { %1573 = vadd.xlane.f32.xlu1 %v1572_v52 }
 0xc8a   :  { %v1569_v30 = vpop.permute.xlu0 %1568 }
 0xc8b   :  { %v1575_v31 = vsel %vm97_vm0, %v1569_v30, 0.0 }
 0xc8c   :  { %1576 = vadd.xlane.f32.xlu0 %v1575_v31 }
 0xce3   :  { %v1574_v8 = vpop.xlane.xlu1 %1573 }
 0xce4   :  { %v1579_v55 = vadd.f32 %v1578_v0, %v1574_v8 }
 0xce6   :  { %1585 = vrot.lane.b32.xlu2 %v1579_v55, %s2022_s0 }
 0xcff   :  { %v1577_v59 = vpop.xlane.xlu0 %1576 }
 0xd00   :  { %v1580_v22 = vadd.f32 %v1578_v0, %v1577_v59 }
 0xd02   :  { %1587 = vrot.lane.b32.xlu1 %v1580_v22, %s2022_s0 }
 0xd40   :  { %v1586_v62 = vpop.permute.xlu2 %1585 }
 0xd41   :  { %v1591_v14 = vsel %vm1581_vm15, %v1586_v62, -1e+30  ;;  %v80_v62 = vld [vmem:[#allocation3 + $0x188] sm:$0xff] }
 0xd42   :  { %v1594_v61 = vsel %vm1593_vm6, %v1591_v14, -inf }
 0xd74   :  { %v1588_v34 = vpop.permute.xlu1 %1587 }
 0xd75   :  { %v1592_v35 = vsel %vm1582_vm5, %v1588_v34, -1e+30 }
 0xd76   :  { %v1595_v29 = vsel %vm1593_vm6, %v1592_v35, -inf }
 0xd77   :  { %v1596_v53 = vmax.f32 %v1594_v61, %v1595_v29 }
 0xd79   :  { %v1597_v57 = vrot.slane %v1596_v53, 4 }
 0xd7b   :  { %v1598_v4 = vmax.f32 %v1596_v53, %v1597_v57  ;;  %v84_v53 = vld [vmem:[#allocation3 + $0x1a8] sm:$0x1] }
 0xd7d   :  { %v1599_v5 = vrot.slane %v1598_v4, 2 }
 0xd7f   :  { %v1600_v7 = vmax.f32 %v1598_v4, %v1599_v5 }
 0xd81   :  { %v1601_v15 = vrot.slane %v1600_v7, 1 }
 0xd83   :  { %v1602_v12 = vmax.f32 %v1600_v7, %v1601_v15 }
 0xd85   :  { %v1603_v50 = vsub.f32 %v1591_v14, %v1602_v12  ;;  %v1604_v17 = vsub.f32 %v1592_v35, %v1602_v12  ;;  %v79_v14 = vld [vmem:[#allocation3 + $0x180] sm:$0x1] }
 0xd87   :  { %v1605_v58 = vmul.f32 1.442695, %v1603_v50  ;;  %v1607_v24 = vmul.f32 1.442695, %v1604_v17 }
 0xd89   :  { %1934 = vpow2.f32 %v1605_v58 }
 0xd8a   :  { %1936 = vpow2.f32 %v1607_v24 }
 0xd8f   :  { %v1935_v21 = vpop.eup %1934 }
 0xd90   :  { %v1937_v25 = vpop.eup %1936  ;;  %v1609_v48 = vmul.f32 %v1961_v60, %v1935_v21  ;;  %v82_v60 = vld [vmem:[#allocation3 + $0x198] sm:$0xff] }
 0xd91   :  { %v1610_v18 = vmul.f32 %v1962_v26, %v1937_v25  ;;  %v1677_v26 = vpop.f32.mrf.mxu0 }
 0xd92   :  { %v1611_v23 = vsel %vm1593_vm6, %v1609_v48, 0.0 }
 0xd93   :  { %v1612_v27 = vsel %vm1593_vm6, %v1610_v18, 0.0 }
 0xd94   :  { %v1613_v63 = vadd.f32 %v1612_v27, %v1611_v23 }
 0xd96   :  { %v1614_v28 = vrot.slane %v1613_v63, 4 }
 0xd98   :  { %v1615_v2 = vadd.f32 %v1614_v28, %v1613_v63 }
 0xd9a   :  { %v1616_v10 = vrot.slane %v1615_v2, 2 }
 0xd9c   :  { %v1617_v32 = vadd.f32 %v1616_v10, %v1615_v2 }
 0xd9e   :  { %v1618_v6 = vrot.slane %v1617_v32, 1 }
 0xda0   :  { %v1619_v41 = vadd.f32 %v1618_v6, %v1617_v32 }
 0xda2   :  { %1938 = vrcp.f32 %v1619_v41  ;;  %v1631_v40 = vand.u32 2147483648, %v1619_v41  ;;  %v1629_v1 = vand.u32 2147483647, %v1619_v41  ;;  %vm1625_vm8 = vweird.f32 %v1619_v41 }
 0xda4   :  { %v1632_v20 = vor.u32 1.1754944e-38, %v1631_v40  ;;  %vm1630_vm3 = vcmp.eq.f32.partialorder %v1629_v1, 8.507059e+37 }
 0xda8   :  { %v1939_v9 = vpop.eup %1938 }
 0xda9   :  { %v1621_v38 = vmul.f32 %v1939_v9, %v1619_v41  ;;  %vm1626_vm7 = vweird.f32 %v1939_v9 }
 0xdaa   :  { %vm1627_vm1 = vmor %vm1625_vm8, %vm1626_vm7 }
 0xdab   :  { %v1622_v33 = vsub.f32 1.0, %v1621_v38 }
 0xdad   :  { %v1623_v54 = vmul.f32 %v1939_v9, %v1622_v33 }
 0xdaf   :  { %v1624_v56 = vadd.f32 %v1939_v9, %v1623_v54 }
 0xdb1   :  { %v1628_v11 = vsel %vm1627_vm1, %v1939_v9, %v1624_v56 }
 0xdb2   :  { %v1633_v43 = vsel %vm1630_vm3, %v1632_v20, %v1628_v11 }
 0xdb3   :  { %v1635_v13 = vmul.f32 %v1633_v43, %v1610_v18  ;;  %v1634_v39 = vmul.f32 %v1633_v43, %v1609_v48 }
 0xdb5   :  { %1643 = vperm.xlu2 %1831, %v1635_v13   ;;  %1638 = vperm.xlu0 %1830, %v1634_v39  }
 0xe0f   :  { %v1644_v19 = vpop.permute.xlu2 %1643 }
 0xe10   :  { %v1647_v51 = vmul.f32 %v1644_v19, %v2623_v47  ;;  %v83_v47 = vld [vmem:[#allocation3 + $0x1a0] sm:$0xff] }
 0xe11   :  { %1722 = vmatpush.msra.mxu0 %v83_v47 }
 0xe12   :  { %v1649_v31 = vsel %vm352_vm2, %v1647_v51, 0.0 }
 0xe13   :  { %1723 = vmatpush.msra.mxu0 %v82_v60 }
 0xe27   :  { %v1639_v52 = vpop.permute.xlu0 %1638 }
 0xe28   :  { %v1646_v30 = vmul.f32 %v1639_v52, %v2618_v16  ;;  %v81_v16 = vld [vmem:[#allocation3 + $0x190] sm:$0xff] }
 0xe29   :  { %1724 = vmatpush.msra.mxu0 %v81_v16 }
 0xe2a   :  { %v1648_v3 = vsel %vm352_vm2, %v1646_v30, 0.0  ;;  %vm1734_vm2 = vcmask 73728  }
 0xe2b   :  { %v1650_v45 = vadd.f32 %v1649_v31, %v1648_v3  ;;  %1725 = vmatpush.msra.mxu0 %v80_v62 }
 0xe2d   :  { %v1651_v42 = vrot.slane %v1650_v45, 4 }
 0xe2f   :  { %v1652_v0 = vadd.f32 %v1651_v42, %v1650_v45 }
 0xe31   :  { %v1653_v8 = vrot.slane %v1652_v0, 2 }
 0xe33   :  { %v1654_v55 = vadd.f32 %v1653_v8, %v1652_v0 }
 0xe35   :  { %v1655_v59 = vrot.slane %v1654_v55, 1 }
 0xe37   :  { %v1656_v22 = vadd.f32 %v1655_v59, %v1654_v55 }
 0xe39   :  { %1681 = vrot.lane.b32.xlu1 %v1656_v22, %s2018_s2  ;;  %s1741_s2 = sshll.u32 %s2024_s1, 4  ;;  %s1742_s2 = int_to_ptr.vmem [resolvable:$true] %s1741_s2 }
 0xeab   :  { %v1682_v36 = vpop.permute.xlu1 %1681 }
 0xeac   :  { %1786 = vmatmul.msk.f32.vlgmr.msra.gmra.mxu1 %vm97_vm0, %v1682_v36 }
 0xf29   :  { %v1702_v34 = vpop.f32.mrf.mxu1 }
 0xf2a   :  { %v1703_v35 = vadd.f32 %v1702_v34, %v1677_v26 }
 0xf2c   :  { %v1705_v61 = vadd.f32 %v1703_v35, %v79_v14 }
 0xf2e   :  { %1940 = vtanh.f32 %v1705_v61 }
 0xf34   :  { %v1941_v29 = vpop.eup %1940 }
 0xf35   :  { %1787 = vmatmul.msk.f32.vlgmr.msra.gmra.mxu0 %vm97_vm0, %v1941_v29 }
 0xfb2   :  { %v1727_v57 = vpop.f32.mrf.mxu0 }
 0xfb3   :  { %v1728_v4 = vadd.f32 %v1727_v57, %v84_v53 }
 0xfb5   :  { %v1730_v5 = vmul.f32 0.5, %v1728_v4 }
 0xfb7   :  { %1942 = vtanh.f32 %v1730_v5 }
 0xfbd   :  { %v1943_v7 = vpop.eup %1942 }
 0xfbe   :  { %v1732_v15 = vadd.f32 1.0, %v1943_v7 }
 0xfc0   :  { %v1733_v12 = vmul.f32 0.5, %v1732_v15 }
 0xfc2   :  { %1735 = vst.msk [vmem:[#allocation6] sm:$0x1] %vm1734_vm2, %v1733_v12 }
 0xfc3   :  { %1746 = dma.vmem_to_hbm [thread:$0]  %s1742_s2, 16, %s1744_s13, [#allocation5]  }
 0xfc4   :  { %2013 = dma.done.wait [#allocation5], 16  }
 0xfc5   :  { %2014 = vsyncadd [#allocation5], 4294967280 }
 0xfc6   :  { %1751 = vsyncpa [#allocation4], 1 }
 0xfc7   :  { %1752 = vsyncpa [#allocation5], 1 }

</bundles_post_ra>
